<compile_context>
chip_gen: v6e
topology: v6e:2x2x1
jax: 0.10.0
libtpu: 0.0.40
codegen_flags: <defaults>
</compile_context>

<pallas_src>
import numpy as np
import jax
import jax.numpy as jnp
from jax.experimental import pallas as pl
from jax.experimental.pallas import tpu as pltpu

NUM_BLOCKS = 8      # number of repeated_block()s in the module
C = 32              # hidden channel width of every block
MIN_W = 128         # lane-width floor: keep the length axis a multiple of one vreg row


def convnet_kernel(x_ref, wcat_ref, b_ref, pe_ref, wfc_ref, seg_ref, bfc_ref, out_ref):
    # x_ref   : (1, C, M0)    activations for one batch block; M0 = Bb*L0. The Bb batch
    #                         elements live in contiguous length-L0 lane segments.
    # wcat_ref: (8, C, 3C)    fused conv weights, wcat[l, co, k*C+ci] == torch_w[co, ci, k]
    # b_ref   : (8, C, 1)     conv biases
    # pe_ref  : (M0, M0//2)   even-column selection matrix, pe[i, j] = (i == 2j)
    # wfc_ref : (C, Wf)       fc weight (torch view(B,-1) order) per batch segment, 0-padded
    # seg_ref : (Wf, Bb)      per-segment column-sum matrix (1 where live col // fl == b)
    # bfc_ref : (1, 1)        fc bias
    a = x_ref[0]                                   # (C, M0) f32
    M0 = a.shape[-1]
    Bb = seg_ref.shape[-1]
    L = M0 // Bb                                   # live per-segment length (power of two)
    W = M0                                         # physical lane width of `a`

    for layer in range(NUM_BLOCKS):
        # Within-segment position of every lane (segments are contiguous, length L,
        # starting at multiples of L; L is a power of two).
        local = jax.lax.broadcasted_iota(jnp.int32, (C, W), 1) & (L - 1)
        # x[:, j-1] / x[:, j+1] via XLU lane rotations; zero the segment edges so the
        # circular wrap reproduces Conv1d's zero padding and never leaks across batch
        # segments (or into the dead right-padding of the fixed-width tail layers).
        x_m1 = jnp.where(local == 0, 0.0, pltpu.roll(a, 1, axis=1))
        x_p1 = jnp.where(local == L - 1, 0.0, pltpu.roll(a, W - 1, axis=1))   # shift -1
        # Conv1d(k=3, pad=1): one fused channel-mixing matmul with K = 3*C.
        stacked = jnp.concatenate([x_m1, a, x_p1], axis=0)                    # (3C, W)
        y = jnp.dot(wcat_ref[layer], stacked, preferred_element_type=jnp.float32)
        y = jnp.maximum(y + b_ref[layer], 0.0)                                # bias + ReLU
        # MaxPool1d(2): adjacent-column max on the VPU ...
        y = jnp.maximum(y, pltpu.roll(y, W - 1, axis=1))                      # max(y[j], y[j+1])
        # ... then keep the even columns with one selection matmul.  When W_next == W
        # (lane-width floor reached) the live data is compacted into the first half of
        # the lanes and the remaining columns become exact zeros.
        W_next = max(W // 2, MIN_W)
        a = jnp.dot(y, pe_ref[:W, :W_next], preferred_element_type=jnp.float32)
        W = W_next
        L //= 2

    # fc + sigmoid: one logit per live batch segment.
    rows = jnp.sum(a * wfc_ref[...], axis=0, keepdims=True)                   # (1, Wf)
    logits = jnp.dot(rows, seg_ref[...], preferred_element_type=jnp.float32)  # (1, Bb)
    out_ref[0] = jax.nn.sigmoid(logits + bfc_ref[...])


def convnet_forward(x, w_taps, biases, wfc_r, bfc, batch_block=None):
    """x: (B, seq_len, in_channels) float32 — same calling convention as the torch module."""
    B, L0, cin = x.shape
    assert L0 % (2 ** NUM_BLOCKS) == 0
    assert (L0 & (L0 - 1)) == 0, "segment-edge masking assumes power-of-two sequence length"
    # TODO(synk): the torch default sequence_length=600 (odd intermediate lengths under
    # MaxPool1d floor-division) is not supported; this kernel assumes power-of-two lengths.
    fl = L0 // (2 ** NUM_BLOCKS)          # final per-element sequence length

    if batch_block is None:
        # Fold a few batch elements into the lane axis but keep >=2 grid steps so both
        # v7x TensorCores get work, and keep the (Bb*L0)x(Bb*L0/2) pooling matrix modest.
        batch_block = max(1, min(max(1, B // 2), max(1, 2048 // L0)))
        while B % batch_block:
            batch_block -= 1
    Bb = batch_block
    assert B % Bb == 0
    G = B // Bb
    M0 = Bb * L0
    Wf = max(M0 >> NUM_BLOCKS, MIN_W)     # final physical lane width inside the kernel

    # ---- plain-JAX glue ---------------------------------------------------------------
    # NCL layout, zero-pad input channels up to C, fold Bb batch elements into lanes.
    a = jnp.transpose(x, (0, 2, 1))                          # (B, cin, L0)
    a = jnp.pad(a, ((0, 0), (0, C - cin), (0, 0)))           # (B, C,   L0)
    a = a.reshape(G, Bb, C, L0).transpose(0, 2, 1, 3).reshape(G, C, M0)

    # Fuse the 3 conv taps along the contraction axis: (8, C, 3C).
    w_cat = jnp.transpose(w_taps, (0, 2, 1, 3)).reshape(NUM_BLOCKS, C, 3 * C)

    # Even-column selection (MaxPool1d(2) downsample), shared by all layers via slicing.
    ii = jnp.arange(M0)
    jj = jnp.arange(M0 // 2)
    pe = (ii[:, None] == 2 * jj[None, :]).astype(jnp.float32)   # (M0, M0//2)

    # fc weight tiled once per batch segment + per-segment column-sum matrix,
    # zero-padded out to the kernel's final physical lane width Wf.
    wfc_pad = jnp.zeros((C, Wf), jnp.float32).at[:, :Bb * fl].set(jnp.tile(wfc_r, (1, Bb)))
    seg = (jnp.arange(Bb * fl)[:, None] // fl ==
           jnp.arange(Bb)[None, :]).astype(jnp.float32)         # (Bb*fl, Bb)
    seg_pad = jnp.zeros((Wf, Bb), jnp.float32).at[:Bb * fl, :].set(seg)

    out = pl.pallas_call(
        convnet_kernel,
        out_shape=jax.ShapeDtypeStruct((G, 1, Bb), jnp.float32),
        grid_spec=pltpu.PrefetchScalarGridSpec(
            num_scalar_prefetch=0,
            grid=(G,),
            in_specs=[
                pl.BlockSpec((1, C, M0), lambda g: (g, 0, 0)),
                pl.BlockSpec((NUM_BLOCKS, C, 3 * C), lambda g: (0, 0, 0)),
                pl.BlockSpec((NUM_BLOCKS, C, 1), lambda g: (0, 0, 0)),
                pl.BlockSpec((M0, M0 // 2), lambda g: (0, 0)),
                pl.BlockSpec((C, Wf), lambda g: (0, 0)),
                pl.BlockSpec((Wf, Bb), lambda g: (0, 0)),
                pl.BlockSpec((1, 1), lambda g: (0, 0)),
            ],
            out_specs=pl.BlockSpec((1, 1, Bb), lambda g: (g, 0, 0)),
        ),
        compiler_params=pltpu.CompilerParams(
            dimension_semantics=("parallel",)),
    )(a, w_cat, biases, pe, wfc_pad, seg_pad, bfc)
    return out.reshape(B, 1)      # matches torch output shape (B, num_classes=1)


def reference_forward(x, w_taps, biases, wfc_r, bfc):
    """Pure-JAX reference matching the PyTorch forward (for a correctness check)."""
    B, L0, cin = x.shape
    a = jnp.transpose(x, (0, 2, 1))
    a = jnp.pad(a, ((0, 0), (0, C - cin), (0, 0)))
    hp = jax.lax.Precision.HIGHEST
    for layer in range(NUM_BLOCKS):
        L = a.shape[-1]
        ap = jnp.pad(a, ((0, 0), (0, 0), (1, 1)))
        y = biases[layer][None]
        for k in range(3):
            y = y + jnp.einsum('oc,bcl->bol', w_taps[layer, k], ap[:, :, k:k + L],
                               precision=hp)
        y = jax.nn.relu(y)
        a = jnp.max(y.reshape(B, C, L // 2, 2), axis=-1)
    logits = jnp.sum(a * wfc_r[None], axis=(1, 2)) + bfc[0, 0]
    return jax.nn.sigmoid(logits)[:, None]


if __name__ == "__main__":
    B = 4                    # small batch; batch_block=2 -> grid of 2 "parallel" steps
    SEQ_LEN = 512            # must be divisible by 2**8 (sequence_length of the module)
    IN_CH = 1                # input_channels of the module
    FINAL_LEN = SEQ_LEN // (2 ** NUM_BLOCKS)

    key = jax.random.PRNGKey(0)
    k1, k2, k3, k4, k5 = jax.random.split(key, 5)

    # Deterministic synthetic parameters (shapes implied by the module's __init__).
    w_taps = 0.1 * jax.random.normal(k1, (NUM_BLOCKS, 3, C, C), jnp.float32)
    # First conv has in_channels=1: zero out the unused input-channel slots.
    ci_mask = (jnp.arange(C) < IN_CH).astype(jnp.float32)
    w_taps = w_taps.at[0].set(w_taps[0] * ci_mask[None, None, :])
    biases = 0.05 * jax.random.normal(k2, (NUM_BLOCKS, C, 1), jnp.float32)
    wfc = 0.3 * jax.random.normal(k3, (1, C * FINAL_LEN), jnp.float32)   # nn.Linear weight
    wfc_r = wfc.reshape(C, FINAL_LEN)       # row-major == torch x.view(B, -1) order
    bfc = 0.05 * jax.random.normal(k4, (1,), jnp.float32).reshape(1, 1)

    x = jax.random.normal(k5, (B, SEQ_LEN, IN_CH), jnp.float32)

    out = convnet_forward(x, w_taps, biases, wfc_r, bfc, batch_block=2)
    out = jax.block_until_ready(out)

    ref = reference_forward(x, w_taps, biases, wfc_r, bfc)
    np.testing.assert_allclose(np.asarray(out), np.asarray(ref), atol=2e-3, rtol=2e-3)

    print("KERNEL_OK")
</pallas_src>

<mosaic_0001>
module attributes {stable_mosaic.version = 11 : i64} {
  func.func @convnet_kernel(%arg0: i32, %arg1: memref<1x32x1024xf32, #tpu.memory_space<vmem>>, %arg2: memref<8x32x96xf32, #tpu.memory_space<vmem>>, %arg3: memref<8x32x1xf32, #tpu.memory_space<vmem>>, %arg4: memref<1024x512xf32, #tpu.memory_space<vmem>>, %arg5: memref<32x128xf32, #tpu.memory_space<vmem>>, %arg6: memref<128x2xf32, #tpu.memory_space<vmem>>, %arg7: memref<1x1xf32, #tpu.memory_space<vmem>>, %arg8: memref<1x1x2xf32, #tpu.memory_space<vmem>>) attributes {dimension_semantics = [#tpu.dimension_semantics<parallel>], iteration_bounds = array<i64: 2>, scalar_prefetch = 0 : i64, scratch_operands = 0 : i64, tpu.core_type = #tpu.core_type<tc>, window_params = [{transform_indices = @transform_0, window_bounds = array<i64: 1, 32, 1024>}, {pipeline_mode = #tpu.pipeline_mode<synchronous>, transform_indices = @transform_1, window_bounds = array<i64: 8, 32, 96>}, {pipeline_mode = #tpu.pipeline_mode<synchronous>, transform_indices = @transform_2, window_bounds = array<i64: 8, 32, 1>}, {pipeline_mode = #tpu.pipeline_mode<synchronous>, transform_indices = @transform_3, window_bounds = array<i64: 1024, 512>}, {pipeline_mode = #tpu.pipeline_mode<synchronous>, transform_indices = @transform_4, window_bounds = array<i64: 32, 128>}, {pipeline_mode = #tpu.pipeline_mode<synchronous>, transform_indices = @transform_5, window_bounds = array<i64: 128, 2>}, {pipeline_mode = #tpu.pipeline_mode<synchronous>, transform_indices = @transform_6, window_bounds = array<i64: 1, 1>}, {transform_indices = @transform_7, window_bounds = array<i64: 1, 1, 2>}]} {
    %c0 = arith.constant 0 : index
    %c0_0 = arith.constant 0 : index
    %c0_1 = arith.constant 0 : index
    %0 = vector.load %arg1[%c0, %c0_0, %c0_1] : memref<1x32x1024xf32, #tpu.memory_space<vmem>>, vector<1x32x1024xf32>
    %1 = vector.shape_cast %0 : vector<1x32x1024xf32> to vector<32x1024xf32>
    %2 = tpu.iota {dimensions = array<i32: 1>} : vector<32x1024xi32>
    %c511_i32 = arith.constant 511 : i32
    %3 = vector.broadcast %c511_i32 : i32 to vector<32x1024xi32>
    %4 = arith.andi %2, %3 : vector<32x1024xi32>
    %c0_i32 = arith.constant 0 : i32
    %5 = vector.broadcast %c0_i32 : i32 to vector<32x1024xi32>
    %6 = arith.cmpi eq, %4, %5 : vector<32x1024xi32>
    %c1_i32 = arith.constant 1 : i32
    %7 = tpu.dynamic_rotate %1 by %c1_i32 dim 1 : vector<32x1024xf32>, i32 -> vector<32x1024xf32>
    %cst = arith.constant 0.000000e+00 : f32
    %8 = vector.broadcast %cst : f32 to vector<32x1024xf32>
    %9 = arith.select %6, %8, %7 : vector<32x1024xi1>, vector<32x1024xf32>
    %c511_i32_2 = arith.constant 511 : i32
    %10 = vector.broadcast %c511_i32_2 : i32 to vector<32x1024xi32>
    %11 = arith.cmpi eq, %4, %10 : vector<32x1024xi32>
    %c1023_i32 = arith.constant 1023 : i32
    %12 = tpu.dynamic_rotate %1 by %c1023_i32 dim 1 : vector<32x1024xf32>, i32 -> vector<32x1024xf32>
    %cst_3 = arith.constant 0.000000e+00 : f32
    %13 = vector.broadcast %cst_3 : f32 to vector<32x1024xf32>
    %14 = arith.select %11, %13, %12 : vector<32x1024xi1>, vector<32x1024xf32>
    %15 = tpu.concatenate %9, %1, %14 in 0 : vector<32x1024xf32>, vector<32x1024xf32>, vector<32x1024xf32> -> vector<96x1024xf32>
    %c0_4 = arith.constant 0 : index
    %c0_5 = arith.constant 0 : index
    %c0_6 = arith.constant 0 : index
    %16 = vector.load %arg2[%c0_4, %c0_5, %c0_6] : memref<8x32x96xf32, #tpu.memory_space<vmem>>, vector<1x32x96xf32>
    %17 = vector.shape_cast %16 : vector<1x32x96xf32> to vector<32x96xf32>
    %cst_7 = arith.constant dense<0.000000e+00> : vector<32x1024xf32>
    %18 = tpu.matmul %17, %15, %cst_7 {dimension_numbers = #tpu.dot_dimension_numbers<[1], [0], [0], [1], [0, 0, 1, 1], [], []>} : vector<32x96xf32>, vector<96x1024xf32>, vector<32x1024xf32> -> vector<32x1024xf32>
    %c0_8 = arith.constant 0 : index
    %c0_9 = arith.constant 0 : index
    %c0_10 = arith.constant 0 : index
    %19 = vector.load %arg3[%c0_8, %c0_9, %c0_10] : memref<8x32x1xf32, #tpu.memory_space<vmem>>, vector<1x32x1xf32>
    %20 = vector.shape_cast %19 : vector<1x32x1xf32> to vector<32x1xf32>
    %21 = vector.broadcast %20 : vector<32x1xf32> to vector<32x1024xf32>
    %22 = arith.addf %18, %21 : vector<32x1024xf32>
    %cst_11 = arith.constant 0.000000e+00 : f32
    %23 = vector.broadcast %cst_11 : f32 to vector<32x1024xf32>
    %24 = arith.maximumf %22, %23 : vector<32x1024xf32>
    %c1023_i32_12 = arith.constant 1023 : i32
    %25 = tpu.dynamic_rotate %24 by %c1023_i32_12 dim 1 : vector<32x1024xf32>, i32 -> vector<32x1024xf32>
    %26 = arith.maximumf %24, %25 : vector<32x1024xf32>
    %c0_13 = arith.constant 0 : index
    %c0_14 = arith.constant 0 : index
    %27 = vector.load %arg4[%c0_13, %c0_14] : memref<1024x512xf32, #tpu.memory_space<vmem>>, vector<1024x512xf32>
    %cst_15 = arith.constant dense<0.000000e+00> : vector<32x512xf32>
    %28 = tpu.matmul %26, %27, %cst_15 {dimension_numbers = #tpu.dot_dimension_numbers<[1], [0], [0], [1], [0, 0, 1, 1], [], []>} : vector<32x1024xf32>, vector<1024x512xf32>, vector<32x512xf32> -> vector<32x512xf32>
    %29 = tpu.iota {dimensions = array<i32: 1>} : vector<32x512xi32>
    %c255_i32 = arith.constant 255 : i32
    %30 = vector.broadcast %c255_i32 : i32 to vector<32x512xi32>
    %31 = arith.andi %29, %30 : vector<32x512xi32>
    %c0_i32_16 = arith.constant 0 : i32
    %32 = vector.broadcast %c0_i32_16 : i32 to vector<32x512xi32>
    %33 = arith.cmpi eq, %31, %32 : vector<32x512xi32>
    %c1_i32_17 = arith.constant 1 : i32
    %34 = tpu.dynamic_rotate %28 by %c1_i32_17 dim 1 : vector<32x512xf32>, i32 -> vector<32x512xf32>
    %cst_18 = arith.constant 0.000000e+00 : f32
    %35 = vector.broadcast %cst_18 : f32 to vector<32x512xf32>
    %36 = arith.select %33, %35, %34 : vector<32x512xi1>, vector<32x512xf32>
    %c255_i32_19 = arith.constant 255 : i32
    %37 = vector.broadcast %c255_i32_19 : i32 to vector<32x512xi32>
    %38 = arith.cmpi eq, %31, %37 : vector<32x512xi32>
    %c511_i32_20 = arith.constant 511 : i32
    %39 = tpu.dynamic_rotate %28 by %c511_i32_20 dim 1 : vector<32x512xf32>, i32 -> vector<32x512xf32>
    %cst_21 = arith.constant 0.000000e+00 : f32
    %40 = vector.broadcast %cst_21 : f32 to vector<32x512xf32>
    %41 = arith.select %38, %40, %39 : vector<32x512xi1>, vector<32x512xf32>
    %42 = tpu.concatenate %36, %28, %41 in 0 : vector<32x512xf32>, vector<32x512xf32>, vector<32x512xf32> -> vector<96x512xf32>
    %c1 = arith.constant 1 : index
    %c0_22 = arith.constant 0 : index
    %c0_23 = arith.constant 0 : index
    %43 = vector.load %arg2[%c1, %c0_22, %c0_23] : memref<8x32x96xf32, #tpu.memory_space<vmem>>, vector<1x32x96xf32>
    %44 = vector.shape_cast %43 : vector<1x32x96xf32> to vector<32x96xf32>
    %cst_24 = arith.constant dense<0.000000e+00> : vector<32x512xf32>
    %45 = tpu.matmul %44, %42, %cst_24 {dimension_numbers = #tpu.dot_dimension_numbers<[1], [0], [0], [1], [0, 0, 1, 1], [], []>} : vector<32x96xf32>, vector<96x512xf32>, vector<32x512xf32> -> vector<32x512xf32>
    %c1_25 = arith.constant 1 : index
    %c0_26 = arith.constant 0 : index
    %c0_27 = arith.constant 0 : index
    %46 = vector.load %arg3[%c1_25, %c0_26, %c0_27] : memref<8x32x1xf32, #tpu.memory_space<vmem>>, vector<1x32x1xf32>
    %47 = vector.shape_cast %46 : vector<1x32x1xf32> to vector<32x1xf32>
    %48 = vector.broadcast %47 : vector<32x1xf32> to vector<32x512xf32>
    %49 = arith.addf %45, %48 : vector<32x512xf32>
    %cst_28 = arith.constant 0.000000e+00 : f32
    %50 = vector.broadcast %cst_28 : f32 to vector<32x512xf32>
    %51 = arith.maximumf %49, %50 : vector<32x512xf32>
    %c511_i32_29 = arith.constant 511 : i32
    %52 = tpu.dynamic_rotate %51 by %c511_i32_29 dim 1 : vector<32x512xf32>, i32 -> vector<32x512xf32>
    %53 = arith.maximumf %51, %52 : vector<32x512xf32>
    %c0_30 = arith.constant 0 : index
    %c0_31 = arith.constant 0 : index
    %54 = vector.load %arg4[%c0_30, %c0_31] : memref<1024x512xf32, #tpu.memory_space<vmem>>, vector<512x256xf32>
    %cst_32 = arith.constant dense<0.000000e+00> : vector<32x256xf32>
    %55 = tpu.matmul %53, %54, %cst_32 {dimension_numbers = #tpu.dot_dimension_numbers<[1], [0], [0], [1], [0, 0, 1, 1], [], []>} : vector<32x512xf32>, vector<512x256xf32>, vector<32x256xf32> -> vector<32x256xf32>
    %56 = tpu.iota {dimensions = array<i32: 1>} : vector<32x256xi32>
    %c127_i32 = arith.constant 127 : i32
    %57 = vector.broadcast %c127_i32 : i32 to vector<32x256xi32>
    %58 = arith.andi %56, %57 : vector<32x256xi32>
    %c0_i32_33 = arith.constant 0 : i32
    %59 = vector.broadcast %c0_i32_33 : i32 to vector<32x256xi32>
    %60 = arith.cmpi eq, %58, %59 : vector<32x256xi32>
    %c1_i32_34 = arith.constant 1 : i32
    %61 = tpu.dynamic_rotate %55 by %c1_i32_34 dim 1 : vector<32x256xf32>, i32 -> vector<32x256xf32>
    %cst_35 = arith.constant 0.000000e+00 : f32
    %62 = vector.broadcast %cst_35 : f32 to vector<32x256xf32>
    %63 = arith.select %60, %62, %61 : vector<32x256xi1>, vector<32x256xf32>
    %c127_i32_36 = arith.constant 127 : i32
    %64 = vector.broadcast %c127_i32_36 : i32 to vector<32x256xi32>
    %65 = arith.cmpi eq, %58, %64 : vector<32x256xi32>
    %c255_i32_37 = arith.constant 255 : i32
    %66 = tpu.dynamic_rotate %55 by %c255_i32_37 dim 1 : vector<32x256xf32>, i32 -> vector<32x256xf32>
    %cst_38 = arith.constant 0.000000e+00 : f32
    %67 = vector.broadcast %cst_38 : f32 to vector<32x256xf32>
    %68 = arith.select %65, %67, %66 : vector<32x256xi1>, vector<32x256xf32>
    %69 = tpu.concatenate %63, %55, %68 in 0 : vector<32x256xf32>, vector<32x256xf32>, vector<32x256xf32> -> vector<96x256xf32>
    %c2 = arith.constant 2 : index
    %c0_39 = arith.constant 0 : index
    %c0_40 = arith.constant 0 : index
    %70 = vector.load %arg2[%c2, %c0_39, %c0_40] : memref<8x32x96xf32, #tpu.memory_space<vmem>>, vector<1x32x96xf32>
    %71 = vector.shape_cast %70 : vector<1x32x96xf32> to vector<32x96xf32>
    %cst_41 = arith.constant dense<0.000000e+00> : vector<32x256xf32>
    %72 = tpu.matmul %71, %69, %cst_41 {dimension_numbers = #tpu.dot_dimension_numbers<[1], [0], [0], [1], [0, 0, 1, 1], [], []>} : vector<32x96xf32>, vector<96x256xf32>, vector<32x256xf32> -> vector<32x256xf32>
    %c2_42 = arith.constant 2 : index
    %c0_43 = arith.constant 0 : index
    %c0_44 = arith.constant 0 : index
    %73 = vector.load %arg3[%c2_42, %c0_43, %c0_44] : memref<8x32x1xf32, #tpu.memory_space<vmem>>, vector<1x32x1xf32>
    %74 = vector.shape_cast %73 : vector<1x32x1xf32> to vector<32x1xf32>
    %75 = vector.broadcast %74 : vector<32x1xf32> to vector<32x256xf32>
    %76 = arith.addf %72, %75 : vector<32x256xf32>
    %cst_45 = arith.constant 0.000000e+00 : f32
    %77 = vector.broadcast %cst_45 : f32 to vector<32x256xf32>
    %78 = arith.maximumf %76, %77 : vector<32x256xf32>
    %c255_i32_46 = arith.constant 255 : i32
    %79 = tpu.dynamic_rotate %78 by %c255_i32_46 dim 1 : vector<32x256xf32>, i32 -> vector<32x256xf32>
    %80 = arith.maximumf %78, %79 : vector<32x256xf32>
    %c0_47 = arith.constant 0 : index
    %c0_48 = arith.constant 0 : index
    %81 = vector.load %arg4[%c0_47, %c0_48] : memref<1024x512xf32, #tpu.memory_space<vmem>>, vector<256x128xf32>
    %cst_49 = arith.constant dense<0.000000e+00> : vector<32x128xf32>
    %82 = tpu.matmul %80, %81, %cst_49 {dimension_numbers = #tpu.dot_dimension_numbers<[1], [0], [0], [1], [0, 0, 1, 1], [], []>} : vector<32x256xf32>, vector<256x128xf32>, vector<32x128xf32> -> vector<32x128xf32>
    %83 = tpu.iota {dimensions = array<i32: 1>} : vector<32x128xi32>
    %c63_i32 = arith.constant 63 : i32
    %84 = vector.broadcast %c63_i32 : i32 to vector<32x128xi32>
    %85 = arith.andi %83, %84 : vector<32x128xi32>
    %c0_i32_50 = arith.constant 0 : i32
    %86 = vector.broadcast %c0_i32_50 : i32 to vector<32x128xi32>
    %87 = arith.cmpi eq, %85, %86 : vector<32x128xi32>
    %c1_i32_51 = arith.constant 1 : i32
    %88 = tpu.dynamic_rotate %82 by %c1_i32_51 dim 1 : vector<32x128xf32>, i32 -> vector<32x128xf32>
    %cst_52 = arith.constant 0.000000e+00 : f32
    %89 = vector.broadcast %cst_52 : f32 to vector<32x128xf32>
    %90 = arith.select %87, %89, %88 : vector<32x128xi1>, vector<32x128xf32>
    %c63_i32_53 = arith.constant 63 : i32
    %91 = vector.broadcast %c63_i32_53 : i32 to vector<32x128xi32>
    %92 = arith.cmpi eq, %85, %91 : vector<32x128xi32>
    %c127_i32_54 = arith.constant 127 : i32
    %93 = tpu.dynamic_rotate %82 by %c127_i32_54 dim 1 : vector<32x128xf32>, i32 -> vector<32x128xf32>
    %cst_55 = arith.constant 0.000000e+00 : f32
    %94 = vector.broadcast %cst_55 : f32 to vector<32x128xf32>
    %95 = arith.select %92, %94, %93 : vector<32x128xi1>, vector<32x128xf32>
    %96 = tpu.concatenate %90, %82, %95 in 0 : vector<32x128xf32>, vector<32x128xf32>, vector<32x128xf32> -> vector<96x128xf32>
    %c3 = arith.constant 3 : index
    %c0_56 = arith.constant 0 : index
    %c0_57 = arith.constant 0 : index
    %97 = vector.load %arg2[%c3, %c0_56, %c0_57] : memref<8x32x96xf32, #tpu.memory_space<vmem>>, vector<1x32x96xf32>
    %98 = vector.shape_cast %97 : vector<1x32x96xf32> to vector<32x96xf32>
    %cst_58 = arith.constant dense<0.000000e+00> : vector<32x128xf32>
    %99 = tpu.matmul %98, %96, %cst_58 {dimension_numbers = #tpu.dot_dimension_numbers<[1], [0], [0], [1], [0, 0, 1, 1], [], []>} : vector<32x96xf32>, vector<96x128xf32>, vector<32x128xf32> -> vector<32x128xf32>
    %c3_59 = arith.constant 3 : index
    %c0_60 = arith.constant 0 : index
    %c0_61 = arith.constant 0 : index
    %100 = vector.load %arg3[%c3_59, %c0_60, %c0_61] : memref<8x32x1xf32, #tpu.memory_space<vmem>>, vector<1x32x1xf32>
    %101 = vector.shape_cast %100 : vector<1x32x1xf32> to vector<32x1xf32>
    %102 = vector.broadcast %101 : vector<32x1xf32> to vector<32x128xf32>
    %103 = arith.addf %99, %102 : vector<32x128xf32>
    %cst_62 = arith.constant 0.000000e+00 : f32
    %104 = vector.broadcast %cst_62 : f32 to vector<32x128xf32>
    %105 = arith.maximumf %103, %104 : vector<32x128xf32>
    %c127_i32_63 = arith.constant 127 : i32
    %106 = tpu.dynamic_rotate %105 by %c127_i32_63 dim 1 : vector<32x128xf32>, i32 -> vector<32x128xf32>
    %107 = arith.maximumf %105, %106 : vector<32x128xf32>
    %c0_64 = arith.constant 0 : index
    %c0_65 = arith.constant 0 : index
    %108 = vector.load %arg4[%c0_64, %c0_65] : memref<1024x512xf32, #tpu.memory_space<vmem>>, vector<128x128xf32>
    %cst_66 = arith.constant dense<0.000000e+00> : vector<32x128xf32>
    %109 = tpu.matmul %107, %108, %cst_66 {dimension_numbers = #tpu.dot_dimension_numbers<[1], [0], [0], [1], [0, 0, 1, 1], [], []>} : vector<32x128xf32>, vector<128x128xf32>, vector<32x128xf32> -> vector<32x128xf32>
    %110 = tpu.iota {dimensions = array<i32: 1>} : vector<32x128xi32>
    %c31_i32 = arith.constant 31 : i32
    %111 = vector.broadcast %c31_i32 : i32 to vector<32x128xi32>
    %112 = arith.andi %110, %111 : vector<32x128xi32>
    %c0_i32_67 = arith.constant 0 : i32
    %113 = vector.broadcast %c0_i32_67 : i32 to vector<32x128xi32>
    %114 = arith.cmpi eq, %112, %113 : vector<32x128xi32>
    %c1_i32_68 = arith.constant 1 : i32
    %115 = tpu.dynamic_rotate %109 by %c1_i32_68 dim 1 : vector<32x128xf32>, i32 -> vector<32x128xf32>
    %cst_69 = arith.constant 0.000000e+00 : f32
    %116 = vector.broadcast %cst_69 : f32 to vector<32x128xf32>
    %117 = arith.select %114, %116, %115 : vector<32x128xi1>, vector<32x128xf32>
    %c31_i32_70 = arith.constant 31 : i32
    %118 = vector.broadcast %c31_i32_70 : i32 to vector<32x128xi32>
    %119 = arith.cmpi eq, %112, %118 : vector<32x128xi32>
    %c127_i32_71 = arith.constant 127 : i32
    %120 = tpu.dynamic_rotate %109 by %c127_i32_71 dim 1 : vector<32x128xf32>, i32 -> vector<32x128xf32>
    %cst_72 = arith.constant 0.000000e+00 : f32
    %121 = vector.broadcast %cst_72 : f32 to vector<32x128xf32>
    %122 = arith.select %119, %121, %120 : vector<32x128xi1>, vector<32x128xf32>
    %123 = tpu.concatenate %117, %109, %122 in 0 : vector<32x128xf32>, vector<32x128xf32>, vector<32x128xf32> -> vector<96x128xf32>
    %c4 = arith.constant 4 : index
    %c0_73 = arith.constant 0 : index
    %c0_74 = arith.constant 0 : index
    %124 = vector.load %arg2[%c4, %c0_73, %c0_74] : memref<8x32x96xf32, #tpu.memory_space<vmem>>, vector<1x32x96xf32>
    %125 = vector.shape_cast %124 : vector<1x32x96xf32> to vector<32x96xf32>
    %cst_75 = arith.constant dense<0.000000e+00> : vector<32x128xf32>
    %126 = tpu.matmul %125, %123, %cst_75 {dimension_numbers = #tpu.dot_dimension_numbers<[1], [0], [0], [1], [0, 0, 1, 1], [], []>} : vector<32x96xf32>, vector<96x128xf32>, vector<32x128xf32> -> vector<32x128xf32>
    %c4_76 = arith.constant 4 : index
    %c0_77 = arith.constant 0 : index
    %c0_78 = arith.constant 0 : index
    %127 = vector.load %arg3[%c4_76, %c0_77, %c0_78] : memref<8x32x1xf32, #tpu.memory_space<vmem>>, vector<1x32x1xf32>
    %128 = vector.shape_cast %127 : vector<1x32x1xf32> to vector<32x1xf32>
    %129 = vector.broadcast %128 : vector<32x1xf32> to vector<32x128xf32>
    %130 = arith.addf %126, %129 : vector<32x128xf32>
    %cst_79 = arith.constant 0.000000e+00 : f32
    %131 = vector.broadcast %cst_79 : f32 to vector<32x128xf32>
    %132 = arith.maximumf %130, %131 : vector<32x128xf32>
    %c127_i32_80 = arith.constant 127 : i32
    %133 = tpu.dynamic_rotate %132 by %c127_i32_80 dim 1 : vector<32x128xf32>, i32 -> vector<32x128xf32>
    %134 = arith.maximumf %132, %133 : vector<32x128xf32>
    %c0_81 = arith.constant 0 : index
    %c0_82 = arith.constant 0 : index
    %135 = vector.load %arg4[%c0_81, %c0_82] : memref<1024x512xf32, #tpu.memory_space<vmem>>, vector<128x128xf32>
    %cst_83 = arith.constant dense<0.000000e+00> : vector<32x128xf32>
    %136 = tpu.matmul %134, %135, %cst_83 {dimension_numbers = #tpu.dot_dimension_numbers<[1], [0], [0], [1], [0, 0, 1, 1], [], []>} : vector<32x128xf32>, vector<128x128xf32>, vector<32x128xf32> -> vector<32x128xf32>
    %137 = tpu.iota {dimensions = array<i32: 1>} : vector<32x128xi32>
    %c15_i32 = arith.constant 15 : i32
    %138 = vector.broadcast %c15_i32 : i32 to vector<32x128xi32>
    %139 = arith.andi %137, %138 : vector<32x128xi32>
    %c0_i32_84 = arith.constant 0 : i32
    %140 = vector.broadcast %c0_i32_84 : i32 to vector<32x128xi32>
    %141 = arith.cmpi eq, %139, %140 : vector<32x128xi32>
    %c1_i32_85 = arith.constant 1 : i32
    %142 = tpu.dynamic_rotate %136 by %c1_i32_85 dim 1 : vector<32x128xf32>, i32 -> vector<32x128xf32>
    %cst_86 = arith.constant 0.000000e+00 : f32
    %143 = vector.broadcast %cst_86 : f32 to vector<32x128xf32>
    %144 = arith.select %141, %143, %142 : vector<32x128xi1>, vector<32x128xf32>
    %c15_i32_87 = arith.constant 15 : i32
    %145 = vector.broadcast %c15_i32_87 : i32 to vector<32x128xi32>
    %146 = arith.cmpi eq, %139, %145 : vector<32x128xi32>
    %c127_i32_88 = arith.constant 127 : i32
    %147 = tpu.dynamic_rotate %136 by %c127_i32_88 dim 1 : vector<32x128xf32>, i32 -> vector<32x128xf32>
    %cst_89 = arith.constant 0.000000e+00 : f32
    %148 = vector.broadcast %cst_89 : f32 to vector<32x128xf32>
    %149 = arith.select %146, %148, %147 : vector<32x128xi1>, vector<32x128xf32>
    %150 = tpu.concatenate %144, %136, %149 in 0 : vector<32x128xf32>, vector<32x128xf32>, vector<32x128xf32> -> vector<96x128xf32>
    %c5 = arith.constant 5 : index
    %c0_90 = arith.constant 0 : index
    %c0_91 = arith.constant 0 : index
    %151 = vector.load %arg2[%c5, %c0_90, %c0_91] : memref<8x32x96xf32, #tpu.memory_space<vmem>>, vector<1x32x96xf32>
    %152 = vector.shape_cast %151 : vector<1x32x96xf32> to vector<32x96xf32>
    %cst_92 = arith.constant dense<0.000000e+00> : vector<32x128xf32>
    %153 = tpu.matmul %152, %150, %cst_92 {dimension_numbers = #tpu.dot_dimension_numbers<[1], [0], [0], [1], [0, 0, 1, 1], [], []>} : vector<32x96xf32>, vector<96x128xf32>, vector<32x128xf32> -> vector<32x128xf32>
    %c5_93 = arith.constant 5 : index
    %c0_94 = arith.constant 0 : index
    %c0_95 = arith.constant 0 : index
    %154 = vector.load %arg3[%c5_93, %c0_94, %c0_95] : memref<8x32x1xf32, #tpu.memory_space<vmem>>, vector<1x32x1xf32>
    %155 = vector.shape_cast %154 : vector<1x32x1xf32> to vector<32x1xf32>
    %156 = vector.broadcast %155 : vector<32x1xf32> to vector<32x128xf32>
    %157 = arith.addf %153, %156 : vector<32x128xf32>
    %cst_96 = arith.constant 0.000000e+00 : f32
    %158 = vector.broadcast %cst_96 : f32 to vector<32x128xf32>
    %159 = arith.maximumf %157, %158 : vector<32x128xf32>
    %c127_i32_97 = arith.constant 127 : i32
    %160 = tpu.dynamic_rotate %159 by %c127_i32_97 dim 1 : vector<32x128xf32>, i32 -> vector<32x128xf32>
    %161 = arith.maximumf %159, %160 : vector<32x128xf32>
    %c0_98 = arith.constant 0 : index
    %c0_99 = arith.constant 0 : index
    %162 = vector.load %arg4[%c0_98, %c0_99] : memref<1024x512xf32, #tpu.memory_space<vmem>>, vector<128x128xf32>
    %cst_100 = arith.constant dense<0.000000e+00> : vector<32x128xf32>
    %163 = tpu.matmul %161, %162, %cst_100 {dimension_numbers = #tpu.dot_dimension_numbers<[1], [0], [0], [1], [0, 0, 1, 1], [], []>} : vector<32x128xf32>, vector<128x128xf32>, vector<32x128xf32> -> vector<32x128xf32>
    %164 = tpu.iota {dimensions = array<i32: 1>} : vector<32x128xi32>
    %c7_i32 = arith.constant 7 : i32
    %165 = vector.broadcast %c7_i32 : i32 to vector<32x128xi32>
    %166 = arith.andi %164, %165 : vector<32x128xi32>
    %c0_i32_101 = arith.constant 0 : i32
    %167 = vector.broadcast %c0_i32_101 : i32 to vector<32x128xi32>
    %168 = arith.cmpi eq, %166, %167 : vector<32x128xi32>
    %c1_i32_102 = arith.constant 1 : i32
    %169 = tpu.dynamic_rotate %163 by %c1_i32_102 dim 1 : vector<32x128xf32>, i32 -> vector<32x128xf32>
    %cst_103 = arith.constant 0.000000e+00 : f32
    %170 = vector.broadcast %cst_103 : f32 to vector<32x128xf32>
    %171 = arith.select %168, %170, %169 : vector<32x128xi1>, vector<32x128xf32>
    %c7_i32_104 = arith.constant 7 : i32
    %172 = vector.broadcast %c7_i32_104 : i32 to vector<32x128xi32>
    %173 = arith.cmpi eq, %166, %172 : vector<32x128xi32>
    %c127_i32_105 = arith.constant 127 : i32
    %174 = tpu.dynamic_rotate %163 by %c127_i32_105 dim 1 : vector<32x128xf32>, i32 -> vector<32x128xf32>
    %cst_106 = arith.constant 0.000000e+00 : f32
    %175 = vector.broadcast %cst_106 : f32 to vector<32x128xf32>
    %176 = arith.select %173, %175, %174 : vector<32x128xi1>, vector<32x128xf32>
    %177 = tpu.concatenate %171, %163, %176 in 0 : vector<32x128xf32>, vector<32x128xf32>, vector<32x128xf32> -> vector<96x128xf32>
    %c6 = arith.constant 6 : index
    %c0_107 = arith.constant 0 : index
    %c0_108 = arith.constant 0 : index
    %178 = vector.load %arg2[%c6, %c0_107, %c0_108] : memref<8x32x96xf32, #tpu.memory_space<vmem>>, vector<1x32x96xf32>
    %179 = vector.shape_cast %178 : vector<1x32x96xf32> to vector<32x96xf32>
    %cst_109 = arith.constant dense<0.000000e+00> : vector<32x128xf32>
    %180 = tpu.matmul %179, %177, %cst_109 {dimension_numbers = #tpu.dot_dimension_numbers<[1], [0], [0], [1], [0, 0, 1, 1], [], []>} : vector<32x96xf32>, vector<96x128xf32>, vector<32x128xf32> -> vector<32x128xf32>
    %c6_110 = arith.constant 6 : index
    %c0_111 = arith.constant 0 : index
    %c0_112 = arith.constant 0 : index
    %181 = vector.load %arg3[%c6_110, %c0_111, %c0_112] : memref<8x32x1xf32, #tpu.memory_space<vmem>>, vector<1x32x1xf32>
    %182 = vector.shape_cast %181 : vector<1x32x1xf32> to vector<32x1xf32>
    %183 = vector.broadcast %182 : vector<32x1xf32> to vector<32x128xf32>
    %184 = arith.addf %180, %183 : vector<32x128xf32>
    %cst_113 = arith.constant 0.000000e+00 : f32
    %185 = vector.broadcast %cst_113 : f32 to vector<32x128xf32>
    %186 = arith.maximumf %184, %185 : vector<32x128xf32>
    %c127_i32_114 = arith.constant 127 : i32
    %187 = tpu.dynamic_rotate %186 by %c127_i32_114 dim 1 : vector<32x128xf32>, i32 -> vector<32x128xf32>
    %188 = arith.maximumf %186, %187 : vector<32x128xf32>
    %c0_115 = arith.constant 0 : index
    %c0_116 = arith.constant 0 : index
    %189 = vector.load %arg4[%c0_115, %c0_116] : memref<1024x512xf32, #tpu.memory_space<vmem>>, vector<128x128xf32>
    %cst_117 = arith.constant dense<0.000000e+00> : vector<32x128xf32>
    %190 = tpu.matmul %188, %189, %cst_117 {dimension_numbers = #tpu.dot_dimension_numbers<[1], [0], [0], [1], [0, 0, 1, 1], [], []>} : vector<32x128xf32>, vector<128x128xf32>, vector<32x128xf32> -> vector<32x128xf32>
    %191 = tpu.iota {dimensions = array<i32: 1>} : vector<32x128xi32>
    %c3_i32 = arith.constant 3 : i32
    %192 = vector.broadcast %c3_i32 : i32 to vector<32x128xi32>
    %193 = arith.andi %191, %192 : vector<32x128xi32>
    %c0_i32_118 = arith.constant 0 : i32
    %194 = vector.broadcast %c0_i32_118 : i32 to vector<32x128xi32>
    %195 = arith.cmpi eq, %193, %194 : vector<32x128xi32>
    %c1_i32_119 = arith.constant 1 : i32
    %196 = tpu.dynamic_rotate %190 by %c1_i32_119 dim 1 : vector<32x128xf32>, i32 -> vector<32x128xf32>
    %cst_120 = arith.constant 0.000000e+00 : f32
    %197 = vector.broadcast %cst_120 : f32 to vector<32x128xf32>
    %198 = arith.select %195, %197, %196 : vector<32x128xi1>, vector<32x128xf32>
    %c3_i32_121 = arith.constant 3 : i32
    %199 = vector.broadcast %c3_i32_121 : i32 to vector<32x128xi32>
    %200 = arith.cmpi eq, %193, %199 : vector<32x128xi32>
    %c127_i32_122 = arith.constant 127 : i32
    %201 = tpu.dynamic_rotate %190 by %c127_i32_122 dim 1 : vector<32x128xf32>, i32 -> vector<32x128xf32>
    %cst_123 = arith.constant 0.000000e+00 : f32
    %202 = vector.broadcast %cst_123 : f32 to vector<32x128xf32>
    %203 = arith.select %200, %202, %201 : vector<32x128xi1>, vector<32x128xf32>
    %204 = tpu.concatenate %198, %190, %203 in 0 : vector<32x128xf32>, vector<32x128xf32>, vector<32x128xf32> -> vector<96x128xf32>
    %c7 = arith.constant 7 : index
    %c0_124 = arith.constant 0 : index
    %c0_125 = arith.constant 0 : index
    %205 = vector.load %arg2[%c7, %c0_124, %c0_125] : memref<8x32x96xf32, #tpu.memory_space<vmem>>, vector<1x32x96xf32>
    %206 = vector.shape_cast %205 : vector<1x32x96xf32> to vector<32x96xf32>
    %cst_126 = arith.constant dense<0.000000e+00> : vector<32x128xf32>
    %207 = tpu.matmul %206, %204, %cst_126 {dimension_numbers = #tpu.dot_dimension_numbers<[1], [0], [0], [1], [0, 0, 1, 1], [], []>} : vector<32x96xf32>, vector<96x128xf32>, vector<32x128xf32> -> vector<32x128xf32>
    %c7_127 = arith.constant 7 : index
    %c0_128 = arith.constant 0 : index
    %c0_129 = arith.constant 0 : index
    %208 = vector.load %arg3[%c7_127, %c0_128, %c0_129] : memref<8x32x1xf32, #tpu.memory_space<vmem>>, vector<1x32x1xf32>
    %209 = vector.shape_cast %208 : vector<1x32x1xf32> to vector<32x1xf32>
    %210 = vector.broadcast %209 : vector<32x1xf32> to vector<32x128xf32>
    %211 = arith.addf %207, %210 : vector<32x128xf32>
    %cst_130 = arith.constant 0.000000e+00 : f32
    %212 = vector.broadcast %cst_130 : f32 to vector<32x128xf32>
    %213 = arith.maximumf %211, %212 : vector<32x128xf32>
    %c127_i32_131 = arith.constant 127 : i32
    %214 = tpu.dynamic_rotate %213 by %c127_i32_131 dim 1 : vector<32x128xf32>, i32 -> vector<32x128xf32>
    %215 = arith.maximumf %213, %214 : vector<32x128xf32>
    %c0_132 = arith.constant 0 : index
    %c0_133 = arith.constant 0 : index
    %216 = vector.load %arg4[%c0_132, %c0_133] : memref<1024x512xf32, #tpu.memory_space<vmem>>, vector<128x128xf32>
    %cst_134 = arith.constant dense<0.000000e+00> : vector<32x128xf32>
    %217 = tpu.matmul %215, %216, %cst_134 {dimension_numbers = #tpu.dot_dimension_numbers<[1], [0], [0], [1], [0, 0, 1, 1], [], []>} : vector<32x128xf32>, vector<128x128xf32>, vector<32x128xf32> -> vector<32x128xf32>
    %c0_135 = arith.constant 0 : index
    %c0_136 = arith.constant 0 : index
    %218 = vector.load %arg5[%c0_135, %c0_136] : memref<32x128xf32, #tpu.memory_space<vmem>>, vector<32x128xf32>
    %219 = arith.mulf %217, %218 : vector<32x128xf32>
    %cst_137 = arith.constant dense<0.000000e+00> : vector<128xf32>
    %220 = vector.multi_reduction <add>, %219, %cst_137 [0] : vector<32x128xf32> to vector<128xf32>
    %221 = vector.shape_cast %220 : vector<128xf32> to vector<1x128xf32>
    %c0_138 = arith.constant 0 : index
    %c0_139 = arith.constant 0 : index
    %222 = vector.load %arg6[%c0_138, %c0_139] : memref<128x2xf32, #tpu.memory_space<vmem>>, vector<128x2xf32>
    %cst_140 = arith.constant dense<0.000000e+00> : vector<1x2xf32>
    %223 = tpu.matmul %221, %222, %cst_140 {dimension_numbers = #tpu.dot_dimension_numbers<[1], [0], [0], [1], [0, 0, 1, 1], [], []>} : vector<1x128xf32>, vector<128x2xf32>, vector<1x2xf32> -> vector<1x2xf32>
    %c0_141 = arith.constant 0 : index
    %c0_142 = arith.constant 0 : index
    %224 = vector.load %arg7[%c0_141, %c0_142] : memref<1x1xf32, #tpu.memory_space<vmem>>, vector<1x1xf32>
    %225 = vector.broadcast %224 : vector<1x1xf32> to vector<1x2xf32>
    %226 = arith.addf %223, %225 : vector<1x2xf32>
    %227 = arith.negf %226 : vector<1x2xf32>
    %228 = math.exp %227 : vector<1x2xf32>
    %cst_143 = arith.constant 1.000000e+00 : f32
    %229 = vector.broadcast %cst_143 : f32 to vector<1x2xf32>
    %230 = arith.addf %229, %228 : vector<1x2xf32>
    %231 = arith.divf %229, %230 : vector<1x2xf32>
    %c0_144 = arith.constant 0 : index
    %c0_145 = arith.constant 0 : index
    %c0_146 = arith.constant 0 : index
    %232 = vector.load %arg8[%c0_144, %c0_145, %c0_146] : memref<1x1x2xf32, #tpu.memory_space<vmem>>, vector<1x1x2xf32>
    %233 = vector.shape_cast %232 : vector<1x1x2xf32> to vector<1x2xf32>
    %234 = vector.shape_cast %231 : vector<1x2xf32> to vector<1x1x2xf32>
    tpu.vector_store %arg8[%c0_144, %c0_145, %c0_146], %234 {strides = array<i32>} : memref<1x1x2xf32, #tpu.memory_space<vmem>>, vector<1x1x2xf32>,
    return
  }
  func.func @transform_0(%arg0: i32) -> (i32, i32, i32) {
    %c0_i32 = arith.constant 0 : i32
    %c0_i32_0 = arith.constant 0 : i32
    %c0_i32_1 = arith.constant 0 : i32
    return %arg0, %c0_i32, %c0_i32_0 : i32, i32, i32
  }
  func.func @transform_1(%arg0: i32) -> (i32, i32, i32) {
    %c0_i32 = arith.constant 0 : i32
    %c0_i32_0 = arith.constant 0 : i32
    %c0_i32_1 = arith.constant 0 : i32
    %c0_i32_2 = arith.constant 0 : i32
    return %c0_i32, %c0_i32_0, %c0_i32_1 : i32, i32, i32
  }
  func.func @transform_2(%arg0: i32) -> (i32, i32, i32) {
    %c0_i32 = arith.constant 0 : i32
    %c0_i32_0 = arith.constant 0 : i32
    %c0_i32_1 = arith.constant 0 : i32
    %c0_i32_2 = arith.constant 0 : i32
    return %c0_i32, %c0_i32_0, %c0_i32_1 : i32, i32, i32
  }
  func.func @transform_3(%arg0: i32) -> (i32, i32) {
    %c0_i32 = arith.constant 0 : i32
    %c0_i32_0 = arith.constant 0 : i32
    %c0_i32_1 = arith.constant 0 : i32
    return %c0_i32, %c0_i32_0 : i32, i32
  }
  func.func @transform_4(%arg0: i32) -> (i32, i32) {
    %c0_i32 = arith.constant 0 : i32
    %c0_i32_0 = arith.constant 0 : i32
    %c0_i32_1 = arith.constant 0 : i32
    return %c0_i32, %c0_i32_0 : i32, i32
  }
  func.func @transform_5(%arg0: i32) -> (i32, i32) {
    %c0_i32 = arith.constant 0 : i32
    %c0_i32_0 = arith.constant 0 : i32
    %c0_i32_1 = arith.constant 0 : i32
    return %c0_i32, %c0_i32_0 : i32, i32
  }
  func.func @transform_6(%arg0: i32) -> (i32, i32) {
    %c0_i32 = arith.constant 0 : i32
    %c0_i32_0 = arith.constant 0 : i32
    %c0_i32_1 = arith.constant 0 : i32
    return %c0_i32, %c0_i32_0 : i32, i32
  }
  func.func @transform_7(%arg0: i32) -> (i32, i32, i32) {
    %c0_i32 = arith.constant 0 : i32
    %c0_i32_0 = arith.constant 0 : i32
    %c0_i32_1 = arith.constant 0 : i32
    return %arg0, %c0_i32, %c0_i32_0 : i32, i32, i32
  }
}

</mosaic_0001>

<bundles_post_ra>
// kernel: tpu_custom_call.1
= control target key start
LH: loop header
LB: loop body
LE: loop exit
PB: predicated region body
PF: predicated region fallthrough
CT: control target
= control target key end

     0   :  { %s8970_s0 = inlined_call_operand.hbm [shape: f32[2,32,1024], index: 0, kind: input, shape index: {}]   ;;  %s8971_s1 = inlined_call_operand.hbm [shape: f32[8,32,96], index: 1, kind: input, shape index: {}]   ;;  %s8972_s2 = inlined_call_operand.vmem [shape: f32[8,32,1], index: 2, kind: input, shape index: {}]   ;;  %s8973_s3 = inlined_call_operand.hbm [shape: f32[1024,512], index: 3, kind: input, shape index: {}]   ;;  %s8974_s4 = inlined_call_operand.hbm [shape: f32[32,128], index: 4, kind: input, shape index: {}]   ;;  %s8975_s5 = inlined_call_operand.vmem [shape: f32[128,2], index: 5, kind: input, shape index: {}]   ;;  %s8976_s6 = inlined_call_operand.<no memory space> [shape: f32[1,1], index: 6, kind: input, shape index: {}]   ;;  %s8977_s7 = inlined_call_operand.hbm [shape: f32[2,1,2], index: 7, kind: output, shape index: {}]  }
   0x1   :  { %v12_v0 = vstv %s8976_s6 }
   0x2   :  { %13 = vst [vmem:[#allocation2] sm:$0x1] %v12_v0 }
   0x3   :  { %14 = vsyncpa [#allocation4], 0 }
   0x4   :  { %16 = vsyncpa [#allocation4 + $0x1], 0 }
   0x5   :  { %17 = vsyncpa [#allocation7], 0 }
   0x6   :  { %18 = vsyncpa [#allocation10], 0 }
   0x7   :  { %19 = vsyncpa [#allocation5], 0 }
   0x8   :  { %21 = vsyncpa [#allocation5 + $0x1], 0  ;;  %s6508_s26 = smov 0   ;;  %s6510_s27 = smov 0  }
   0x9   :  { %s6512_s28 = smov 0   ;;  %s6514_s29 = smov 0  }
   0xa LB: > { %s6529_s6 = sadd.s32 4294967295, %s6447_s29   ;;  %s5070_s30 = sadd.s32 4294967294, %s6447_s29   ;;  %s6447_s29 = sphi %s6514_s29, %s9130_s29   ;;  %s6443_s28 = sphi %s6512_s28, %s9129_s28   ;;  %s6439_s27 = sphi %s6510_s27, %s9128_s27   ;;  %s6435_s26 = sphi %s6508_s26, %s9127_s26  }
   0xb   : > { %p47_p0 = scmp.ne.s32.totalorder %s6439_s27, %s6435_s26  ;;  %p8978_p1 = scmp.eq.s32.totalorder %s6529_s6, 0 }
   0xc   : > { %p197_p2 = scmp.eq.s32.totalorder %s6529_s6, 1  ;;  %p203_p3 = scmp.eq.s32.totalorder %s5070_s30, 1 }
   0xd   : > { %p6538_p4 = por %p8978_p1, %p47_p0  ;;  %p5071_p5 = scmp.ge.s32.totalorder %s6447_s29, 1 }
   0xe   : > { %p6543_p6 = por %p203_p3, %p47_p0  ;;  %p210_p7 = scmp.lt.s32.totalorder %s6447_s29, 3 }
   0xf   : > { %s9034_s8 = scalar_select %p6538_p4, 1, 0 }
  0x10   : > { %s9035_s9 = scalar_select %p6543_p6, 1, 0 }
  0x11   : > { %p6548_p8 = pnand %p5071_p5, %p210_p7  ;;  %s6449_s11 = smov [#allocation6]  }
  0x12   : > { %s222_s12 = sshll.u32 %s6449_s11, 4  ;;  %s6450_s14 = smov [#allocation8]   ;;  %s223_s12 = int_to_ptr.vmem [resolvable:$true] %s222_s12 }
  0x13   : > { %s9036_s10 = scalar_select %p6548_p8, 1, 0 }
  0x14   : > { %p5995_p9 = pneg %p6548_p8  ;;  %s238_s15 = sshll.u32 %s6450_s14, 4  ;;  %s239_s15 = int_to_ptr.vmem [resolvable:$true] %s238_s15 }
  0x15   : > { %s6280_s16 = scalar_lea.vmem %s223_s12, 4096  ;;  %p6288_p5 = scmp.lt.s32.totalorder %s223_s12, %s223_s12 }
  0x16   : > { %p6557_p11 = pnand %p5995_p9, %p8978_p1  ;;  %p6281_p13 = scmp.ne.s32.totalorder %s223_s12, %s6280_s16 }
  0x17   : > { %p6289_p7 = scmp.lt.s32.totalorder %s6280_s16, %s6280_s16 }
  0x18   : > { %p6271_p12 = pneg %p6557_p11 }
  0x19   : > { %p6290_p10 = por %p6289_p7, %p6288_p5 }
  0x1a   : > { %p6283_p0 = pnand %p6281_p13, %p6271_p12 }
  0x1c   : > { %p6284_p3 = pneg %p6283_p0 }
  0x1e   : > { %p6291_p9 = pnand %p6290_p10, %p6284_p3 }
  0x20   : > { %6294 = shalt.err (!%p6291_p9)
}
  0x21   : > { %s6451_s17 = smov 128   ;;  %s6452_s18 = smov 8  }
  0x22   : > { %5998 = dma.hbm_to_vmem [thread:$0]  (!%p6557_p11), %s8971_s1, 4096, %s223_s12, [#allocation7], %s6451_s17, %s6451_s17, %s6452_s18  }
  0x23   : > { %s6306_s21 = scalar_lea.vmem %s239_s15, 65536  ;;  %p6314_p10 = scmp.lt.s32.totalorder %s239_s15, %s239_s15 }
  0x24   : > { %p6307_p13 = scmp.ne.s32.totalorder %s239_s15, %s6306_s21  ;;  %p6315_p3 = scmp.lt.s32.totalorder %s6306_s21, %s6306_s21 }
  0x26   : > { %p6309_p0 = pnand %p6307_p13, %p6271_p12  ;;  %p6316_p7 = por %p6315_p3, %p6314_p10 }
  0x28   : > { %p6310_p5 = pneg %p6309_p0 }
  0x2a   : > { %p6317_p9 = pnand %p6316_p7, %p6310_p5 }
  0x2c   : > { %6320 = shalt.err (!%p6317_p9)
}
  0x2d   : > { %s6453_s22 = smov 512   ;;  %s6454_s23 = smov 32  }
  0x2e   : > { %6001 = dma.hbm_to_vmem [thread:$0]  (!%p6557_p11), %s8973_s3, 65536, %s239_s15, [#allocation7], %s6453_s22, %s6453_s22, %s6454_s23  }
  0x2f   : > { %s6455_s30 = smov [#allocation9]   ;;  %s6583_s12 = sadd.s32 1, %s6447_s29  }
  0x30   : > { %s251_s11 = sshll.u32 %s6455_s30, 4  ;;  %s252_s11 = int_to_ptr.vmem [resolvable:$true] %s251_s11 }
  0x31   : > { %s6332_s14 = scalar_lea.vmem %s252_s11, 512  ;;  %p6340_p10 = scmp.lt.s32.totalorder %s252_s11, %s252_s11 }
  0x32   : > { %p6333_p13 = scmp.ne.s32.totalorder %s252_s11, %s6332_s14  ;;  %p6341_p3 = scmp.lt.s32.totalorder %s6332_s14, %s6332_s14 }
  0x34   : > { %p6335_p0 = pnand %p6333_p13, %p6271_p12  ;;  %p6342_p7 = por %p6341_p3, %p6340_p10 }
  0x36   : > { %p6336_p5 = pneg %p6335_p0 }
  0x38   : > { %p6343_p9 = pnand %p6342_p7, %p6336_p5 }
  0x3a   : > { %6346 = shalt.err (!%p6343_p9)
}
  0x3b   : > { %6004 = dma.hbm_to_vmem [thread:$0]  (!%p6557_p11), %s8974_s4, 512, %s252_s11, [#allocation10], %s6451_s17, %s6451_s17, %s6452_s18  }
  0x3c   : > { %s31_s19 = ssub.s32 %s6447_s29, %s6583_s12  ;;  %s34_s13 = sadd.s32 1, %s6443_s28 }
  0x3d   : > { %p32_p12 = scmp.eq.s32.totalorder %s31_s19, 0  ;;  %p41_p13 = scmp.ne.s32.totalorder %s6443_s28, %s6439_s27 }
  0x3e   : > { %p42_p0 = scmp.eq.s32.totalorder %s6447_s29, 0  ;;  %p6016_p5 = scmp.lt.s32.totalorder %s6447_s29, 2 }
  0x3f   : > { %s6604_s20 = scalar_select %p32_p12, %s6443_s28, %s34_s13  }
  0x40   : > { %p43_p10 = por %p42_p0, %p41_p13  ;;  %p6608_p3 = por %p197_p2, %p41_p13 }
  0x41   : > { %s271_s22 = sand.u32 1, %s6443_s28   ;;  %s5340_s23 = sshll.u32 %s6447_s29, 12 }
  0x42   : > { %s9038_s21 = scalar_select %p6608_p3, 1, 0 }
  0x43   : > { %s5076_s24 = sshll.u32 %s271_s22, 8  ;;  %s6617_s17 = scalar_lea.hbm %s8970_s0, %s5340_s23 }
  0x44   : > { %s275_s18 = scalar_lea.vmem [#allocation3], %s5076_s24  ;;  %p6619_p11 = pnand %p6016_p5, %p43_p10 }
  0x45   : > { %s282_s11 = sshll.u32 %s275_s18, 4  ;;  %s6625_s15 = scalar_lea.sflag [#allocation4], %s271_s22  ;;  %s6623_s11 = int_to_ptr.vmem [resolvable:$true] %s282_s11 }
  0x46   : > { %s6347_s16 = scalar_lea.hbm %s6617_s17, 4096  ;;  %p6349_p7 = pneg %p6619_p11 }
  0x47   : > { %p6348_p2 = scmp.ne.s32.totalorder %s6617_s17, %s6347_s16  ;;  %s6352_s23 = scalar_lea.hbm %s8970_s0, 8192 }
  0x48   : > { %p6353_p13 = scmp.lt.s32.totalorder %s6617_s17, %s8970_s0  ;;  %p6354_p0 = scmp.lt.s32.totalorder %s6352_s23, %s6347_s16 }
  0x49   : > { %p6350_p9 = pnand %p6349_p7, %p6348_p2 }
  0x4a   : > { %p6355_p5 = por %p6354_p0, %p6353_p13 }
  0x4b   : > { %p6351_p12 = pneg %p6350_p9 }
  0x4d   : > { %p6356_p10 = pnand %p6355_p5, %p6351_p12 }
  0x4f   : > { %6359 = shalt.err (!%p6356_p10)
}
  0x50   : > { %s6360_s22 = scalar_lea.vmem %s6623_s11, 4096  ;;  %s6456_s30 = smov [#allocation3]  }
  0x51   : > { %p6361_p1 = scmp.ne.s32.totalorder %s6623_s11, %s6360_s22  ;;  %s6365_s18 = sshll.u32 %s6456_s30, 4  ;;  %s6366_s18 = int_to_ptr.vmem [resolvable:$false] %s6365_s18 }
  0x52   : > { %s6367_s19 = scalar_lea.vmem %s6366_s18, 8192  ;;  %p6368_p9 = scmp.lt.s32.totalorder %s6623_s11, %s6366_s18 }
  0x53   : > { %p6363_p6 = pnand %p6361_p1, %p6349_p7  ;;  %p6369_p3 = scmp.lt.s32.totalorder %s6367_s19, %s6360_s22 }
  0x55   : > { %p6364_p2 = pneg %p6363_p6  ;;  %p6370_p4 = por %p6369_p3, %p6368_p9 }
  0x57   : > { %p6371_p8 = pnand %p6370_p4, %p6364_p2 }
  0x59   : > { %6374 = shalt.err (!%p6371_p8)
}
  0x5a   : > { %s6457_s16 = smov 1024   ;;  %s6458_s13 = smov 64  }
  0x5b   : > { %6008 = dma.hbm_to_vmem [thread:$0]  (!%p6619_p11), %s6617_s17, 4096, %s6623_s11, %s6625_s15, %s6457_s16, %s6457_s16, %s6458_s13  }
  0x5c   : > { %p9040_p1 = scmp.ne.s32.totalorder %s9036_s10, 0 }
  0x5e   : > { %294 = sbr.rel (%p9040_p1) target bundleno = 5969 (0x1751), region = 48 }
  0x63   : > { %s6649_s23 = sand.u32 1, %s6439_s27   ;;  %p9041_p4 = scmp.ne.s32.totalorder %s9034_s8, 0 }
  0x64   : > { %s5080_s24 = sshll.u32 %s6649_s23, 8  ;;  %s297_s25 = scalar_lea.sflag [#allocation4], %s6649_s23 }
  0x65   : > { %s6653_s22 = scalar_lea.vmem [#allocation3], %s5080_s24 }
  0x66   : > { %6418 = dma.done.wait (%p9041_p4), %s297_s25, 4096  }
  0x67   : > { %6420 = vsyncadd (%p9041_p4), %s297_s25, 4294963200  ;;  %p9042_p6 = scmp.eq.s32.totalorder %s6529_s6, 0 }
  0x69   : > { %6422 = dma.done.wait (%p9042_p6), [#allocation7], 69632   ;;  %p9043_p8 = pmov %p9042_p6 }
  0x6a   : > { %p9044_p3 = pmov %p9042_p6 }
  0x6b   : > { %6424 = vsyncadd (%p9043_p8), [#allocation7], 4294897664 }
  0x6c   : > { %6426 = dma.done.wait (%p9044_p3), [#allocation10], 512   ;;  %p9045_p11 = pmov %p9044_p3 }
  0x6d   : > { %v6668_v1 = vld [vmem:[%s6653_s22 + $0xc8] sm:$0xff]  ;;  %v6671_v2 = vld [vmem:[%s6653_s22 + $0xc0] sm:$0xff]  ;;  %s6459_s8 = smov 127   ;;  %v6678_v3 = vld [vmem:[%s6653_s22 + $0xd0] sm:$0xff]  ;;  %s6460_s10 = smov 1   ;;  %v8983_v17 = vmov 0.0   ;;  %v8982_v34 = vlaneseq }
  0x6e   : > { %6428 = vsyncadd (%p9045_p11), [#allocation10], 4294966784  ;;  %550 = vrot.lane.b32.xlu0 %v6668_v1, %s6459_s8  ;;  %542 = vrot.lane.b32.xlu1 %v6671_v2, %s6459_s8  ;;  %v6681_v4 = vld [vmem:[%s6653_s22 + $0x88] sm:$0xff]  ;;  %v6688_v5 = vld [vmem:[%s6653_s22 + $0x90] sm:$0xff]  ;;  %v6462_v59 = vmov 0   ;;  %vm693_vm4 = vcmask 785408  }
  0x6f   : > { %v6691_v6 = vld [vmem:[%s6653_s22 + $0x80] sm:$0xff]  ;;  %v6698_v7 = vld [vmem:[%s6653_s22 + $0x50] sm:$0xff]  ;;  %v6701_v8 = vld [vmem:[%s6653_s22 + $0x48] sm:$0xff]  ;;  %770 = vmatprep.mubr.f32.mxu0 %v8983_v17  ;;  %859 = vmatprep.mubr.f32.mxu1 %v8983_v17  ;;  %v6882_v35 = vand.u32 127, %v8982_v34  ;;  %s5337_s16 = sshll.u32 %s6529_s6, 4  ;;  %s341_s13 = scalar_lea.vmem [#allocation11], %s6649_s23 }
  0x70   : > { %v6708_v9 = vld [vmem:[%s6653_s22 + $0x40] sm:$0xff]  ;;  %v6711_v10 = vld [vmem:[%s6653_s22 + $0x8] sm:$0xff]  ;;  %v6718_v11 = vld [vmem:[%s6653_s22 + $0x10] sm:$0xff]  ;;  %6067 = vset.pattern.permute.xlu0 %v6462_v59  ;;  %6068 = vset.pattern.permute.xlu1 %v6462_v59  ;;  %s4963_s17 = scalar_lea.sflag [#allocation5], %s6649_s23  ;;  %p9124_p12 = scmp.ne.s32.totalorder %s9038_s21, 0 }
  0x71   : > { %v6721_v12 = vld [vmem:[%s6653_s22] sm:$0xff]  ;;  %v6732_v13 = vld [vmem:[%s6653_s22 + $0xf8] sm:$0xff]  ;;  %v6786_v22 = vld [vmem:[%s6653_s22 + $0xe8] sm:$0xff]  ;;  %vm600_vm0 = vcmp.lt.s32.totalorder %v6882_v35, 127  ;;  %v383_v61 = vand.u32 511, %v6882_v35  ;;  %vm463_vm1 = vcmp.lt.s32.totalorder %v6882_v35, 1 }
  0x72   : > { %558 = vrot.lane.b32.xlu0 %v6678_v3, %s6459_s8  ;;  %548 = vrot.lane.b32.xlu1 %v6681_v4, %s6459_s8  ;;  %v6739_v14 = vld [vmem:[%s6653_s22 + $0xb8] sm:$0xff]  ;;  %v6766_v18 = vld [vmem:[%s6653_s22 + $0xe0] sm:$0xff]  ;;  %vm5350_vm12 = vcmp.ne.s32.totalorder %v6882_v35, 127  ;;  %vm5352_vm14 = vcmp.ne.s32.totalorder %v6882_v35, 0  ;;  %s6464_s14 = smov [#allocation11]  }
  0x73   : > { %v6750_v15 = vld [vmem:[%s6653_s22 + $0x78] sm:$0xff]  ;;  %v6779_v21 = vld [vmem:[%s6653_s22 + $0xa0] sm:$0xff]  ;;  %v6789_v23 = vld [vmem:[%s6653_s22 + $0xf0] sm:$0xff]  ;;  %vm6962_vm2 = vcmp.ne.s32.totalorder %v383_v61, 0  ;;  %s6379_s15 = sshll.u32 %s6464_s14, 4  ;;  %s6380_s15 = int_to_ptr.vmem [resolvable:$false] %s6379_s15 }
  0x74   : > { %v6757_v16 = vld [vmem:[%s6653_s22 + $0xd8] sm:$0xff]  ;;  %v6799_v25 = vld [vmem:[%s6653_s22 + $0x60] sm:$0xff]  ;;  %v6806_v26 = vld [vmem:[%s6653_s22 + $0xa8] sm:$0xff]  ;;  %s6381_s6 = scalar_lea.vmem %s6380_s15, 32 }
  0x75   : > { %v6769_v19 = vld [vmem:[%s6653_s22 + $0x38] sm:$0xff]  ;;  %v6809_v27 = vld [vmem:[%s6653_s22 + $0xb0] sm:$0xff]  ;;  %v6819_v29 = vld [vmem:[%s6653_s22 + $0x20] sm:$0xff] }
  0x76   : > { %556 = vrot.lane.b32.xlu0 %v6688_v5, %s6459_s8  ;;  %540 = vrot.lane.b32.xlu1 %v6691_v6, %s6459_s8  ;;  %v6776_v20 = vld [vmem:[%s6653_s22 + $0x98] sm:$0xff]  ;;  %v6826_v30 = vld [vmem:[%s6653_s22 + $0x68] sm:$0xff]  ;;  %v7014_v59 = vld [vmem:[#allocation6] sm:$0xff] }
  0x77   : > { %v6796_v24 = vld [vmem:[%s6653_s22 + $0x58] sm:$0xff]  ;;  %v6829_v31 = vld [vmem:[%s6653_s22 + $0x70] sm:$0xff]  ;;  %v6836_v32 = vld [vmem:[%s6653_s22 + $0x28] sm:$0xff] }
  0x78   : > { %v6816_v28 = vld [vmem:[%s6653_s22 + $0x18] sm:$0xff]  ;;  %v6839_v33 = vld [vmem:[%s6653_s22 + $0x30] sm:$0xff]  ;;  %v670_v60 = vld [vmem:[%s8972_s2 + $0x8] sm:$0xff]  ;;  %s8933_s22 = scalar_lea.hbm %s8977_s7, %s5337_s16 }
  0x79   : > { %v669_v56 = vld [vmem:[%s8972_s2] sm:$0xff]  ;;  %v672_v62 = vld [vmem:[%s8972_s2 + $0x18] sm:$0xff] }
  0x7a   : > { %554 = vrot.lane.b32.xlu1 %v6698_v7, %s6459_s8  ;;  %546 = vrot.lane.b32.xlu0 %v6701_v8, %s6459_s8 }
  0x7e   : > { %538 = vrot.lane.b32.xlu0 %v6708_v9, %s6459_s8  ;;  %544 = vrot.lane.b32.xlu1 %v6711_v10, %s6459_s8 }
  0x82   : > { %552 = vrot.lane.b32.xlu0 %v6718_v11, %s6459_s8  ;;  %536 = vrot.lane.b32.xlu1 %v6721_v12, %s6459_s8 }
  0x86   : > { %405 = vrot.lane.b32.xlu0 %v6671_v2, %s6460_s10  ;;  %413 = vrot.lane.b32.xlu1 %v6668_v1, %s6460_s10 }
  0x8a   : > { %461 = vrot.lane.b32.xlu0 %v6732_v13, %s6460_s10  ;;  %403 = vrot.lane.b32.xlu1 %v6691_v6, %s6460_s10 }
  0x8e   : > { %411 = vrot.lane.b32.xlu0 %v6681_v4, %s6460_s10  ;;  %459 = vrot.lane.b32.xlu1 %v6739_v14, %s6460_s10 }
  0x92   : > { %401 = vrot.lane.b32.xlu0 %v6708_v9, %s6460_s10  ;;  %409 = vrot.lane.b32.xlu1 %v6701_v8, %s6460_s10 }
  0x96   : > { %457 = vrot.lane.b32.xlu0 %v6750_v15, %s6460_s10  ;;  %399 = vrot.lane.b32.xlu1 %v6721_v12, %s6460_s10 }
  0x9a   : > { %407 = vrot.lane.b32.xlu0 %v6711_v10, %s6460_s10  ;;  %566 = vrot.lane.b32.xlu1 %v6757_v16, %s6459_s8 }
  0x9e   : > { %574 = vrot.lane.b32.xlu0 %v6766_v18, %s6459_s8  ;;  %455 = vrot.lane.b32.xlu1 %v6769_v19, %s6460_s10 }
  0xa2   : > { %564 = vrot.lane.b32.xlu0 %v6776_v20, %s6459_s8  ;;  %572 = vrot.lane.b32.xlu1 %v6779_v21, %s6459_s8 }
  0xa6   : > { %582 = vrot.lane.b32.xlu0 %v6786_v22, %s6459_s8  ;;  %590 = vrot.lane.b32.xlu1 %v6789_v23, %s6459_s8 }
  0xaa   : > { %562 = vrot.lane.b32.xlu0 %v6796_v24, %s6459_s8  ;;  %570 = vrot.lane.b32.xlu1 %v6799_v25, %s6459_s8 }
  0xae   : > { %580 = vrot.lane.b32.xlu0 %v6806_v26, %s6459_s8  ;;  %588 = vrot.lane.b32.xlu1 %v6809_v27, %s6459_s8 }
  0xb2   : > { %560 = vrot.lane.b32.xlu0 %v6816_v28, %s6459_s8  ;;  %568 = vrot.lane.b32.xlu1 %v6819_v29, %s6459_s8 }
  0xb6   : > { %578 = vrot.lane.b32.xlu0 %v6826_v30, %s6459_s8  ;;  %586 = vrot.lane.b32.xlu1 %v6829_v31, %s6459_s8 }
  0xba   : > { %576 = vrot.lane.b32.xlu0 %v6836_v32, %s6459_s8  ;;  %584 = vrot.lane.b32.xlu1 %v6839_v33, %s6459_s8 }
  0xbe   : > { %421 = vrot.lane.b32.xlu0 %v6678_v3, %s6460_s10  ;;  %429 = vrot.lane.b32.xlu1 %v6757_v16, %s6460_s10 }
  0xc2   : > { %419 = vrot.lane.b32.xlu0 %v6688_v5, %s6460_s10  ;;  %427 = vrot.lane.b32.xlu1 %v6776_v20, %s6460_s10 }
  0xc6   : > { %437 = vrot.lane.b32.xlu0 %v6766_v18, %s6460_s10  ;;  %445 = vrot.lane.b32.xlu1 %v6786_v22, %s6460_s10 }
  0xca   : > { %417 = vrot.lane.b32.xlu0 %v6698_v7, %s6460_s10  ;;  %425 = vrot.lane.b32.xlu1 %v6796_v24, %s6460_s10 }
  0xce   : > { %435 = vrot.lane.b32.xlu0 %v6779_v21, %s6460_s10  ;;  %443 = vrot.lane.b32.xlu1 %v6806_v26, %s6460_s10 }
  0xd2   : > { %415 = vrot.lane.b32.xlu0 %v6718_v11, %s6460_s10  ;;  %423 = vrot.lane.b32.xlu1 %v6816_v28, %s6460_s10 }
  0xd6   : > { %433 = vrot.lane.b32.xlu0 %v6799_v25, %s6460_s10  ;;  %441 = vrot.lane.b32.xlu1 %v6826_v30, %s6460_s10 }
  0xda   : > { %431 = vrot.lane.b32.xlu0 %v6819_v29, %s6460_s10  ;;  %439 = vrot.lane.b32.xlu1 %v6836_v32, %s6460_s10 }
  0xde   : > { %598 = vrot.lane.b32.xlu0 %v6732_v13, %s6459_s8  ;;  %596 = vrot.lane.b32.xlu1 %v6739_v14, %s6459_s8 }
  0xe0   : > { %v551_v36 = vpop.permute.xlu0 %550  ;;  %v6884_v37 = vpop.permute.xlu1 %542 }
  0xe1   : > { %v628_v41 = vsel %vm600_vm0, %v6884_v37, %v551_v36 }
  0xe2   : > { %594 = vrot.lane.b32.xlu0 %v6750_v15, %s6459_s8  ;;  %592 = vrot.lane.b32.xlu1 %v6769_v19, %s6459_s8 }
  0xe4   : > { %v6891_v38 = vpop.permute.xlu0 %558  ;;  %v549_v39 = vpop.permute.xlu1 %548 }
  0xe5   : > { %v624_v40 = vsel %vm600_vm0, %v551_v36, %v6891_v38 }
  0xe6   : > { %714 = vmatprep.subr.mxu0 %v624_v40  ;;  %453 = vrot.lane.b32.xlu0 %v6789_v23, %s6460_s10 }
  0xe7   : > { %451 = vrot.lane.b32.xlu1 %v6809_v27, %s6460_s10  ;;  %715 = vmatpush1.msra.mxu0 %v628_v41  ;;  %v6993_v41 = vadd.s32 384, %v6882_v35 }
  0xe8   : > { %v6903_v42 = vpop.permute.xlu0 %556  ;;  %v6905_v43 = vpop.permute.xlu1 %540 }
  0xe9   : > { %v623_v44 = vsel %vm600_vm0, %v549_v39, %v6903_v42  ;;  %v627_v45 = vsel %vm600_vm0, %v6905_v43, %v549_v39 }
  0xea   : > { %716 = vmatprep.subr.mxu0 %v623_v44  ;;  %449 = vrot.lane.b32.xlu0 %v6829_v31, %s6460_s10 }
  0xeb   : > { %447 = vrot.lane.b32.xlu1 %v6839_v33, %s6460_s10  ;;  %717 = vmatpush1.msra.mxu0 %v627_v45 }
  0xec   : > { %v6917_v46 = vpop.permute.xlu1 %554  ;;  %v547_v47 = vpop.permute.xlu0 %546 }
  0xed   : > { %v622_v48 = vsel %vm600_vm0, %v547_v47, %v6917_v46 }
  0xee   : > { %718 = vmatprep.subr.mxu0 %v622_v48  ;;  %675 = vperm.xlu0 %6067, %v669_v56   ;;  %v386_v48 = vand.u32 511, %v6993_v41 }
  0xef   : > { %680 = vperm.xlu1 %6068, %v670_v60  }
  0xf0   : > { %v6922_v49 = vpop.permute.xlu0 %538  ;;  %v545_v50 = vpop.permute.xlu1 %544  ;;  %vm7008_vm3 = vcmp.ne.s32.totalorder %v386_v48, 511 }
  0xf1   : > { %v626_v51 = vsel %vm600_vm0, %v6922_v49, %v547_v47 }
  0xf2   : > { %719 = vmatpush1.msra.mxu0 %v626_v51  ;;  %690 = vperm.xlu0 %6067, %v672_v62  }
  0xf4   : > { %v6927_v52 = vpop.permute.xlu0 %552  ;;  %v6929_v53 = vpop.permute.xlu1 %536 }
  0xf5   : > { %v621_v54 = vsel %vm600_vm0, %v545_v50, %v6927_v52  ;;  %v625_v55 = vsel %vm600_vm0, %v6929_v53, %v545_v50 }
  0xf6   : > { %720 = vmatprep.subr.mxu0 %v621_v54 }
  0xf7   : > { %721 = vmatpush1.msra.mxu0 %v625_v55 }
  0xf8   : > { %v406_v57 = vpop.permute.xlu0 %405  ;;  %722 = vmatprep.subr.mxu0 %v6668_v1  ;;  %v6941_v58 = vpop.permute.xlu1 %413  ;;  %v671_v1 = vld [vmem:[%s8972_s2 + $0x10] sm:$0xff] }
  0xf9   : > { %723 = vmatpush1.msra.mxu0 %v6671_v2  ;;  %685 = vperm.xlu1 %6068, %v671_v1  }
  0xfa   : > { %724 = vmatprep.subr.mxu0 %v6681_v4  ;;  %v491_v4 = vsel %vm463_vm1, %v406_v57, %v6941_v58 }
  0xfb   : > { %725 = vmatpush1.msra.mxu0 %v6691_v6 }
  0xfc   : > { %v6953_v63 = vpop.permute.xlu0 %461  ;;  %726 = vmatprep.subr.mxu0 %v6701_v8  ;;  %v404_v0 = vpop.permute.xlu1 %403 }
  0xfd   : > { %727 = vmatpush1.msra.mxu0 %v6708_v9  ;;  %v495_v9 = vsel %vm463_vm1, %v6953_v63, %v406_v57 }
  0xfe   : > { %728 = vmatprep.subr.mxu0 %v6711_v10 }
  0xff   : > { %729 = vmatpush1.msra.mxu0 %v6721_v12 }
 0x100   : > { %v6970_v6 = vpop.permute.xlu0 %411  ;;  %730 = vmatprep.subr.mxu0 %v491_v4  ;;  %v6972_v8 = vpop.permute.xlu1 %459  ;;  %v7031_v4 = vld [vmem:[#allocation6 + $0x8] sm:$0xff] }
 0x101   : > { %5085 = vmatpush1.msk.msra.mxu0 %vm6962_vm2, %v495_v9  ;;  %v490_v10 = vsel %vm463_vm1, %v404_v0, %v6970_v6  ;;  %v494_v12 = vsel %vm463_vm1, %v6972_v8, %v404_v0 }
 0x102   : > { %732 = vmatprep.subr.mxu0 %v490_v10 }
 0x103   : > { %5087 = vmatpush1.msk.msra.mxu0 %vm6962_vm2, %v494_v12 }
 0x104   : > { %v402_v36 = vpop.permute.xlu0 %401  ;;  %v6987_v39 = vpop.permute.xlu1 %409 }
 0x105   : > { %v489_v40 = vsel %vm463_vm1, %v402_v36, %v6987_v39 }
 0x106   : > { %734 = vmatprep.subr.mxu0 %v489_v40 }
 0x108   : > { %v6995_v44 = vpop.permute.xlu0 %457  ;;  %v400_v45 = vpop.permute.xlu1 %399 }
 0x109   : > { %v493_v47 = vsel %vm463_vm1, %v6995_v44, %v402_v36 }
 0x10a   : > { %5089 = vmatpush1.msk.msra.mxu0 %vm6962_vm2, %v493_v47 }
 0x10c   : > { %v7003_v50 = vpop.permute.xlu0 %407  ;;  %v567_v51 = vpop.permute.xlu1 %566 }
 0x10d   : > { %v488_v54 = vsel %vm463_vm1, %v400_v45, %v7003_v50  ;;  %v620_v62 = vsel %vm600_vm0, %v6891_v38, %v567_v51 }
 0x10e   : > { %736 = vmatprep.subr.mxu0 %v488_v54 }
 0x110   : > { %v575_v56 = vpop.permute.xlu0 %574  ;;  %v7012_v57 = vpop.permute.xlu1 %455 }
 0x111   : > { %v492_v60 = vsel %vm463_vm1, %v7012_v57, %v400_v45  ;;  %v616_v61 = vsel %vm600_vm0, %v567_v51, %v575_v56  ;;  %v7060_v51 = vld [vmem:[#allocation6 + $0x18] sm:$0xff] }
 0x112   : > { %5091 = vmatpush1.msk.msra.mxu0 %vm6962_vm2, %v492_v60  ;;  %5097 = vmatprep.subr.msk.mxu1 %vm7008_vm3, %v616_v61 }
 0x113   : > { %804 = vmatpush1.msra.mxu1 %v620_v62  ;;  %5092 = vmatmul.mubr.msk.f32.vlgmr.msra.gmra.mxu0 %vm693_vm4, %v7014_v59 }
 0x114   : > { %v565_v0 = vpop.permute.xlu0 %564  ;;  %v573_v1 = vpop.permute.xlu1 %572  ;;  %776 = vmatprep.mubr.f32.mxu0 %v8983_v17 }
 0x115   : > { %v615_v2 = vsel %vm600_vm0, %v565_v0, %v573_v1  ;;  %v619_v9 = vsel %vm600_vm0, %v6903_v42, %v565_v0  ;;  %v7050_v42 = vld [vmem:[#allocation6 + $0x10] sm:$0xff] }
 0x116   : > { %5099 = vmatprep.subr.msk.mxu1 %vm7008_vm3, %v615_v2 }
 0x117   : > { %806 = vmatpush1.msra.mxu1 %v619_v9  ;;  %5093 = vmatmul.mubr.msk.f32.gmra.mxu0 %vm693_vm4, %v7031_v4 }
 0x118   : > { %v583_v38 = vpop.permute.xlu0 %582  ;;  %v7042_v10 = vpop.permute.xlu1 %590  ;;  %782 = vmatprep.mubr.f32.mxu0 %v8983_v17 }
 0x119   : > { %v608_v12 = vsel %vm600_vm0, %v583_v38, %v7042_v10  ;;  %v612_v36 = vsel %vm600_vm0, %v575_v56, %v583_v38 }
 0x11a   : > { %892 = vmatprep.subr.mxu0 %v608_v12 }
 0x11b   : > { %893 = vmatpush1.msra.mxu0 %v612_v36 }
 0x11c   : > { %v563_v40 = vpop.permute.xlu0 %562  ;;  %v571_v45 = vpop.permute.xlu1 %570  ;;  %5094 = vmatmul.mubr.msk.f32.gmra.mxu0 %vm693_vm4, %v7050_v42 }
 0x11d   : > { %v614_v47 = vsel %vm600_vm0, %v563_v40, %v571_v45  ;;  %v618_v48 = vsel %vm600_vm0, %v6917_v46, %v563_v40  ;;  %788 = vmatprep.mubr.f32.mxu0 %v8983_v17 }
 0x11e   : > { %5101 = vmatprep.subr.msk.mxu1 %vm7008_vm3, %v614_v47 }
 0x11f   : > { %808 = vmatpush1.msra.mxu1 %v618_v48 }
 0x120   : > { %v581_v54 = vpop.permute.xlu0 %580  ;;  %v7064_v56 = vpop.permute.xlu1 %588  ;;  %5095 = vmatmul.mubr.msk.f32.gmra.mxu0 %vm693_vm4, %v7060_v51 }
 0x121   : > { %v607_v60 = vsel %vm600_vm0, %v581_v54, %v7064_v56  ;;  %v611_v46 = vsel %vm600_vm0, %v573_v1, %v581_v54  ;;  %948 = vmatprep.mubr.f32.mxu0 %v8983_v17 }
 0x122   : > { %894 = vmatprep.subr.mxu0 %v607_v60 }
 0x123   : > { %895 = vmatpush1.msra.mxu0 %v611_v46 }
 0x124   : > { %v561_v61 = vpop.permute.xlu0 %560  ;;  %v569_v62 = vpop.permute.xlu1 %568 }
 0x125   : > { %v613_v0 = vsel %vm600_vm0, %v561_v61, %v569_v62  ;;  %v617_v2 = vsel %vm600_vm0, %v6927_v52, %v561_v61 }
 0x126   : > { %5103 = vmatprep.subr.msk.mxu1 %vm7008_vm3, %v613_v0  ;;  %v382_v0 = vadd.s32 896, %v6882_v35 }
 0x127   : > { %810 = vmatpush1.msra.mxu1 %v617_v2 }
 0x128   : > { %v579_v9 = vpop.permute.xlu0 %578  ;;  %v7081_v38 = vpop.permute.xlu1 %586  ;;  %811 = vmatprep.subr.mxu1 %v6757_v16 }
 0x129   : > { %v606_v1 = vsel %vm600_vm0, %v579_v9, %v7081_v38  ;;  %812 = vmatpush1.msra.mxu1 %v6678_v3  ;;  %v610_v12 = vsel %vm600_vm0, %v571_v45, %v579_v9 }
 0x12a   : > { %896 = vmatprep.subr.mxu0 %v606_v1  ;;  %813 = vmatprep.subr.mxu1 %v6776_v20 }
 0x12b   : > { %897 = vmatpush1.msra.mxu0 %v610_v12  ;;  %814 = vmatpush1.msra.mxu1 %v6688_v5 }
 0x12c   : > { %v577_v52 = vpop.permute.xlu0 %576  ;;  %v7092_v55 = vpop.permute.xlu1 %584  ;;  %815 = vmatprep.subr.mxu1 %v6796_v24  ;;  %v379_v24 = vadd.s32 512, %v6882_v35 }
 0x12d   : > { %v605_v16 = vsel %vm600_vm0, %v577_v52, %v7092_v55  ;;  %816 = vmatpush1.msra.mxu1 %v6698_v7  ;;  %v609_v3 = vsel %vm600_vm0, %v569_v62, %v577_v52 }
 0x12e   : > { %898 = vmatprep.subr.mxu0 %v605_v16  ;;  %817 = vmatprep.subr.mxu1 %v6816_v28 }
 0x12f   : > { %899 = vmatpush1.msra.mxu0 %v609_v3  ;;  %818 = vmatpush1.msra.mxu1 %v6718_v11 }
 0x130   : > { %v422_v5 = vpop.permute.xlu0 %421  ;;  %v430_v20 = vpop.permute.xlu1 %429  ;;  %900 = vmatprep.subr.mxu0 %v6786_v22  ;;  %v387_v22 = vand.u32 511, %v379_v24 }
 0x131   : > { %v483_v36 = vsel %vm463_vm1, %v422_v5, %v430_v20  ;;  %v487_v7 = vsel %vm463_vm1, %v6941_v58, %v422_v5  ;;  %901 = vmatpush1.msra.mxu0 %v6766_v18 }
 0x132   : > { %819 = vmatprep.subr.mxu1 %v483_v36  ;;  %902 = vmatprep.subr.mxu0 %v6806_v26  ;;  %vm7124_vm5 = vcmp.ne.s32.totalorder %v387_v22, 0  ;;  %v1274_v26 = vld [vmem:[#allocation8 + $0x1a0] sm:$0xff] }
 0x133   : > { %820 = vmatpush1.msra.mxu1 %v487_v7  ;;  %903 = vmatpush1.msra.mxu0 %v6779_v21 }
 0x134   : > { %v420_v11 = vpop.permute.xlu0 %419  ;;  %v428_v28 = vpop.permute.xlu1 %427  ;;  %904 = vmatprep.subr.mxu0 %v6826_v30 }
 0x135   : > { %v482_v40 = vsel %vm463_vm1, %v420_v11, %v428_v28  ;;  %v486_v58 = vsel %vm463_vm1, %v6970_v6, %v420_v11  ;;  %905 = vmatpush1.msra.mxu0 %v6799_v25 }
 0x136   : > { %821 = vmatprep.subr.mxu1 %v482_v40  ;;  %906 = vmatprep.subr.mxu0 %v6836_v32 }
 0x137   : > { %822 = vmatpush1.msra.mxu1 %v486_v58  ;;  %907 = vmatpush1.msra.mxu0 %v6819_v29 }
 0x138   : > { %v438_v18 = vpop.permute.xlu0 %437  ;;  %v7122_v21 = vpop.permute.xlu1 %445 }
 0x139   : > { %v479_v30 = vsel %vm463_vm1, %v430_v20, %v438_v18  ;;  %v475_v25 = vsel %vm463_vm1, %v438_v18, %v7122_v21  ;;  %v1275_v18 = vld [vmem:[#allocation8 + $0x1a8] sm:$0xff] }
 0x13a   : > { %908 = vmatprep.subr.mxu0 %v475_v25  ;;  %v1403_v25 = vld [vmem:[#allocation8 + $0x5a8] sm:$0xff] }
 0x13b   : > { %5109 = vmatpush1.msk.msra.mxu0 %vm7124_vm5, %v479_v30  ;;  %v1271_v30 = vld [vmem:[#allocation8 + $0x188] sm:$0xff] }
 0x13c   : > { %v418_v32 = vpop.permute.xlu0 %417  ;;  %v426_v29 = vpop.permute.xlu1 %425  ;;  %v1247_v20 = vld [vmem:[#allocation8 + $0xc8] sm:$0xff] }
 0x13d   : > { %v481_v6 = vsel %vm463_vm1, %v418_v32, %v426_v29  ;;  %v485_v45 = vsel %vm463_vm1, %v6987_v39, %v418_v32  ;;  %v1270_v32 = vld [vmem:[#allocation8 + $0x180] sm:$0xff] }
 0x13e   : > { %823 = vmatprep.subr.mxu1 %v481_v6  ;;  %v1267_v6 = vld [vmem:[#allocation8 + $0x168] sm:$0xff] }
 0x13f   : > { %824 = vmatpush1.msra.mxu1 %v485_v45  ;;  %v1398_v45 = vld [vmem:[#allocation8 + $0x580] sm:$0xff] }
 0x140   : > { %v436_v47 = vpop.permute.xlu0 %435  ;;  %v7140_v48 = vpop.permute.xlu1 %443 }
 0x141   : > { %v478_v54 = vsel %vm463_vm1, %v428_v28, %v436_v47  ;;  %v474_v60 = vsel %vm463_vm1, %v436_v47, %v7140_v48  ;;  %v1266_v47 = vld [vmem:[#allocation8 + $0x160] sm:$0xff] }
 0x142   : > { %910 = vmatprep.subr.mxu0 %v474_v60  ;;  %v1394_v60 = vld [vmem:[#allocation8 + $0x560] sm:$0xff] }
 0x143   : > { %5111 = vmatpush1.msk.msra.mxu0 %vm7124_vm5, %v478_v54  ;;  %v1263_v54 = vld [vmem:[#allocation8 + $0x148] sm:$0xff] }
 0x144   : > { %v416_v46 = vpop.permute.xlu0 %415  ;;  %v424_v61 = vpop.permute.xlu1 %423 }
 0x145   : > { %v480_v39 = vsel %vm463_vm1, %v416_v46, %v424_v61  ;;  %v484_v62 = vsel %vm463_vm1, %v7003_v50, %v416_v46  ;;  %v390_v50 = vand.u32 511, %v382_v0  ;;  %v1262_v46 = vld [vmem:[#allocation8 + $0x140] sm:$0xff] }
 0x146   : > { %825 = vmatprep.subr.mxu1 %v480_v39  ;;  %v1259_v39 = vld [vmem:[#allocation8 + $0x128] sm:$0xff]  ;;  %v1258_v0 = vld [vmem:[#allocation8 + $0x120] sm:$0xff] }
 0x147   : > { %826 = vmatpush1.msra.mxu1 %v484_v62  ;;  %vm7179_vm6 = vcmp.ne.s32.totalorder %v390_v50, 511  ;;  %v1390_v62 = vld [vmem:[#allocation8 + $0x540] sm:$0xff]  ;;  %v1383_v50 = vld [vmem:[#allocation8 + $0x508] sm:$0xff] }
 0x148   : > { %v434_v2 = vpop.permute.xlu0 %433  ;;  %5104 = vmatmul.mubr.msk.f32.vlgmr.msra.gmra.mxu1 %vm693_vm4, %v7014_v59  ;;  %v7157_v9 = vpop.permute.xlu1 %441 }
 0x149   : > { %v477_v1 = vsel %vm463_vm1, %v426_v29, %v434_v2  ;;  %v473_v12 = vsel %vm463_vm1, %v434_v2, %v7157_v9  ;;  %865 = vmatprep.mubr.f32.mxu1 %v8983_v17  ;;  %v1399_v29 = vld [vmem:[#allocation8 + $0x588] sm:$0xff] }
 0x14a   : > { %912 = vmatprep.subr.mxu0 %v473_v12  ;;  %v1387_v2 = vld [vmem:[#allocation8 + $0x528] sm:$0xff]  ;;  %v1254_v12 = vld [vmem:[#allocation8 + $0x100] sm:$0xff] }
 0x14b   : > { %5113 = vmatpush1.msk.msra.mxu0 %vm7124_vm5, %v477_v1  ;;  %v1386_v1 = vld [vmem:[#allocation8 + $0x520] sm:$0xff] }
 0x14c   : > { %v432_v52 = vpop.permute.xlu0 %431  ;;  %5105 = vmatmul.mubr.msk.f32.gmra.mxu1 %vm693_vm4, %v7031_v4  ;;  %v7169_v16 = vpop.permute.xlu1 %439 }
 0x14d   : > { %v476_v3 = vsel %vm463_vm1, %v424_v61, %v432_v52  ;;  %v472_v5 = vsel %vm463_vm1, %v432_v52, %v7169_v16  ;;  %871 = vmatprep.mubr.f32.mxu1 %v8983_v17  ;;  %v1391_v61 = vld [vmem:[#allocation8 + $0x548] sm:$0xff] }
 0x14e   : > { %914 = vmatprep.subr.mxu0 %v472_v5  ;;  %v1251_v52 = vld [vmem:[#allocation8 + $0xe8] sm:$0xff] }
 0x14f   : > { %5115 = vmatpush1.msk.msra.mxu0 %vm7124_vm5, %v476_v3  ;;  %v1250_v3 = vld [vmem:[#allocation8 + $0xe0] sm:$0xff]  ;;  %v1379_v5 = vld [vmem:[#allocation8 + $0x4e8] sm:$0xff] }
 0x150   : > { %v599_v24 = vpop.permute.xlu0 %598  ;;  %5106 = vmatmul.mubr.msk.f32.gmra.mxu1 %vm693_vm4, %v7050_v42  ;;  %5116 = vmatmul.mubr.msk.f32.vlgmr.msra.gmra.mxu0 %vm693_vm4, %v7014_v59  ;;  %v597_v36 = vpop.permute.xlu1 %596 }
 0x151   : > { %v632_v7 = vsel %vm600_vm0, %v599_v24, %v6884_v37  ;;  %877 = vmatprep.mubr.f32.mxu1 %v8983_v17  ;;  %954 = vmatprep.mubr.f32.mxu0 %v8983_v17  ;;  %v604_v11 = vsel %vm600_vm0, %v7042_v10, %v599_v24  ;;  %v631_v37 = vsel %vm600_vm0, %v597_v36, %v6905_v43  ;;  %v1378_v24 = vld [vmem:[#allocation8 + $0x4e0] sm:$0xff] }
 0x152   : > { %5121 = vmatprep.subr.msk.mxu1 %vm7179_vm6, %v632_v7  ;;  %v603_v10 = vsel %vm600_vm0, %v7064_v56, %v597_v36  ;;  %v1246_v36 = vld [vmem:[#allocation8 + $0xc0] sm:$0xff]  ;;  %v1375_v7 = vld [vmem:[#allocation8 + $0x4c8] sm:$0xff] }
 0x153   : > { %982 = vmatpush1.msra.mxu1 %v604_v11  ;;  %v1243_v11 = vld [vmem:[#allocation8 + $0xa8] sm:$0xff] }
 0x154   : > { %v595_v28 = vpop.permute.xlu0 %594  ;;  %5107 = vmatmul.mubr.msk.f32.gmra.mxu1 %vm693_vm4, %v7060_v51  ;;  %5117 = vmatmul.mubr.msk.f32.gmra.mxu0 %vm693_vm4, %v7031_v4  ;;  %v593_v22 = vpop.permute.xlu1 %592 }
 0x155   : > { %5123 = vmatprep.subr.msk.mxu1 %vm7179_vm6, %v631_v37  ;;  %v630_v40 = vsel %vm600_vm0, %v595_v28, %v6922_v49  ;;  %960 = vmatprep.mubr.f32.mxu0 %v8983_v17  ;;  %v602_v58 = vsel %vm600_vm0, %v7081_v38, %v595_v28  ;;  %v629_v43 = vsel %vm600_vm0, %v593_v22, %v6929_v53  ;;  %v1279_v38 = vld [vmem:[#allocation8 + $0x1c8] sm:$0xff]  ;;  %v1374_v28 = vld [vmem:[#allocation8 + $0x4c0] sm:$0xff] }
 0x156   : > { %984 = vmatpush1.msra.mxu1 %v603_v10  ;;  %1037 = vmatprep.mubr.f32.mxu1 %v8983_v17  ;;  %v601_v49 = vsel %vm600_vm0, %v7092_v55, %v593_v22  ;;  %v1411_v55 = vld [vmem:[#allocation8 + $0x5e8] sm:$0xff]  ;;  %v1242_v37 = vld [vmem:[#allocation8 + $0xa0] sm:$0xff] }
 0x157   : > { %5125 = vmatprep.subr.msk.mxu1 %vm7179_vm6, %v630_v40  ;;  %v1371_v22 = vld [vmem:[#allocation8 + $0x4a8] sm:$0xff]  ;;  %v1370_v40 = vld [vmem:[#allocation8 + $0x4a0] sm:$0xff] }
 0x158   : > { %986 = vmatpush1.msra.mxu1 %v602_v58  ;;  %5118 = vmatmul.mubr.msk.f32.gmra.mxu0 %vm693_vm4, %v7050_v42  ;;  %v454_v56 = vpop.permute.xlu0 %453  ;;  %v1239_v10 = vld [vmem:[#allocation8 + $0x88] sm:$0xff]  ;;  %v1238_v58 = vld [vmem:[#allocation8 + $0x80] sm:$0xff] }
 0x159   : > { %5127 = vmatprep.subr.msk.mxu1 %vm7179_vm6, %v629_v43  ;;  %966 = vmatprep.mubr.f32.mxu0 %v8983_v17  ;;  %v452_v53 = vpop.permute.xlu1 %451  ;;  %v1367_v43 = vld [vmem:[#allocation8 + $0x488] sm:$0xff] }
 0x15a   : > { %988 = vmatpush1.msra.mxu1 %v601_v49  ;;  %v1235_v49 = vld [vmem:[#allocation8 + $0x68] sm:$0xff] }
 0x15b   : > { %989 = vmatprep.subr.mxu1 %v6732_v13  ;;  %v467_v13 = vsel %vm463_vm1, %v454_v56, %v6953_v63 }
 0x15c   : > { %990 = vmatpush1.msra.mxu1 %v6789_v23  ;;  %5119 = vmatmul.mubr.msk.f32.gmra.mxu0 %vm693_vm4, %v7060_v51  ;;  %v450_v23 = vpop.permute.xlu0 %449 }
 0x15d   : > { %991 = vmatprep.subr.mxu1 %v6739_v14  ;;  %v471_v14 = vsel %vm463_vm1, %v7122_v21, %v454_v56  ;;  %v1407_v21 = vld [vmem:[#allocation8 + $0x5c8] sm:$0xff]  ;;  %v1366_v56 = vld [vmem:[#allocation8 + $0x480] sm:$0xff] }
 0x15e   : > { %992 = vmatpush1.msra.mxu1 %v6809_v27  ;;  %v448_v27 = vpop.permute.xlu1 %447 }
 0x15f   : > { %993 = vmatprep.subr.mxu1 %v6750_v15  ;;  %v466_v15 = vsel %vm463_vm1, %v452_v53, %v6972_v8  ;;  %v464_v63 = vsel %vm463_vm1, %v448_v27, %v7012_v57  ;;  %v468_v8 = vsel %vm463_vm1, %v7169_v16, %v448_v27  ;;  %v1282_v57 = vld [vmem:[#allocation8 + $0x1e0] sm:$0xff]  ;;  %v1359_v27 = vld [vmem:[#allocation8 + $0x448] sm:$0xff] }
 0x160   : > { %994 = vmatpush1.msra.mxu1 %v6829_v31  ;;  %v465_v31 = vsel %vm463_vm1, %v450_v23, %v6995_v44  ;;  %v1283_v44 = vld [vmem:[#allocation8 + $0x1e8] sm:$0xff]  ;;  %v1382_v16 = vld [vmem:[#allocation8 + $0x500] sm:$0xff] }
 0x161   : > { %995 = vmatprep.subr.mxu1 %v6769_v19  ;;  %v470_v19 = vsel %vm463_vm1, %v7140_v48, %v452_v53  ;;  %1734 = vmatprep.subr.mxu0 %v1283_v44  ;;  %v1395_v48 = vld [vmem:[#allocation8 + $0x568] sm:$0xff]  ;;  %v1234_v53 = vld [vmem:[#allocation8 + $0x60] sm:$0xff] }
 0x162   : > { %996 = vmatpush1.msra.mxu1 %v6839_v33  ;;  %v469_v33 = vsel %vm463_vm1, %v7157_v9, %v450_v23  ;;  %1735 = vmatpush1.msra.mxu0 %v1282_v57  ;;  %v1255_v9 = vld [vmem:[#allocation8 + $0x108] sm:$0xff]  ;;  %v1354_v44 = vld [vmem:[#allocation8 + $0x420] sm:$0xff] }
 0x163   : > { %997 = vmatprep.subr.mxu1 %v467_v13  ;;  %1736 = vmatprep.subr.mxu0 %v1279_v38  ;;  %v1363_v13 = vld [vmem:[#allocation8 + $0x468] sm:$0xff]  ;;  %v1222_v57 = vld [vmem:[#allocation8] sm:$0xff] }
 0x164   : > { %998 = vmatpush1.msra.mxu1 %v471_v14  ;;  %v1231_v23 = vld [vmem:[#allocation8 + $0x48] sm:$0xff]  ;;  %v1362_v14 = vld [vmem:[#allocation8 + $0x460] sm:$0xff] }
 0x165   : > { %999 = vmatprep.subr.mxu1 %v466_v15  ;;  %v1230_v15 = vld [vmem:[#allocation8 + $0x40] sm:$0xff]  ;;  %v1351_v38 = vld [vmem:[#allocation8 + $0x408] sm:$0xff] }
 0x166   : > { %1000 = vmatpush1.msra.mxu1 %v470_v19  ;;  %v1227_v19 = vld [vmem:[#allocation8 + $0x28] sm:$0xff] }
 0x167   : > { %1001 = vmatprep.subr.mxu1 %v465_v31  ;;  %v1358_v31 = vld [vmem:[#allocation8 + $0x440] sm:$0xff] }
 0x168   : > { %1002 = vmatpush1.msra.mxu1 %v469_v33  ;;  %v1226_v33 = vld [vmem:[#allocation8 + $0x20] sm:$0xff] }
 0x169   : > { %1003 = vmatprep.subr.mxu1 %v464_v63  ;;  %v1355_v63 = vld [vmem:[#allocation8 + $0x428] sm:$0xff] }
 0x16a   : > { %1004 = vmatpush1.msra.mxu1 %v468_v8  ;;  %v1223_v8 = vld [vmem:[#allocation8 + $0x8] sm:$0xff] }
 0x16b   : > { %5128 = vmatmul.mubr.msk.f32.vlgmr.msra.gmra.mxu1 %vm693_vm4, %v7014_v59  ;;  %v1278_v59 = vld [vmem:[#allocation8 + $0x1c0] sm:$0xff]  ;;  %1823 = vmatprep.subr.mxu1 %v1411_v55 }
 0x16c   : > { %1043 = vmatprep.mubr.f32.mxu1 %v8983_v17  ;;  %1737 = vmatpush1.msra.mxu0 %v1278_v59  ;;  %v1347_v59 = vld [vmem:[#allocation8 + $0x3e8] sm:$0xff]  ;;  %v1350_v55 = vld [vmem:[#allocation8 + $0x400] sm:$0xff] }
 0x16d   : > { %1738 = vmatprep.subr.mxu0 %v1275_v18  ;;  %v1346_v18 = vld [vmem:[#allocation8 + $0x3e0] sm:$0xff] }
 0x16e   : > { %1739 = vmatpush1.msra.mxu0 %v1274_v26  ;;  %v1474_v26 = vld [vmem:[#allocation8 + $0x7e0] sm:$0xff] }
 0x16f   : > { %5129 = vmatmul.mubr.msk.f32.gmra.mxu1 %vm693_vm4, %v7031_v4  ;;  %v1410_v4 = vld [vmem:[#allocation8 + $0x5e0] sm:$0xff]  ;;  %1740 = vmatprep.subr.mxu0 %v1271_v30  ;;  %v1471_v30 = vld [vmem:[#allocation8 + $0x7c8] sm:$0xff] }
 0x170   : > { %1049 = vmatprep.mubr.f32.mxu1 %v8983_v17  ;;  %1824 = vmatpush1.msra.mxu1 %v1410_v4  ;;  %v1475_v4 = vld [vmem:[#allocation8 + $0x7e8] sm:$0xff] }
 0x171   : > { %1825 = vmatprep.subr.mxu1 %v1407_v21  ;;  %1741 = vmatpush1.msra.mxu0 %v1270_v32  ;;  %v1343_v21 = vld [vmem:[#allocation8 + $0x3c8] sm:$0xff]  ;;  %v1338_v32 = vld [vmem:[#allocation8 + $0x3a0] sm:$0xff] }
 0x172   : > { %1742 = vmatprep.subr.mxu0 %v1267_v6  ;;  %v1335_v6 = vld [vmem:[#allocation8 + $0x388] sm:$0xff] }
 0x173   : > { %5130 = vmatmul.mubr.msk.f32.gmra.mxu1 %vm693_vm4, %v7050_v42  ;;  %v1406_v42 = vld [vmem:[#allocation8 + $0x5c0] sm:$0xff]  ;;  %1743 = vmatpush1.msra.mxu0 %v1266_v47 }
 0x174   : > { %1055 = vmatprep.mubr.f32.mxu1 %v8983_v17  ;;  %1826 = vmatpush1.msra.mxu1 %v1406_v42  ;;  %v1342_v42 = vld [vmem:[#allocation8 + $0x3c0] sm:$0xff] }
 0x175   : > { %1827 = vmatprep.subr.mxu1 %v1403_v25  ;;  %1744 = vmatprep.subr.mxu0 %v1263_v54  ;;  %v1339_v25 = vld [vmem:[#allocation8 + $0x3a8] sm:$0xff]  ;;  %v1334_v47 = vld [vmem:[#allocation8 + $0x380] sm:$0xff] }
 0x176   : > { %1745 = vmatpush1.msra.mxu0 %v1262_v46  ;;  %v1331_v54 = vld [vmem:[#allocation8 + $0x368] sm:$0xff]  ;;  %v1330_v46 = vld [vmem:[#allocation8 + $0x360] sm:$0xff] }
 0x177   : > { %5131 = vmatmul.mubr.msk.f32.gmra.mxu1 %vm693_vm4, %v7060_v51  ;;  %v1402_v51 = vld [vmem:[#allocation8 + $0x5a0] sm:$0xff]  ;;  %1746 = vmatprep.subr.mxu0 %v1259_v39  ;;  %v1327_v39 = vld [vmem:[#allocation8 + $0x348] sm:$0xff] }
 0x178   : > { %1828 = vmatpush1.msra.mxu1 %v1402_v51  ;;  %1747 = vmatpush1.msra.mxu0 %v1258_v0  ;;  %v1470_v51 = vld [vmem:[#allocation8 + $0x7c0] sm:$0xff] }
 0x179   : > { %1829 = vmatprep.subr.mxu1 %v1399_v29  ;;  %1748 = vmatprep.subr.mxu0 %v1255_v9  ;;  %v1467_v29 = vld [vmem:[#allocation8 + $0x7a8] sm:$0xff]  ;;  %v1326_v0 = vld [vmem:[#allocation8 + $0x340] sm:$0xff] }
 0x17a   : > { %1830 = vmatpush1.msra.mxu1 %v1398_v45  ;;  %1749 = vmatpush1.msra.mxu0 %v1254_v12  ;;  %v1466_v45 = vld [vmem:[#allocation8 + $0x7a0] sm:$0xff]  ;;  %v1323_v9 = vld [vmem:[#allocation8 + $0x328] sm:$0xff] }
 0x17b   : > { %1831 = vmatprep.subr.mxu1 %v1395_v48  ;;  %1750 = vmatprep.subr.mxu0 %v1251_v52  ;;  %v1463_v48 = vld [vmem:[#allocation8 + $0x788] sm:$0xff]  ;;  %v1322_v12 = vld [vmem:[#allocation8 + $0x320] sm:$0xff] }
 0x17c   : > { %1832 = vmatpush1.msra.mxu1 %v1394_v60  ;;  %1751 = vmatpush1.msra.mxu0 %v1250_v3  ;;  %v1462_v60 = vld [vmem:[#allocation8 + $0x780] sm:$0xff]  ;;  %v1319_v52 = vld [vmem:[#allocation8 + $0x308] sm:$0xff] }
 0x17d   : > { %1833 = vmatprep.subr.mxu1 %v1391_v61  ;;  %1752 = vmatprep.subr.mxu0 %v1247_v20  ;;  %v1459_v61 = vld [vmem:[#allocation8 + $0x768] sm:$0xff]  ;;  %v1318_v3 = vld [vmem:[#allocation8 + $0x300] sm:$0xff] }
 0x17e   : > { %1834 = vmatpush1.msra.mxu1 %v1390_v62  ;;  %1753 = vmatpush1.msra.mxu0 %v1246_v36  ;;  %v1458_v62 = vld [vmem:[#allocation8 + $0x760] sm:$0xff]  ;;  %v1315_v20 = vld [vmem:[#allocation8 + $0x2e8] sm:$0xff] }
 0x17f   : > { %1835 = vmatprep.subr.mxu1 %v1387_v2  ;;  %1754 = vmatprep.subr.mxu0 %v1243_v11  ;;  %v1455_v2 = vld [vmem:[#allocation8 + $0x748] sm:$0xff]  ;;  %v1314_v36 = vld [vmem:[#allocation8 + $0x2e0] sm:$0xff] }
 0x180   : > { %1836 = vmatpush1.msra.mxu1 %v1386_v1  ;;  %1755 = vmatpush1.msra.mxu0 %v1242_v37  ;;  %v1454_v1 = vld [vmem:[#allocation8 + $0x740] sm:$0xff]  ;;  %v1311_v11 = vld [vmem:[#allocation8 + $0x2c8] sm:$0xff] }
 0x181   : > { %1837 = vmatprep.subr.mxu1 %v1383_v50  ;;  %1756 = vmatprep.subr.mxu0 %v1239_v10  ;;  %v1451_v50 = vld [vmem:[#allocation8 + $0x728] sm:$0xff]  ;;  %v1310_v37 = vld [vmem:[#allocation8 + $0x2c0] sm:$0xff] }
 0x182   : > { %1838 = vmatpush1.msra.mxu1 %v1382_v16  ;;  %1757 = vmatpush1.msra.mxu0 %v1238_v58  ;;  %v1450_v16 = vld [vmem:[#allocation8 + $0x720] sm:$0xff]  ;;  %v1307_v10 = vld [vmem:[#allocation8 + $0x2a8] sm:$0xff] }
 0x183   : > { %1839 = vmatprep.subr.mxu1 %v1379_v5  ;;  %1758 = vmatprep.subr.mxu0 %v1235_v49  ;;  %v1447_v5 = vld [vmem:[#allocation8 + $0x708] sm:$0xff]  ;;  %v1306_v58 = vld [vmem:[#allocation8 + $0x2a0] sm:$0xff] }
 0x184   : > { %1840 = vmatpush1.msra.mxu1 %v1378_v24  ;;  %1759 = vmatpush1.msra.mxu0 %v1234_v53  ;;  %v1446_v24 = vld [vmem:[#allocation8 + $0x700] sm:$0xff] }
 0x185   : > { %1841 = vmatprep.subr.mxu1 %v1375_v7  ;;  %1760 = vmatprep.subr.mxu0 %v1231_v23  ;;  %v1443_v7 = vld [vmem:[#allocation8 + $0x6e8] sm:$0xff]  ;;  %v1434_v53 = vld [vmem:[#allocation8 + $0x6a0] sm:$0xff] }
 0x186   : > { %1842 = vmatpush1.msra.mxu1 %v1374_v28  ;;  %1761 = vmatpush1.msra.mxu0 %v1230_v15  ;;  %v1442_v28 = vld [vmem:[#allocation8 + $0x6e0] sm:$0xff]  ;;  %v1431_v23 = vld [vmem:[#allocation8 + $0x688] sm:$0xff] }
 0x187   : > { %1843 = vmatprep.subr.mxu1 %v1371_v22  ;;  %1762 = vmatprep.subr.mxu0 %v1227_v19  ;;  %v1439_v22 = vld [vmem:[#allocation8 + $0x6c8] sm:$0xff]  ;;  %v1298_v15 = vld [vmem:[#allocation8 + $0x260] sm:$0xff] }
 0x188   : > { %1844 = vmatpush1.msra.mxu1 %v1370_v40  ;;  %1763 = vmatpush1.msra.mxu0 %v1226_v33  ;;  %v1438_v40 = vld [vmem:[#allocation8 + $0x6c0] sm:$0xff] }
 0x189   : > { %1845 = vmatprep.subr.mxu1 %v1367_v43  ;;  %1764 = vmatprep.subr.mxu0 %v1223_v8  ;;  %v1435_v43 = vld [vmem:[#allocation8 + $0x6a8] sm:$0xff]  ;;  %v1430_v8 = vld [vmem:[#allocation8 + $0x680] sm:$0xff] }
 0x18a   : > { %1846 = vmatpush1.msra.mxu1 %v1366_v56  ;;  %1765 = vmatpush1.msra.mxu0 %v1222_v57  ;;  %v1303_v56 = vld [vmem:[#allocation8 + $0x288] sm:$0xff] }
 0x18b   : > { %1847 = vmatprep.subr.mxu1 %v1363_v13  ;;  %1766 = vmatprep.subr.mxu0 %v1347_v59  ;;  %v1302_v13 = vld [vmem:[#allocation8 + $0x280] sm:$0xff]  ;;  %v1427_v57 = vld [vmem:[#allocation8 + $0x668] sm:$0xff] }
 0x18c   : > { %1848 = vmatpush1.msra.mxu1 %v1362_v14  ;;  %1767 = vmatpush2.msra.mxu0 %v1346_v18  ;;  %v1299_v14 = vld [vmem:[#allocation8 + $0x268] sm:$0xff]  ;;  %v1290_v18 = vld [vmem:[#allocation8 + $0x220] sm:$0xff] }
 0x18d   : > { %1849 = vmatprep.subr.mxu1 %v1359_v27  ;;  %1768 = vmatprep.subr.mxu0 %v1343_v21  ;;  %v1291_v59 = vld [vmem:[#allocation8 + $0x228] sm:$0xff] }
 0x18e   : > { %1850 = vmatpush1.msra.mxu1 %v1358_v31  ;;  %1769 = vmatpush2.msra.mxu0 %v1342_v42  ;;  %v1422_v42 = vld [vmem:[#allocation8 + $0x640] sm:$0xff] }
 0x18f   : > { %1851 = vmatprep.subr.mxu1 %v1355_v63  ;;  %1770 = vmatprep.subr.mxu0 %v1339_v25  ;;  %v1295_v63 = vld [vmem:[#allocation8 + $0x248] sm:$0xff]  ;;  %v1286_v25 = vld [vmem:[#allocation8 + $0x200] sm:$0xff] }
 0x190   : > { %1852 = vmatpush1.msra.mxu1 %v1354_v44  ;;  %1771 = vmatpush2.msra.mxu0 %v1338_v32  ;;  %v1294_v44 = vld [vmem:[#allocation8 + $0x240] sm:$0xff] }
 0x191   : > { %1853 = vmatprep.subr.mxu1 %v1351_v38  ;;  %1772 = vmatprep.subr.mxu0 %v1335_v6  ;;  %v7279_v38 = vpop.permute.xlu0 %675  ;;  %v1418_v6 = vld [vmem:[#allocation8 + $0x620] sm:$0xff] }
 0x192   : > { %1854 = vmatpush1.msra.mxu1 %v1350_v55  ;;  %1773 = vmatpush2.msra.mxu0 %v1334_v47  ;;  %v1426_v55 = vld [vmem:[#allocation8 + $0x660] sm:$0xff]  ;;  %v7287_v47 = vpop.permute.xlu1 %680 }
 0x193   : > { %1855 = vmatprep.subr.mxu1 %v1475_v4  ;;  %1774 = vmatprep.subr.mxu0 %v1331_v54  ;;  %v1423_v4 = vld [vmem:[#allocation8 + $0x648] sm:$0xff] }
 0x194   : > { %1856 = vmatpush2.msra.mxu1 %v1474_v26  ;;  %1775 = vmatpush2.msra.mxu0 %v1330_v46  ;;  %v1287_v26 = vld [vmem:[#allocation8 + $0x208] sm:$0xff] }
 0x195   : > { %1857 = vmatprep.subr.mxu1 %v1471_v30  ;;  %1776 = vmatprep.subr.mxu0 %v1327_v39  ;;  %v1415_v54 = vld [vmem:[#allocation8 + $0x608] sm:$0xff] }
 0x196   : > { %1858 = vmatpush2.msra.mxu1 %v1470_v51  ;;  %1777 = vmatpush2.msra.mxu0 %v1326_v0  ;;  %v1419_v51 = vld [vmem:[#allocation8 + $0x628] sm:$0xff] }
 0x197   : > { %1859 = vmatprep.subr.mxu1 %v1467_v29  ;;  %1778 = vmatprep.subr.mxu0 %v1323_v9 }
 0x198   : > { %1860 = vmatpush2.msra.mxu1 %v1466_v45  ;;  %1779 = vmatpush2.msra.mxu0 %v1322_v12  ;;  %v1539_v45 = vld [vmem:[#allocation8 + $0x9e8] sm:$0xff] }
 0x199   : > { %1861 = vmatprep.subr.mxu1 %v1463_v48  ;;  %1780 = vmatprep.subr.mxu0 %v1319_v52 }
 0x19a   : > { %1862 = vmatpush2.msra.mxu1 %v1462_v60  ;;  %1781 = vmatpush2.msra.mxu0 %v1318_v3 }
 0x19b   : > { %1863 = vmatprep.subr.mxu1 %v1459_v61  ;;  %1782 = vmatprep.subr.mxu0 %v1315_v20  ;;  %v1414_v61 = vld [vmem:[#allocation8 + $0x600] sm:$0xff]  ;;  %v7311_v20 = vpop.permute.xlu1 %685 }
 0x19c   : > { %1864 = vmatpush2.msra.mxu1 %v1458_v62  ;;  %1783 = vmatpush2.msra.mxu0 %v1314_v36 }
 0x19d   : > { %1865 = vmatprep.subr.mxu1 %v1455_v2  ;;  %1784 = vmatprep.subr.mxu0 %v1311_v11  ;;  %v1667_v2 = vld [vmem:[#allocation8 + $0xde8] sm:$0xff] }
 0x19e   : > { %1866 = vmatpush2.msra.mxu1 %v1454_v1  ;;  %1785 = vmatpush2.msra.mxu0 %v1310_v37 }
 0x19f   : > { %1867 = vmatprep.subr.mxu1 %v1451_v50  ;;  %1786 = vmatprep.subr.mxu0 %v1307_v10 }
 0x1a0   : > { %1868 = vmatpush2.msra.mxu1 %v1450_v16  ;;  %1787 = vmatpush2.msra.mxu0 %v1306_v58 }
 0x1a1   : > { %1869 = vmatprep.subr.mxu1 %v1447_v5  ;;  %1788 = vmatprep.subr.mxu0 %v1303_v56 }
 0x1a2   : > { %1870 = vmatpush2.msra.mxu1 %v1446_v24  ;;  %1789 = vmatpush2.msra.mxu0 %v1302_v13 }
 0x1a3   : > { %1871 = vmatprep.subr.mxu1 %v1443_v7  ;;  %1790 = vmatprep.subr.mxu0 %v1299_v14 }
 0x1a4   : > { %1872 = vmatpush2.msra.mxu1 %v1442_v28  ;;  %1791 = vmatpush2.msra.mxu0 %v1298_v15 }
 0x1a5   : > { %1873 = vmatprep.subr.mxu1 %v1439_v22  ;;  %1792 = vmatprep.subr.mxu0 %v1295_v63 }
 0x1a6   : > { %1874 = vmatpush2.msra.mxu1 %v1438_v40  ;;  %1793 = vmatpush2.msra.mxu0 %v1294_v44 }
 0x1a7   : > { %1875 = vmatprep.subr.mxu1 %v1435_v43  ;;  %1794 = vmatprep.subr.mxu0 %v1291_v59 }
 0x1a8   : > { %1876 = vmatpush2.msra.mxu1 %v1434_v53  ;;  %1795 = vmatpush2.msra.mxu0 %v1290_v18 }
 0x1a9   : > { %1877 = vmatprep.subr.mxu1 %v1431_v23  ;;  %1796 = vmatprep.subr.mxu0 %v1287_v26 }
 0x1aa   : > { %1878 = vmatpush2.msra.mxu1 %v1430_v8  ;;  %1797 = vmatpush2.msra.mxu0 %v1286_v25 }
 0x1ab   : > { %1879 = vmatprep.subr.mxu1 %v1427_v57  ;;  %1912 = vmatprep.subr.mxu0 %v1539_v45 }
 0x1ac   : > { %1880 = vmatpush2.msra.mxu1 %v1426_v55 }
 0x1ad   : > { %1881 = vmatprep.subr.mxu1 %v1423_v4 }
 0x1ae   : > { %1882 = vmatpush2.msra.mxu1 %v1422_v42 }
 0x1af   : > { %1883 = vmatprep.subr.mxu1 %v1419_v51 }
 0x1b0   : > { %1884 = vmatpush2.msra.mxu1 %v1418_v6 }
 0x1b1   : > { %1885 = vmatprep.subr.mxu1 %v1415_v54 }
 0x1b2   : > { %1886 = vmatpush2.msra.mxu1 %v1414_v61 }
 0x1b3   : > { %2001 = vmatprep.subr.mxu1 %v1667_v2 }
 0x1d3   : > { %v772_v49 = vpop.f32.mrf.mxu0 }
 0x1d4   : > { %v7285_v29 = vadd.f32 %v772_v49, %v7279_v38 }
 0x1d5   : > { %v774_v27 = vpop.f32.mrf.mxu0 }
 0x1d6   : > { %v7282_v30 = vadd.f32 %v774_v27, %v7279_v38  ;;  %v1062_v9 = vmax.f32 %v7285_v29, 0.0 }
 0x1d7   : > { %v7275_v19 = vpop.f32.mrf.mxu0 }
 0x1d8   : > { %v1063_v39 = vmax.f32 %v7282_v30, 0.0  ;;  %v7325_v22 = vadd.f32 %v7275_v19, %v7287_v47  ;;  %v1538_v30 = vld [vmem:[#allocation8 + $0x9e0] sm:$0xff] }
 0x1d9   : > { %v780_v31 = vpop.f32.mrf.mxu0 }
 0x1da   : > { %v7306_v52 = vadd.f32 %v780_v31, %v7287_v47  ;;  %v1070_v15 = vmax.f32 %v7325_v22, 0.0  ;;  %v7355_v31 = vpop.permute.xlu0 %690  ;;  %v1519_v22 = vld [vmem:[#allocation8 + $0x948] sm:$0xff] }
 0x1dc   : > { %v7277_v33 = vpop.f32.mrf.mxu0  ;;  %v1071_v37 = vmax.f32 %v7306_v52, 0.0 }
 0x1dd   : > { %v7346_v27 = vadd.f32 %v7277_v33, %v7311_v20 }
 0x1de   : > { %v786_v21 = vpop.f32.mrf.mxu0 }
 0x1df   : > { %v7332_v43 = vadd.f32 %v786_v21, %v7311_v20  ;;  %v1078_v26 = vmax.f32 %v7346_v27, 0.0 }
 0x1e0   : > { %v7292_v60 = vpop.f32.mrf.mxu0 }
 0x1e1   : > { %v1079_v8 = vmax.f32 %v7332_v43, 0.0 }
 0x1e2   : > { %v792_v3 = vpop.f32.mrf.mxu0 }
 0x1e3   : > { %v7371_v21 = vadd.f32 %v792_v3, %v7355_v31 }
 0x208   : > { %v861_v32 = vpop.f32.mrf.mxu1 }
 0x209   : > { %v7290_v48 = vadd.f32 %v861_v32, %v7279_v38 }
 0x20a   : > { %v863_v46 = vpop.f32.mrf.mxu1 }
 0x20b   : > { %v1064_v62 = vmax.f32 %v7290_v48, 0.0  ;;  %v7297_v0 = vadd.f32 %v863_v46, %v7279_v38  ;;  %v7394_v46 = vadd.f32 %v7292_v60, %v7355_v31 }
 0x20c   : > { %v867_v1 = vpop.f32.mrf.mxu1 }
 0x20d   : > { %v6069_v12 = vpack.i.bf16 %v1064_v62, %v1063_v39  ;;  %v1065_v50 = vmax.f32 %v7297_v0, 0.0  ;;  %v7309_v16 = vadd.f32 %v867_v1, %v7287_v47  ;;  %v9005_v1 = vmax.f32 %v7371_v21, 0.0 }
 0x20e   : > { %v869_v5 = vpop.f32.mrf.mxu1 }
 0x20f   : > { %v6074_v24 = vpack.i.bf16 %v1065_v50, %v1062_v9  ;;  %v1072_v36 = vmax.f32 %v7309_v16, 0.0  ;;  %v7319_v7 = vadd.f32 %v869_v5, %v7287_v47  ;;  %6070 = vrot.lane.b32.xlu1 %v6069_v12, %s6459_s8 }
 0x210   : > { %v873_v11 = vpop.f32.mrf.mxu1  ;;  %v950_v28 = vpop.f32.mrf.mxu0 }
 0x211   : > { %v7328_v10 = vadd.f32 %v950_v28, %v7279_v38  ;;  %6075 = vrot.lane.b32.xlu0 %v6074_v24, %s6459_s8  ;;  %v6079_v49 = vpack.i.bf16 %v1072_v36, %v1071_v37  ;;  %v1073_v56 = vmax.f32 %v7319_v7, 0.0  ;;  %v7340_v53 = vadd.f32 %v873_v11, %v7311_v20 }
 0x212   : > { %v875_v40 = vpop.f32.mrf.mxu1  ;;  %v952_v58 = vpop.f32.mrf.mxu0  ;;  %v9004_v28 = vmax.f32 %v7394_v46, 0.0 }
 0x213   : > { %v8998_v13 = vmax.f32 %v7328_v10, 0.0  ;;  %v7358_v63 = vadd.f32 %v875_v40, %v7311_v20  ;;  %v6084_v33 = vpack.i.bf16 %v1073_v56, %v1070_v15  ;;  %v9006_v57 = vmax.f32 %v7340_v53, 0.0 }
 0x214   : > { %v879_v23 = vpop.f32.mrf.mxu1  ;;  %v956_v14 = vpop.f32.mrf.mxu0  ;;  %v7399_v12 = vadd.f32 %v952_v58, %v7279_v38 }
 0x215   : > { %v7349_v19 = vadd.f32 %v956_v14, %v7287_v47  ;;  %1126 = vrot.lane.b32.xlu1 %v8998_v13, %s6459_s8  ;;  %6080 = vrot.lane.b32.xlu0 %v6079_v49, %s6459_s8  ;;  %v7367_v59 = vadd.f32 %v879_v23, %v7355_v31  ;;  %v1081_v25 = vmax.f32 %v7358_v63, 0.0  ;;  %v6089_v45 = vpack.i.bf16 %v1078_v26, %v9006_v57  ;;  %v1655_v57 = vld [vmem:[#allocation8 + $0xd88] sm:$0xff] }
 0x216   : > { %v958_v44 = vpop.f32.mrf.mxu0  ;;  %v881_v18 = vpop.f32.mrf.mxu1  ;;  %v9000_v40 = vmax.f32 %v7399_v12, 0.0 }
 0x217   : > { %v8987_v55 = vmax.f32 %v7349_v19, 0.0  ;;  %v7381_v51 = vadd.f32 %v881_v18, %v7355_v31  ;;  %v9002_v54 = vmax.f32 %v7367_v59, 0.0  ;;  %v7430_v14 = vadd.f32 %v958_v44, %v7287_v47 }
 0x218   : > { %v962_v4 = vpop.f32.mrf.mxu0 }
 0x219   : > { %v6099_v42 = vpack.i.bf16 %v1079_v8, %v8987_v55  ;;  %6085 = vrot.lane.b32.xlu1 %v6084_v33, %s6459_s8  ;;  %v7384_v32 = vadd.f32 %v962_v4, %v7311_v20  ;;  %v9003_v5 = vmax.f32 %v7381_v51, 0.0  ;;  %v6094_v24 = vpack.i.bf16 %v9002_v54, %v9005_v1  ;;  %v1522_v1 = vld [vmem:[#allocation8 + $0x960] sm:$0xff] }
 0x21a   : > { %v964_v6 = vpop.f32.mrf.mxu0 }
 0x21b   : > { %6100 = vrot.lane.b32.xlu0 %v6099_v42, %s6459_s8  ;;  %v8986_v61 = vmax.f32 %v7384_v32, 0.0  ;;  %v6109_v58 = vpack.i.bf16 %v9003_v5, %v9004_v28  ;;  %v7436_v4 = vadd.f32 %v964_v6, %v7311_v20 }
 0x21c   : > { %v968_v2 = vpop.f32.mrf.mxu0 }
 0x21d   : > { %v7402_v3 = vadd.f32 %v968_v2, %v7355_v31  ;;  %6090 = vrot.lane.b32.xlu1 %v6089_v45, %s6459_s8  ;;  %v6104_v60 = vpack.i.bf16 %v8986_v61, %v1081_v25  ;;  %v8991_v6 = vmax.f32 %v7436_v4, 0.0 }
 0x21f   : > { %v8985_v11 = vmax.f32 %v7402_v3, 0.0  ;;  %6105 = vrot.lane.b32.xlu0 %v6104_v60, %s6459_s8  ;;  %v8990_v60 = vmax.f32 %v7430_v14, 0.0 }
 0x221   : > { %6095 = vrot.lane.b32.xlu1 %v6094_v24, %s6459_s8  ;;  %v6114_v49 = vpack.i.bf16 %v9000_v40, %v8985_v11  ;;  %v1666_v40 = vld [vmem:[#allocation8 + $0xde0] sm:$0xff] }
 0x223   : > { %6110 = vrot.lane.b32.xlu0 %v6109_v58, %s6459_s8 }
 0x225   : > { %6115 = vrot.lane.b32.xlu1 %v6114_v49, %s6459_s8 }
 0x22b   : > { %v1039_v23 = vpop.f32.mrf.mxu1 }
 0x22c   : > { %v7433_v33 = vadd.f32 %v1039_v23, %v7279_v38  ;;  %v970_v23 = vpop.f32.mrf.mxu0 }
 0x22d   : > { %v1041_v18 = vpop.f32.mrf.mxu1 }
 0x22e   : > { %v8989_v42 = vmax.f32 %v7433_v33, 0.0  ;;  %v7440_v45 = vadd.f32 %v1041_v18, %v7279_v38 }
 0x22f   : > { %v1045_v2 = vpop.f32.mrf.mxu1 }
 0x230   : > { %v8999_v24 = vmax.f32 %v7440_v45, 0.0  ;;  %v7445_v44 = vadd.f32 %v1045_v2, %v7287_v47  ;;  %1142 = vrot.lane.b32.xlu0 %v8989_v42, %s6459_s8 }
 0x231   : > { %v1047_v58 = vpop.f32.mrf.mxu1 }
 0x232   : > { %v8988_v49 = vmax.f32 %v7445_v44, 0.0  ;;  %v7453_v38 = vadd.f32 %v1047_v58, %v7287_v47  ;;  %1150 = vrot.lane.b32.xlu1 %v8999_v24, %s6459_s8  ;;  %v7467_v47 = vadd.f32 %v970_v23, %v7355_v31 }
 0x233   : > { %v1051_v18 = vpop.f32.mrf.mxu1 }
 0x234   : > { %v6119_v2 = vpack.i.bf16 %v8988_v49, %v8990_v60  ;;  %v8994_v34 = vmax.f32 %v7453_v38, 0.0  ;;  %v7464_v17 = vadd.f32 %v1051_v18, %v7311_v20  ;;  %v8997_v60 = vmax.f32 %v7467_v47, 0.0 }
 0x235   : > { %v1053_v11 = vpop.f32.mrf.mxu1 }
 0x236   : > { %v6124_v58 = vpack.i.bf16 %v8991_v6, %v8994_v34  ;;  %v8992_v61 = vmax.f32 %v7464_v17, 0.0  ;;  %v7475_v55 = vadd.f32 %v1053_v11, %v7311_v20  ;;  %6120 = vrot.lane.b32.xlu0 %v6119_v2, %s6459_s8 }
 0x237   : > { %v1057_v49 = vpop.f32.mrf.mxu1 }
 0x238   : > { %v8993_v18 = vmax.f32 %v7475_v55, 0.0  ;;  %v7480_v42 = vadd.f32 %v1057_v49, %v7355_v31  ;;  %6125 = vrot.lane.b32.xlu1 %v6124_v58, %s6459_s8 }
 0x239   : > { %v1059_v23 = vpop.f32.mrf.mxu1 }
 0x23a   : > { %v6129_v6 = vpack.i.bf16 %v8993_v18, %v8992_v61  ;;  %v8995_v20 = vmax.f32 %v7480_v42, 0.0  ;;  %v7490_v11 = vadd.f32 %v1059_v23, %v7355_v31 }
 0x23c   : > { %v6134_v49 = vpack.i.bf16 %v8995_v20, %v8997_v60  ;;  %6130 = vrot.lane.b32.xlu0 %v6129_v6, %s6459_s8  ;;  %v8996_v2 = vmax.f32 %v7490_v11, 0.0 }
 0x23e   : > { %6135 = vrot.lane.b32.xlu1 %v6134_v49, %s6459_s8 }
 0x240   : > { %1156 = vrot.lane.b32.xlu0 %v8996_v2, %s6459_s8 }
 0x281   : > { %v6071_v58 = vpop.permute.xlu1 %6070 }
 0x282   : > { %v6073_v61 = vunpack.i.h.bf16 %v6071_v58  ;;  %v6072_v18 = vunpack.i.l.bf16 %v6071_v58 }
 0x283   : > { %v7502_v31 = vpop.permute.xlu0 %6075 }
 0x284   : > { %v6078_v23 = vunpack.i.h.bf16 %v7502_v31  ;;  %v9001_v34 = vunpack.i.l.bf16 %v7502_v31  ;;  %v1178_v6 = vsel %vm600_vm0, %v6072_v18, %v6073_v61 }
 0x285   : > { %v7510_v20 = vmax.f32 %v1063_v39, %v1178_v6 }
 0x286   : > { %v1182_v49 = vsel %vm600_vm0, %v9001_v34, %v6072_v18  ;;  %v1174_v58 = vsel %vm600_vm0, %v6073_v61, %v6078_v23  ;;  %v1535_v18 = vld [vmem:[#allocation8 + $0x9c8] sm:$0xff]  ;;  %v1526_v34 = vld [vmem:[#allocation8 + $0x980] sm:$0xff] }
 0x287   : > { %v7520_v2 = vmax.f32 %v1062_v9, %v1182_v49  ;;  %v6081_v60 = vpop.permute.xlu0 %6080  ;;  %v7522_v13 = vpop.permute.xlu1 %1126  ;;  %1798 = vmatprep.mubr.f32.mxu0 %v7510_v20  ;;  %v1534_v9 = vld [vmem:[#allocation8 + $0x9c0] sm:$0xff]  ;;  %v7535_v61 = vmax.f32 %v1064_v62, %v1174_v58  ;;  %v1531_v49 = vld [vmem:[#allocation8 + $0x9a8] sm:$0xff] }
 0x288   : > { %v6083_v39 = vunpack.i.h.bf16 %v6081_v60  ;;  %v6082_v6 = vunpack.i.l.bf16 %v6081_v60  ;;  %v1170_v24 = vsel %vm600_vm0, %v6078_v23, %v7522_v13  ;;  %v1663_v62 = vld [vmem:[#allocation8 + $0xdc8] sm:$0xff] }
 0x289   : > { %1799 = vmatmul.mubr.f32.vlgmr.msra.gmra.mxu0 %v7520_v2  ;;  %v7531_v29 = vmax.f32 %v1065_v50, %v1170_v24  ;;  %v1530_v50 = vld [vmem:[#allocation8 + $0x9a0] sm:$0xff]  ;;  %v1527_v24 = vld [vmem:[#allocation8 + $0x988] sm:$0xff] }
 0x28a   : > { %1913 = vmatpush1.msra.mxu0 %v1538_v30  ;;  %v1179_v60 = vsel %vm600_vm0, %v6082_v6, %v6083_v39 }
 0x28b   : > { %1914 = vmatprep.subr.mxu0 %v1535_v18  ;;  %1887 = vmatprep.mubr.f32.mxu1 %v7531_v29  ;;  %v7540_v23 = vpop.permute.xlu1 %6085  ;;  %v7544_v0 = vmax.f32 %v1071_v37, %v1179_v60  ;;  %v1662_v18 = vld [vmem:[#allocation8 + $0xdc0] sm:$0xff]  ;;  %v1659_v37 = vld [vmem:[#allocation8 + $0xda8] sm:$0xff] }
 0x28c   : > { %v9008_v48 = vunpack.i.l.bf16 %v7540_v23  ;;  %1915 = vmatpush1.msra.mxu0 %v1534_v9  ;;  %1888 = vmatmul.mubr.f32.vlgmr.msra.gmra.mxu1 %v7535_v61  ;;  %v6088_v58 = vunpack.i.h.bf16 %v7540_v23  ;;  %v1523_v60 = vld [vmem:[#allocation8 + $0x968] sm:$0xff] }
 0x28d   : > { %1916 = vmatprep.subr.mxu0 %v1531_v49  ;;  %2002 = vmatpush1.msra.mxu1 %v1666_v40  ;;  %v7549_v30 = vpop.permute.xlu0 %6100  ;;  %v1658_v40 = vld [vmem:[#allocation8 + $0xda0] sm:$0xff] }
 0x28e   : > { %v6102_v52 = vunpack.i.l.bf16 %v7549_v30  ;;  %1804 = vmatprep.mubr.f32.mxu0 %v7544_v0  ;;  %1917 = vmatpush1.msra.mxu0 %v1530_v50  ;;  %v1183_v9 = vsel %vm600_vm0, %v9008_v48, %v6082_v6  ;;  %v6103_v5 = vunpack.i.h.bf16 %v7549_v30  ;;  %v1413_v30 = vld [vmem:[#allocation8 + $0x5f8] sm:$0xff] }
 0x28f   : > { %2003 = vmatprep.subr.mxu1 %v1663_v62  ;;  %1918 = vmatprep.subr.mxu0 %v1527_v24  ;;  %v7557_v49 = vpop.permute.xlu1 %6090  ;;  %v7561_v54 = vmax.f32 %v1070_v15, %v1183_v9  ;;  %v1654_v15 = vld [vmem:[#allocation8 + $0xd80] sm:$0xff]  ;;  %v1175_v24 = vsel %vm600_vm0, %v6083_v39, %v6088_v58 }
 0x290   : > { %2004 = vmatpush1.msra.mxu1 %v1662_v18  ;;  %v9007_v50 = vunpack.i.h.bf16 %v7557_v49  ;;  %v6092_v28 = vunpack.i.l.bf16 %v7557_v49  ;;  %1919 = vmatpush1.msra.mxu0 %v1526_v34  ;;  %v1171_v6 = vsel %vm600_vm0, %v6088_v58, %v6102_v52  ;;  %v1518_v18 = vld [vmem:[#allocation8 + $0x940] sm:$0xff]  ;;  %v1651_v58 = vld [vmem:[#allocation8 + $0xd68] sm:$0xff] }
 0x291   : > { %2005 = vmatprep.subr.mxu1 %v1659_v37  ;;  %1920 = vmatprep.subr.mxu0 %v1523_v60  ;;  %v7572_v62 = vmax.f32 %v1073_v56, %v1171_v6  ;;  %v7576_v34 = vpop.permute.xlu0 %6105  ;;  %v7593_v6 = vmax.f32 %v1072_v36, %v1175_v24 }
 0x292   : > { %2006 = vmatpush1.msra.mxu1 %v1658_v40  ;;  %1805 = vmatmul.mubr.f32.gmra.mxu0 %v7561_v54  ;;  %v1180_v9 = vsel %vm600_vm0, %v6103_v5, %v6092_v28  ;;  %v1184_v37 = vsel %vm600_vm0, %v9007_v50, %v6103_v5  ;;  %v9011_v7 = vunpack.i.h.bf16 %v7576_v34  ;;  %v6107_v56 = vunpack.i.l.bf16 %v7576_v34  ;;  %v1515_v5 = vld [vmem:[#allocation8 + $0x928] sm:$0xff]  ;;  %v1650_v50 = vld [vmem:[#allocation8 + $0xd60] sm:$0xff] }
 0x293   : > { %1921 = vmatpush1.msra.mxu0 %v1522_v1  ;;  %2007 = vmatprep.subr.mxu1 %v1655_v57  ;;  %v7587_v39 = vpop.permute.xlu1 %6095  ;;  %v7597_v48 = vmax.f32 %v1079_v8, %v1180_v9  ;;  %v1514_v57 = vld [vmem:[#allocation8 + $0x920] sm:$0xff]  ;;  %v7602_v1 = vmax.f32 %v1078_v26, %v1184_v37  ;;  %v1647_v8 = vld [vmem:[#allocation8 + $0xd48] sm:$0xff] }
 0x294   : > { %1922 = vmatprep.subr.mxu0 %v1519_v22  ;;  %2008 = vmatpush1.msra.mxu1 %v1654_v15  ;;  %v6098_v60 = vunpack.i.h.bf16 %v7587_v39  ;;  %v6097_v40 = vunpack.i.l.bf16 %v7587_v39  ;;  %v1172_v16 = vsel %vm600_vm0, %v6107_v56, %v9011_v7  ;;  %v1176_v36 = vsel %vm600_vm0, %v6092_v28, %v6107_v56  ;;  %v1511_v26 = vld [vmem:[#allocation8 + $0x908] sm:$0xff]  ;;  %v1646_v22 = vld [vmem:[#allocation8 + $0xd40] sm:$0xff] }
 0x295   : > { %1893 = vmatprep.mubr.f32.mxu1 %v7572_v62  ;;  %1923 = vmatpush1.msra.mxu0 %v1518_v18  ;;  %v7611_v43 = vpop.permute.xlu0 %6110  ;;  %v7618_v24 = vmax.f32 %v1081_v25, %v1172_v16  ;;  %v1510_v9 = vld [vmem:[#allocation8 + $0x900] sm:$0xff]  ;;  %v1643_v56 = vld [vmem:[#allocation8 + $0xd28] sm:$0xff] }
 0x296   : > { %2009 = vmatprep.subr.mxu1 %v1651_v58  ;;  %1894 = vmatmul.mubr.f32.gmra.mxu1 %v7593_v6  ;;  %v9009_v27 = vunpack.i.l.bf16 %v7611_v43  ;;  %v1181_v28 = vsel %vm600_vm0, %v6097_v40, %v6098_v60  ;;  %v6113_v25 = vunpack.i.h.bf16 %v7611_v43  ;;  %v1507_v39 = vld [vmem:[#allocation8 + $0x8e8] sm:$0xff]  ;;  %v1642_v58 = vld [vmem:[#allocation8 + $0xd20] sm:$0xff] }
 0x297   : > { %1924 = vmatprep.subr.mxu0 %v1515_v5  ;;  %2010 = vmatpush1.msra.mxu1 %v1650_v50  ;;  %v7614_v15 = vpop.permute.xlu1 %6115  ;;  %v9054_v50 = vmax.f32 %v7340_v53, 0.0  ;;  %v9055_v5 = vmax.f32 %v7371_v21, 0.0  ;;  %v1639_v16 = vld [vmem:[#allocation8 + $0xd08] sm:$0xff] }
 0x298   : > { %1810 = vmatprep.mubr.f32.mxu0 %v7597_v48  ;;  %1925 = vmatpush1.msra.mxu0 %v1514_v57  ;;  %v9010_v18 = vunpack.i.l.bf16 %v7614_v15  ;;  %v1185_v63 = vsel %vm600_vm0, %v9009_v27, %v6097_v40  ;;  %v1506_v57 = vld [vmem:[#allocation8 + $0x8e0] sm:$0xff]  ;;  %v9056_v40 = vmax.f32 %v7394_v46, 0.0  ;;  %v9057_v46 = vmax.f32 %v7381_v51, 0.0  ;;  %v1671_v7 = vld [vmem:[#allocation8 + $0xe08] sm:$0xff] }
 0x299   : > { %v7626_v37 = vmax.f32 %v9054_v50, %v1176_v36  ;;  %2011 = vmatprep.subr.mxu1 %v1647_v8  ;;  %1811 = vmatmul.mubr.f32.gmra.mxu0 %v7602_v1  ;;  %v7636_v53 = vmax.f32 %v9055_v5, %v1181_v28  ;;  %v1503_v36 = vld [vmem:[#allocation8 + $0x8c8] sm:$0xff]  ;;  %v1634_v50 = vld [vmem:[#allocation8 + $0xce0] sm:$0xff]  ;;  %v9058_v5 = vmax.f32 %v7367_v59, 0.0  ;;  %v9060_v27 = vmax.f32 %v7399_v12, 0.0 }
 0x29a   : > { %1926 = vmatprep.subr.mxu0 %v1511_v26  ;;  %2012 = vmatpush1.msra.mxu1 %v1646_v22  ;;  %v7642_v8 = vmax.f32 %v9056_v40, %v1185_v63  ;;  %v1173_v21 = vsel %vm600_vm0, %v6113_v25, %v9010_v18  ;;  %v1638_v26 = vld [vmem:[#allocation8 + $0xd00] sm:$0xff]  ;;  %v1635_v28 = vld [vmem:[#allocation8 + $0xce8] sm:$0xff]  ;;  %v1177_v63 = vsel %vm600_vm0, %v6098_v60, %v6113_v25  ;;  %v6118_v40 = vunpack.i.h.bf16 %v7614_v15 }
 0x29b   : > { %1899 = vmatprep.mubr.f32.mxu1 %v7618_v24  ;;  %1927 = vmatpush1.msra.mxu0 %v1510_v9  ;;  %v1502_v22 = vld [vmem:[#allocation8 + $0x8c0] sm:$0xff]  ;;  %v1499_v9 = vld [vmem:[#allocation8 + $0x8a8] sm:$0xff] }
 0x29c   : > { %2013 = vmatprep.subr.mxu1 %v1643_v56  ;;  %1900 = vmatmul.mubr.f32.gmra.mxu1 %v7626_v37  ;;  %v7651_v56 = vmax.f32 %v9057_v46, %v1173_v21  ;;  %v1630_v51 = vld [vmem:[#allocation8 + $0xcc0] sm:$0xff]  ;;  %v1627_v25 = vld [vmem:[#allocation8 + $0xca8] sm:$0xff] }
 0x29d   : > { %1928 = vmatprep.subr.mxu0 %v1507_v39  ;;  %2014 = vmatpush1.msra.mxu1 %v1642_v58  ;;  %v1498_v39 = vld [vmem:[#allocation8 + $0x8a0] sm:$0xff]  ;;  %v1631_v58 = vld [vmem:[#allocation8 + $0xcc8] sm:$0xff] }
 0x29e   : > { %1816 = vmatprep.mubr.f32.mxu0 %v7636_v53  ;;  %1929 = vmatpush1.msra.mxu0 %v1506_v57  ;;  %v7658_v57 = vmax.f32 %v9058_v5, %v1177_v63  ;;  %v1494_v60 = vld [vmem:[#allocation8 + $0x880] sm:$0xff]  ;;  %v1491_v21 = vld [vmem:[#allocation8 + $0x868] sm:$0xff] }
 0x29f   : > { %2015 = vmatprep.subr.mxu1 %v1639_v16  ;;  %1930 = vmatprep.subr.mxu0 %v1503_v36  ;;  %v1495_v16 = vld [vmem:[#allocation8 + $0x888] sm:$0xff]  ;;  %v1622_v46 = vld [vmem:[#allocation8 + $0xc80] sm:$0xff] }
 0x2a0   : > { %2016 = vmatpush1.msra.mxu1 %v1638_v26  ;;  %1817 = vmatmul.mubr.f32.gmra.mxu0 %v7642_v8  ;;  %v1626_v26 = vld [vmem:[#allocation8 + $0xca0] sm:$0xff]  ;;  %v1611_v12 = vld [vmem:[#allocation8 + $0xc28] sm:$0xff] }
 0x2a1   : > { %1931 = vmatpush1.msra.mxu0 %v1502_v22  ;;  %2017 = vmatprep.subr.mxu1 %v1635_v28  ;;  %v1490_v22 = vld [vmem:[#allocation8 + $0x860] sm:$0xff]  ;;  %v1623_v28 = vld [vmem:[#allocation8 + $0xc88] sm:$0xff] }
 0x2a2   : > { %1932 = vmatprep.subr.mxu0 %v1499_v9  ;;  %2018 = vmatpush1.msra.mxu1 %v1634_v50  ;;  %v7660_v36 = vpop.permute.xlu0 %1142  ;;  %v1487_v50 = vld [vmem:[#allocation8 + $0x848] sm:$0xff]  ;;  %v1486_v63 = vld [vmem:[#allocation8 + $0x840] sm:$0xff] }
 0x2a3   : > { %1905 = vmatprep.mubr.f32.mxu1 %v7651_v56  ;;  %1933 = vmatpush1.msra.mxu0 %v1498_v39  ;;  %v1162_v59 = vsel %vm600_vm0, %v6118_v40, %v7660_v36  ;;  %v1619_v39 = vld [vmem:[#allocation8 + $0xc68] sm:$0xff] }
 0x2a4   : > { %2019 = vmatprep.subr.mxu1 %v1631_v58  ;;  %1906 = vmatmul.mubr.f32.gmra.mxu1 %v7658_v57  ;;  %v7670_v9 = vpop.permute.xlu1 %1150  ;;  %v9059_v58 = vunpack.i.l.bf16 %v7502_v31  ;;  %v1614_v31 = vld [vmem:[#allocation8 + $0xc40] sm:$0xff]  ;;  %v1675_v18 = vld [vmem:[#allocation8 + $0xe28] sm:$0xff] }
 0x2a5   : > { %1934 = vmatprep.subr.mxu0 %v1495_v16  ;;  %2020 = vmatpush1.msra.mxu1 %v1630_v51  ;;  %v1483_v16 = vld [vmem:[#allocation8 + $0x828] sm:$0xff]  ;;  %v1618_v51 = vld [vmem:[#allocation8 + $0xc60] sm:$0xff] }
 0x2a6   : > { %1935 = vmatpush1.msra.mxu0 %v1494_v60  ;;  %2021 = vmatprep.subr.mxu1 %v1627_v25  ;;  %v1186_v5 = vsel %vm600_vm0, %v7670_v9, %v9059_v58  ;;  %v7679_v60 = vmax.f32 %v9060_v27, %v1162_v59  ;;  %v1482_v25 = vld [vmem:[#allocation8 + $0x820] sm:$0xff]  ;;  %v1603_v27 = vld [vmem:[#allocation8 + $0xbe8] sm:$0xff] }
 0x2a7   : > { %1936 = vmatprep.subr.mxu0 %v1491_v21  ;;  %2022 = vmatpush1.msra.mxu1 %v1626_v26  ;;  %v1615_v21 = vld [vmem:[#allocation8 + $0xc48] sm:$0xff]  ;;  %v1610_v59 = vld [vmem:[#allocation8 + $0xc20] sm:$0xff] }
 0x2a8   : > { %1937 = vmatpush1.msra.mxu0 %v1490_v22  ;;  %2023 = vmatprep.subr.mxu1 %v1623_v28  ;;  %v1479_v26 = vld [vmem:[#allocation8 + $0x808] sm:$0xff]  ;;  %v1478_v22 = vld [vmem:[#allocation8 + $0x800] sm:$0xff]  ;;  %v9061_v28 = vmax.f32 %v7440_v45, 0.0 }
 0x2a9   : > { %1938 = vmatprep.subr.mxu0 %v1487_v50  ;;  %2024 = vmatpush1.msra.mxu1 %v1622_v46  ;;  %v1602_v50 = vld [vmem:[#allocation8 + $0xbe0] sm:$0xff]  ;;  %v1607_v46 = vld [vmem:[#allocation8 + $0xc08] sm:$0xff] }
 0x2aa   : > { %1939 = vmatpush1.msra.mxu0 %v1486_v63  ;;  %2025 = vmatprep.subr.mxu1 %v1619_v39  ;;  %v7683_v58 = vmax.f32 %v9061_v28, %v1186_v5  ;;  %v1599_v63 = vld [vmem:[#allocation8 + $0xbc8] sm:$0xff]  ;;  %v1606_v39 = vld [vmem:[#allocation8 + $0xc00] sm:$0xff] }
 0x2ab   : > { %1940 = vmatprep.subr.mxu0 %v1483_v16  ;;  %2026 = vmatpush1.msra.mxu1 %v1618_v51  ;;  %v1598_v45 = vld [vmem:[#allocation8 + $0xbc0] sm:$0xff]  ;;  %v1731_v5 = vld [vmem:[#allocation8 + $0xfe8] sm:$0xff] }
 0x2ac   : > { %1941 = vmatpush1.msra.mxu0 %v1482_v25  ;;  %1976 = vmatprep.mubr.f32.mxu0 %v7679_v60  ;;  %v1595_v16 = vld [vmem:[#allocation8 + $0xba8] sm:$0xff]  ;;  %v1730_v51 = vld [vmem:[#allocation8 + $0xfe0] sm:$0xff] }
 0x2ad   : > { %2027 = vmatprep.subr.mxu1 %v1615_v21  ;;  %1942 = vmatprep.subr.mxu0 %v1479_v26  ;;  %v1594_v25 = vld [vmem:[#allocation8 + $0xba0] sm:$0xff]  ;;  %v1727_v21 = vld [vmem:[#allocation8 + $0xfc8] sm:$0xff] }
 0x2ae   : > { %2028 = vmatpush1.msra.mxu1 %v1614_v31  ;;  %1943 = vmatpush1.msra.mxu0 %v1478_v22  ;;  %v1591_v26 = vld [vmem:[#allocation8 + $0xb88] sm:$0xff]  ;;  %v1726_v31 = vld [vmem:[#allocation8 + $0xfc0] sm:$0xff] }
 0x2af   : > { %2029 = vmatprep.subr.mxu1 %v1611_v12  ;;  %2065 = vmatprep.mubr.f32.mxu1 %v7683_v58  ;;  %v1590_v22 = vld [vmem:[#allocation8 + $0xb80] sm:$0xff]  ;;  %v1723_v28 = vld [vmem:[#allocation8 + $0xfa8] sm:$0xff] }
 0x2b0   : > { %1944 = vmatprep.subr.mxu0 %v1603_v27  ;;  %2030 = vmatpush1.msra.mxu1 %v1610_v59  ;;  %v1587_v12 = vld [vmem:[#allocation8 + $0xb68] sm:$0xff]  ;;  %v1722_v27 = vld [vmem:[#allocation8 + $0xfa0] sm:$0xff] }
 0x2b1   : > { %1945 = vmatpush2.msra.mxu0 %v1602_v50  ;;  %2031 = vmatprep.subr.mxu1 %v1607_v46  ;;  %v1586_v59 = vld [vmem:[#allocation8 + $0xb60] sm:$0xff]  ;;  %v1719_v50 = vld [vmem:[#allocation8 + $0xf88] sm:$0xff] }
 0x2b2   : > { %1946 = vmatprep.subr.mxu0 %v1599_v63  ;;  %2032 = vmatpush1.msra.mxu1 %v1606_v39  ;;  %v1583_v46 = vld [vmem:[#allocation8 + $0xb48] sm:$0xff]  ;;  %v1718_v63 = vld [vmem:[#allocation8 + $0xf80] sm:$0xff] }
 0x2b3   : > { %1947 = vmatpush2.msra.mxu0 %v1598_v45  ;;  %2033 = vmatprep.subr.mxu1 %v1731_v5  ;;  %v1582_v39 = vld [vmem:[#allocation8 + $0xb40] sm:$0xff]  ;;  %v1715_v45 = vld [vmem:[#allocation8 + $0xf68] sm:$0xff] }
 0x2b4   : > { %1948 = vmatprep.subr.mxu0 %v1595_v16  ;;  %2034 = vmatpush2.msra.mxu1 %v1730_v51  ;;  %v1579_v5 = vld [vmem:[#allocation8 + $0xb28] sm:$0xff]  ;;  %v1714_v16 = vld [vmem:[#allocation8 + $0xf60] sm:$0xff] }
 0x2b5   : > { %1949 = vmatpush2.msra.mxu0 %v1594_v25  ;;  %2035 = vmatprep.subr.mxu1 %v1727_v21  ;;  %v1578_v51 = vld [vmem:[#allocation8 + $0xb20] sm:$0xff]  ;;  %v1711_v25 = vld [vmem:[#allocation8 + $0xf48] sm:$0xff] }
 0x2b6   : > { %1950 = vmatprep.subr.mxu0 %v1591_v26  ;;  %2036 = vmatpush2.msra.mxu1 %v1726_v31  ;;  %v1575_v21 = vld [vmem:[#allocation8 + $0xb08] sm:$0xff]  ;;  %v1710_v26 = vld [vmem:[#allocation8 + $0xf40] sm:$0xff] }
 0x2b7   : > { %1951 = vmatpush2.msra.mxu0 %v1590_v22  ;;  %2037 = vmatprep.subr.mxu1 %v1723_v28  ;;  %v1574_v31 = vld [vmem:[#allocation8 + $0xb00] sm:$0xff]  ;;  %v1707_v22 = vld [vmem:[#allocation8 + $0xf28] sm:$0xff] }
 0x2b8   : > { %1952 = vmatprep.subr.mxu0 %v1587_v12  ;;  %2038 = vmatpush2.msra.mxu1 %v1722_v27  ;;  %v1571_v28 = vld [vmem:[#allocation8 + $0xae8] sm:$0xff]  ;;  %v1706_v12 = vld [vmem:[#allocation8 + $0xf20] sm:$0xff] }
 0x2b9   : > { %1953 = vmatpush2.msra.mxu0 %v1586_v59  ;;  %2039 = vmatprep.subr.mxu1 %v1719_v50  ;;  %v1570_v27 = vld [vmem:[#allocation8 + $0xae0] sm:$0xff]  ;;  %v1703_v59 = vld [vmem:[#allocation8 + $0xf08] sm:$0xff] }
 0x2ba   : > { %1954 = vmatprep.subr.mxu0 %v1583_v46  ;;  %2040 = vmatpush2.msra.mxu1 %v1718_v63  ;;  %v1567_v50 = vld [vmem:[#allocation8 + $0xac8] sm:$0xff]  ;;  %v1702_v46 = vld [vmem:[#allocation8 + $0xf00] sm:$0xff] }
 0x2bb   : > { %1955 = vmatpush2.msra.mxu0 %v1582_v39  ;;  %2041 = vmatprep.subr.mxu1 %v1715_v45  ;;  %v1566_v63 = vld [vmem:[#allocation8 + $0xac0] sm:$0xff]  ;;  %v1699_v39 = vld [vmem:[#allocation8 + $0xee8] sm:$0xff] }
 0x2bc   : > { %1956 = vmatprep.subr.mxu0 %v1579_v5  ;;  %2042 = vmatpush2.msra.mxu1 %v1714_v16  ;;  %v1563_v45 = vld [vmem:[#allocation8 + $0xaa8] sm:$0xff]  ;;  %v1698_v5 = vld [vmem:[#allocation8 + $0xee0] sm:$0xff] }
 0x2bd   : > { %1957 = vmatpush2.msra.mxu0 %v1578_v51  ;;  %2043 = vmatprep.subr.mxu1 %v1711_v25  ;;  %v1562_v16 = vld [vmem:[#allocation8 + $0xaa0] sm:$0xff]  ;;  %v1695_v51 = vld [vmem:[#allocation8 + $0xec8] sm:$0xff] }
 0x2be   : > { %1958 = vmatprep.subr.mxu0 %v1575_v21  ;;  %2044 = vmatpush2.msra.mxu1 %v1710_v26  ;;  %v1559_v25 = vld [vmem:[#allocation8 + $0xa88] sm:$0xff]  ;;  %v1694_v21 = vld [vmem:[#allocation8 + $0xec0] sm:$0xff] }
 0x2bf   : > { %1959 = vmatpush2.msra.mxu0 %v1574_v31  ;;  %2045 = vmatprep.subr.mxu1 %v1707_v22  ;;  %v1558_v26 = vld [vmem:[#allocation8 + $0xa80] sm:$0xff]  ;;  %v1691_v31 = vld [vmem:[#allocation8 + $0xea8] sm:$0xff]  ;;  %v7687_v22 = vpop.permute.xlu0 %6120 }
 0x2c0   : > { %1960 = vmatprep.subr.mxu0 %v1571_v28  ;;  %2046 = vmatpush2.msra.mxu1 %v1706_v12  ;;  %v1555_v28 = vld [vmem:[#allocation8 + $0xa68] sm:$0xff]  ;;  %v1690_v12 = vld [vmem:[#allocation8 + $0xea0] sm:$0xff] }
 0x2c1   : > { %1961 = vmatpush2.msra.mxu0 %v1570_v27  ;;  %2047 = vmatprep.subr.mxu1 %v1703_v59  ;;  %v1554_v27 = vld [vmem:[#allocation8 + $0xa60] sm:$0xff]  ;;  %v1687_v59 = vld [vmem:[#allocation8 + $0xe88] sm:$0xff] }
 0x2c2   : > { %1962 = vmatprep.subr.mxu0 %v1567_v50  ;;  %2048 = vmatpush2.msra.mxu1 %v1702_v46  ;;  %v1551_v50 = vld [vmem:[#allocation8 + $0xa48] sm:$0xff]  ;;  %v1686_v46 = vld [vmem:[#allocation8 + $0xe80] sm:$0xff] }
 0x2c3   : > { %1963 = vmatpush2.msra.mxu0 %v1566_v63  ;;  %2049 = vmatprep.subr.mxu1 %v1699_v39  ;;  %v6123_v63 = vunpack.i.h.bf16 %v7687_v22  ;;  %v6122_v39 = vunpack.i.l.bf16 %v7687_v22 }
 0x2c4   : > { %1964 = vmatprep.subr.mxu0 %v1563_v45  ;;  %2050 = vmatpush2.msra.mxu1 %v1698_v5  ;;  %v1550_v45 = vld [vmem:[#allocation8 + $0xa40] sm:$0xff]  ;;  %v1683_v5 = vld [vmem:[#allocation8 + $0xe68] sm:$0xff] }
 0x2c5   : > { %1965 = vmatpush2.msra.mxu0 %v1562_v16  ;;  %2051 = vmatprep.subr.mxu1 %v1695_v51  ;;  %v1547_v16 = vld [vmem:[#allocation8 + $0xa28] sm:$0xff]  ;;  %v1682_v51 = vld [vmem:[#allocation8 + $0xe60] sm:$0xff] }
 0x2c6   : > { %1966 = vmatprep.subr.mxu0 %v1559_v25  ;;  %2052 = vmatpush2.msra.mxu1 %v1694_v21  ;;  %v7691_v25 = vpop.permute.xlu1 %6125  ;;  %v1546_v21 = vld [vmem:[#allocation8 + $0xa20] sm:$0xff] }
 0x2c7   : > { %1967 = vmatpush2.msra.mxu0 %v1558_v26  ;;  %2053 = vmatprep.subr.mxu1 %v1691_v31  ;;  %v1679_v26 = vld [vmem:[#allocation8 + $0xe48] sm:$0xff]  ;;  %v1166_v31 = vsel %vm600_vm0, %v7522_v13, %v6118_v40  ;;  %v1674_v13 = vld [vmem:[#allocation8 + $0xe20] sm:$0xff]  ;;  %v9062_v40 = vmax.f32 %v7328_v10, 0.0  ;;  %v1284_v10 = vld [vmem:[#allocation8 + $0x1f0] sm:$0xff] }
 0x2c8   : > { %1968 = vmatprep.subr.mxu0 %v1555_v28  ;;  %2054 = vmatpush2.msra.mxu1 %v1690_v12  ;;  %v7698_v28 = vpop.permute.xlu0 %6130  ;;  %v1543_v12 = vld [vmem:[#allocation8 + $0xa08] sm:$0xff] }
 0x2c9   : > { %1969 = vmatpush2.msra.mxu0 %v1554_v27  ;;  %2055 = vmatprep.subr.mxu1 %v1687_v59  ;;  %v1678_v27 = vld [vmem:[#allocation8 + $0xe40] sm:$0xff] }
 0x2ca   : > { %1970 = vmatprep.subr.mxu0 %v1551_v50  ;;  %2056 = vmatpush2.msra.mxu1 %v1686_v46  ;;  %v1542_v59 = vld [vmem:[#allocation8 + $0xa00] sm:$0xff]  ;;  %v1163_v50 = vsel %vm600_vm0, %v6122_v39, %v6123_v63  ;;  %v6127_v46 = vunpack.i.l.bf16 %v7691_v25 }
 0x2cb   : > { %1971 = vmatpush2.msra.mxu0 %v1550_v45  ;;  %2057 = vmatprep.subr.mxu1 %v1683_v5  ;;  %v7707_v45 = vmax.f32 %v9062_v40, %v1166_v31  ;;  %v6132_v5 = vunpack.i.l.bf16 %v7698_v28  ;;  %v6128_v31 = vunpack.i.h.bf16 %v7691_v25  ;;  %v1277_v40 = vld [vmem:[#allocation8 + $0x1b8] sm:$0xff] }
 0x2cc   : > { %1972 = vmatprep.subr.mxu0 %v1547_v16  ;;  %2058 = vmatpush2.msra.mxu1 %v1682_v51  ;;  %v1285_v16 = vld [vmem:[#allocation8 + $0x1f8] sm:$0xff]  ;;  %v1158_v51 = vsel %vm600_vm0, %v7660_v36, %v7670_v9  ;;  %v1167_v36 = vsel %vm600_vm0, %v6102_v52, %v6122_v39  ;;  %v7724_v9 = vpop.permute.xlu1 %6135  ;;  %v6133_v39 = vunpack.i.h.bf16 %v7698_v28  ;;  %v1264_v28 = vld [vmem:[#allocation8 + $0x150] sm:$0xff] }
 0x2cd   : > { %1973 = vmatpush2.msra.mxu0 %v1546_v21  ;;  %2059 = vmatprep.subr.mxu1 %v1679_v26  ;;  %v9063_v21 = vmax.f32 %v7430_v14, 0.0  ;;  %v1280_v14 = vld [vmem:[#allocation8 + $0x1d0] sm:$0xff]  ;;  %v1164_v52 = vsel %vm600_vm0, %v6128_v31, %v6132_v5 }
 0x2ce   : > { %1974 = vmatprep.subr.mxu0 %v1543_v12  ;;  %2060 = vmatpush2.msra.mxu1 %v1678_v27  ;;  %v1670_v12 = vld [vmem:[#allocation8 + $0xe00] sm:$0xff]  ;;  %v1281_v27 = vld [vmem:[#allocation8 + $0x1d8] sm:$0xff] }
 0x2cf   : > { %1975 = vmatpush2.msra.mxu0 %v1542_v59  ;;  %2061 = vmatprep.subr.mxu1 %v1675_v18  ;;  %v7716_v26 = vmax.f32 %v9063_v21, %v1163_v50  ;;  %v9064_v18 = vunpack.i.l.bf16 %v7540_v23  ;;  %v9065_v59 = vmax.f32 %v7433_v33, 0.0  ;;  %v9066_v23 = vmax.f32 %v7349_v19, 0.0  ;;  %v1412_v21 = vld [vmem:[#allocation8 + $0x5f0] sm:$0xff] }
 0x2d0   : > { %1977 = vmatmul.mubr.f32.vlgmr.msra.gmra.mxu0 %v7707_v45  ;;  %2062 = vmatpush2.msra.mxu1 %v1674_v13  ;;  %v6138_v33 = vunpack.i.h.bf16 %v7724_v9  ;;  %v9068_v19 = vmax.f32 %v7436_v4, 0.0  ;;  %v1272_v4 = vld [vmem:[#allocation8 + $0x190] sm:$0xff] }
 0x2d1   : > { %2090 = vmatprep.subr.mxu0 %v1285_v16  ;;  %1982 = vmatprep.mubr.f32.mxu0 %v7716_v26  ;;  %v1187_v25 = vsel %vm600_vm0, %v6127_v46, %v9064_v18  ;;  %v7733_v50 = vmax.f32 %v9065_v59, %v1158_v51  ;;  %v7742_v13 = vmax.f32 %v9066_v23, %v1167_v36  ;;  %v9067_v16 = vmax.f32 %v7453_v38, 0.0  ;;  %v1273_v38 = vld [vmem:[#allocation8 + $0x198] sm:$0xff]  ;;  %v1157_v23 = vpop.permute.xlu0 %1156 }
 0x2d2   : > { %2063 = vmatprep.subr.mxu1 %v1671_v7  ;;  %2091 = vmatpush1.msra.mxu0 %v1284_v10  ;;  %v6137_v7 = vunpack.i.l.bf16 %v7724_v9  ;;  %v7754_v10 = vmax.f32 %v9068_v19, %v1164_v52  ;;  %v1159_v36 = vsel %vm600_vm0, %v6123_v63, %v6127_v46  ;;  %v9069_v18 = vunpack.i.h.bf16 %v7576_v34  ;;  %v1269_v52 = vld [vmem:[#allocation8 + $0x178] sm:$0xff] }
 0x2d3   : > { %2064 = vmatpush2.msra.mxu1 %v1670_v12  ;;  %2092 = vmatprep.subr.mxu0 %v1281_v27  ;;  %v7749_v51 = vmax.f32 %v9067_v16, %v1187_v25  ;;  %v1276_v12 = vld [vmem:[#allocation8 + $0x1b0] sm:$0xff]  ;;  %v1409_v27 = vld [vmem:[#allocation8 + $0x5d8] sm:$0xff]  ;;  %v9070_v59 = vunpack.i.h.bf16 %v7557_v49  ;;  %v9071_v63 = vmax.f32 %v7445_v44, 0.0  ;;  %v9073_v44 = vmax.f32 %v7475_v55, 0.0 }
 0x2d4   : > { %2066 = vmatmul.mubr.f32.vlgmr.msra.gmra.mxu1 %v7733_v50  ;;  %2093 = vmatpush1.msra.mxu0 %v1280_v14  ;;  %v1408_v14 = vld [vmem:[#allocation8 + $0x5d0] sm:$0xff]  ;;  %v1168_v25 = vsel %vm600_vm0, %v9069_v18, %v6128_v31  ;;  %v1165_v34 = vsel %vm600_vm0, %v6137_v7, %v6138_v33  ;;  %v9072_v31 = vmax.f32 %v7384_v32, 0.0  ;;  %v1265_v55 = vld [vmem:[#allocation8 + $0x158] sm:$0xff]  ;;  %v9080_v9 = vmax.f32 %v7480_v42, 0.0 }
 0x2d5   : > { %2179 = vmatprep.subr.mxu1 %v1413_v30  ;;  %1983 = vmatmul.mubr.f32.gmra.mxu0 %v7742_v13  ;;  %v1188_v22 = vsel %vm600_vm0, %v6133_v39, %v9070_v59  ;;  %v7772_v46 = vmax.f32 %v9071_v63, %v1159_v36  ;;  %v1405_v30 = vld [vmem:[#allocation8 + $0x5b8] sm:$0xff]  ;;  %v1404_v16 = vld [vmem:[#allocation8 + $0x5b0] sm:$0xff] }
 0x2d6   : > { %2071 = vmatprep.mubr.f32.mxu1 %v7749_v51  ;;  %2094 = vmatprep.subr.mxu0 %v1277_v40  ;;  %v7780_v49 = vmax.f32 %v9072_v31, %v1168_v25  ;;  %v7785_v40 = vmax.f32 %v9073_v44, %v1188_v22  ;;  %v1268_v32 = vld [vmem:[#allocation8 + $0x170] sm:$0xff]  ;;  %v1397_v25 = vld [vmem:[#allocation8 + $0x578] sm:$0xff] }
 0x2d7   : > { %2180 = vmatpush1.msra.mxu1 %v1412_v21  ;;  %1988 = vmatprep.mubr.f32.mxu0 %v7754_v10  ;;  %v9074_v21 = vmax.f32 %v7467_v47, 0.0  ;;  %v1400_v36 = vld [vmem:[#allocation8 + $0x590] sm:$0xff]  ;;  %v9076_v47 = vunpack.i.l.bf16 %v7611_v43  ;;  %v1261_v43 = vld [vmem:[#allocation8 + $0x138] sm:$0xff] }
 0x2d8   : > { %2095 = vmatpush1.msra.mxu0 %v1276_v12  ;;  %2181 = vmatprep.subr.mxu1 %v1409_v27  ;;  %v1401_v12 = vld [vmem:[#allocation8 + $0x598] sm:$0xff]  ;;  %v1160_v27 = vsel %vm600_vm0, %v6132_v5, %v6133_v39  ;;  %v9077_v5 = vmax.f32 %v7464_v17, 0.0  ;;  %v1396_v22 = vld [vmem:[#allocation8 + $0x570] sm:$0xff]  ;;  %v1161_v17 = vsel %vm600_vm0, %v6138_v33, %v1157_v23 }
 0x2d9   : > { %2096 = vmatprep.subr.mxu0 %v1273_v38  ;;  %2182 = vmatpush1.msra.mxu1 %v1408_v14  ;;  %v7790_v19 = vmax.f32 %v9074_v21, %v1165_v34  ;;  %v9075_v38 = vunpack.i.l.bf16 %v7614_v15  ;;  %v1189_v18 = vsel %vm600_vm0, %v1157_v23, %v9076_v47  ;;  %v9078_v15 = vmax.f32 %v7402_v3, 0.0  ;;  %v1260_v63 = vld [vmem:[#allocation8 + $0x130] sm:$0xff]  ;;  %v1393_v3 = vld [vmem:[#allocation8 + $0x558] sm:$0xff] }
 0x2da   : > { %2072 = vmatmul.mubr.f32.gmra.mxu1 %v7772_v46  ;;  %2097 = vmatpush1.msra.mxu0 %v1272_v4  ;;  %v7808_v39 = vmax.f32 %v9077_v5, %v1160_v27  ;;  %v9079_v4 = vmax.f32 %v7490_v11, 0.0  ;;  %v1392_v34 = vld [vmem:[#allocation8 + $0x550] sm:$0xff]  ;;  %v7828_v31 = vmax.f32 %v9080_v9, %v1161_v17  ;;  %v1389_v33 = vld [vmem:[#allocation8 + $0x538] sm:$0xff] }
 0x2db   : > { %2183 = vmatprep.subr.mxu1 %v1405_v30  ;;  %1989 = vmatmul.mubr.f32.gmra.mxu0 %v7780_v49  ;;  %v1169_v14 = vsel %vm600_vm0, %v9075_v38, %v6137_v7  ;;  %v1257_v30 = vld [vmem:[#allocation8 + $0x118] sm:$0xff]  ;;  %v1256_v11 = vld [vmem:[#allocation8 + $0x110] sm:$0xff] }
 0x2dc   : > { %2077 = vmatprep.mubr.f32.mxu1 %v7785_v40  ;;  %2098 = vmatprep.subr.mxu0 %v1269_v52  ;;  %v7812_v7 = vmax.f32 %v9078_v15, %v1169_v14  ;;  %v7817_v59 = vmax.f32 %v9079_v4, %v1189_v18  ;;  %v1253_v52 = vld [vmem:[#allocation8 + $0xf8] sm:$0xff]  ;;  %v1388_v23 = vld [vmem:[#allocation8 + $0x530] sm:$0xff] }
 0x2dd   : > { %2184 = vmatpush1.msra.mxu1 %v1404_v16  ;;  %1994 = vmatprep.mubr.f32.mxu0 %v7790_v19  ;;  %v1252_v44 = vld [vmem:[#allocation8 + $0xf0] sm:$0xff]  ;;  %v1385_v16 = vld [vmem:[#allocation8 + $0x518] sm:$0xff] }
 0x2de   : > { %2099 = vmatpush1.msra.mxu0 %v1268_v32  ;;  %2185 = vmatprep.subr.mxu1 %v1401_v12  ;;  %v1249_v21 = vld [vmem:[#allocation8 + $0xd8] sm:$0xff]  ;;  %v1384_v32 = vld [vmem:[#allocation8 + $0x510] sm:$0xff] }
 0x2df   : > { %2100 = vmatprep.subr.mxu0 %v1265_v55  ;;  %2186 = vmatpush1.msra.mxu1 %v1400_v36  ;;  %v1248_v42 = vld [vmem:[#allocation8 + $0xd0] sm:$0xff]  ;;  %v1245_v12 = vld [vmem:[#allocation8 + $0xb8] sm:$0xff] }
 0x2e0   : > { %2078 = vmatmul.mubr.f32.gmra.mxu1 %v7808_v39  ;;  %2101 = vmatpush1.msra.mxu0 %v1264_v28  ;;  %v1380_v27 = vld [vmem:[#allocation8 + $0x4f0] sm:$0xff]  ;;  %v1377_v36 = vld [vmem:[#allocation8 + $0x4d8] sm:$0xff] }
 0x2e1   : > { %2187 = vmatprep.subr.mxu1 %v1397_v25  ;;  %1995 = vmatmul.mubr.f32.gmra.mxu0 %v7812_v7  ;;  %v1244_v55 = vld [vmem:[#allocation8 + $0xb0] sm:$0xff]  ;;  %v1241_v38 = vld [vmem:[#allocation8 + $0x98] sm:$0xff] }
 0x2e2   : > { %2083 = vmatprep.mubr.f32.mxu1 %v7817_v59  ;;  %2102 = vmatprep.subr.mxu0 %v1261_v43  ;;  %v1376_v14 = vld [vmem:[#allocation8 + $0x4d0] sm:$0xff]  ;;  %v1373_v18 = vld [vmem:[#allocation8 + $0x4b8] sm:$0xff] }
 0x2e3   : > { %2188 = vmatpush1.msra.mxu1 %v1396_v22  ;;  %2103 = vmatpush1.msra.mxu0 %v1260_v63  ;;  %v1240_v47 = vld [vmem:[#allocation8 + $0x90] sm:$0xff]  ;;  %v1369_v25 = vld [vmem:[#allocation8 + $0x498] sm:$0xff] }
 0x2e4   : > { %2154 = vmatprep.mubr.f32.mxu0 %v7510_v20  ;;  %2189 = vmatprep.subr.mxu1 %v1393_v3  ;;  %v1381_v20 = vld [vmem:[#allocation8 + $0x4f8] sm:$0xff]  ;;  %v1372_v28 = vld [vmem:[#allocation8 + $0x4b0] sm:$0xff] }
 0x2e5   : > { %2104 = vmatprep.subr.mxu0 %v1257_v30  ;;  %2190 = vmatpush1.msra.mxu1 %v1392_v34  ;;  %v1236_v5 = vld [vmem:[#allocation8 + $0x70] sm:$0xff]  ;;  %v1233_v15 = vld [vmem:[#allocation8 + $0x58] sm:$0xff] }
 0x2e6   : > { %2084 = vmatmul.mubr.f32.gmra.mxu1 %v7828_v31  ;;  %2105 = vmatpush1.msra.mxu0 %v1256_v11  ;;  %v1368_v43 = vld [vmem:[#allocation8 + $0x490] sm:$0xff]  ;;  %v1365_v22 = vld [vmem:[#allocation8 + $0x478] sm:$0xff] }
 0x2e7   : > { %2191 = vmatprep.subr.mxu1 %v1389_v33  ;;  %2106 = vmatprep.subr.mxu0 %v1253_v52  ;;  %v1232_v4 = vld [vmem:[#allocation8 + $0x50] sm:$0xff]  ;;  %v1229_v63 = vld [vmem:[#allocation8 + $0x38] sm:$0xff] }
 0x2e8   : > { %2192 = vmatpush1.msra.mxu1 %v1388_v23  ;;  %2243 = vmatprep.mubr.f32.mxu1 %v7531_v29  ;;  %v1237_v29 = vld [vmem:[#allocation8 + $0x78] sm:$0xff]  ;;  %v1364_v17 = vld [vmem:[#allocation8 + $0x470] sm:$0xff] }
 0x2e9   : > { %2107 = vmatpush1.msra.mxu0 %v1252_v44  ;;  %2193 = vmatprep.subr.mxu1 %v1385_v16  ;;  %v1228_v3 = vld [vmem:[#allocation8 + $0x30] sm:$0xff]  ;;  %v1361_v30 = vld [vmem:[#allocation8 + $0x458] sm:$0xff] }
 0x2ea   : > { %2108 = vmatprep.subr.mxu0 %v1249_v21  ;;  %2194 = vmatpush1.msra.mxu1 %v1384_v32  ;;  %v1225_v34 = vld [vmem:[#allocation8 + $0x18] sm:$0xff]  ;;  %v1360_v11 = vld [vmem:[#allocation8 + $0x450] sm:$0xff] }
 0x2eb   : > { %2109 = vmatpush1.msra.mxu0 %v1248_v42  ;;  %2195 = vmatprep.subr.mxu1 %v1381_v20  ;;  %v1224_v9 = vld [vmem:[#allocation8 + $0x10] sm:$0xff]  ;;  %v1357_v33 = vld [vmem:[#allocation8 + $0x438] sm:$0xff] }
 0x2ec   : > { %2110 = vmatprep.subr.mxu0 %v1245_v12  ;;  %2196 = vmatpush1.msra.mxu1 %v1380_v27  ;;  %v1349_v52 = vld [vmem:[#allocation8 + $0x3f8] sm:$0xff]  ;;  %v1356_v23 = vld [vmem:[#allocation8 + $0x430] sm:$0xff] }
 0x2ed   : > { %2111 = vmatpush1.msra.mxu0 %v1244_v55  ;;  %2197 = vmatprep.subr.mxu1 %v1377_v36  ;;  %v1348_v44 = vld [vmem:[#allocation8 + $0x3f0] sm:$0xff]  ;;  %v1353_v16 = vld [vmem:[#allocation8 + $0x418] sm:$0xff] }
 0x2ee   : > { %2112 = vmatprep.subr.mxu0 %v1241_v38  ;;  %2198 = vmatpush1.msra.mxu1 %v1376_v14  ;;  %v1345_v21 = vld [vmem:[#allocation8 + $0x3d8] sm:$0xff]  ;;  %v1352_v32 = vld [vmem:[#allocation8 + $0x410] sm:$0xff] }
 0x2ef   : > { %2113 = vmatpush1.msra.mxu0 %v1240_v47  ;;  %2199 = vmatprep.subr.mxu1 %v1373_v18  ;;  %v1344_v42 = vld [vmem:[#allocation8 + $0x3d0] sm:$0xff]  ;;  %v1477_v20 = vld [vmem:[#allocation8 + $0x7f8] sm:$0xff] }
 0x2f0   : > { %2114 = vmatprep.subr.mxu0 %v1237_v29  ;;  %2200 = vmatpush1.msra.mxu1 %v1372_v28  ;;  %v1341_v12 = vld [vmem:[#allocation8 + $0x3b8] sm:$0xff]  ;;  %v1476_v27 = vld [vmem:[#allocation8 + $0x7f0] sm:$0xff] }
 0x2f1   : > { %2115 = vmatpush1.msra.mxu0 %v1236_v5  ;;  %2201 = vmatprep.subr.mxu1 %v1369_v25  ;;  %v1340_v55 = vld [vmem:[#allocation8 + $0x3b0] sm:$0xff]  ;;  %v1473_v36 = vld [vmem:[#allocation8 + $0x7d8] sm:$0xff] }
 0x2f2   : > { %2116 = vmatprep.subr.mxu0 %v1233_v15  ;;  %2202 = vmatpush1.msra.mxu1 %v1368_v43  ;;  %v1337_v38 = vld [vmem:[#allocation8 + $0x398] sm:$0xff]  ;;  %v1472_v14 = vld [vmem:[#allocation8 + $0x7d0] sm:$0xff] }
 0x2f3   : > { %2117 = vmatpush1.msra.mxu0 %v1232_v4  ;;  %2203 = vmatprep.subr.mxu1 %v1365_v22  ;;  %v1336_v47 = vld [vmem:[#allocation8 + $0x390] sm:$0xff]  ;;  %v1469_v18 = vld [vmem:[#allocation8 + $0x7b8] sm:$0xff] }
 0x2f4   : > { %2118 = vmatprep.subr.mxu0 %v1229_v63  ;;  %2204 = vmatpush1.msra.mxu1 %v1364_v17  ;;  %v1333_v29 = vld [vmem:[#allocation8 + $0x378] sm:$0xff]  ;;  %v1468_v28 = vld [vmem:[#allocation8 + $0x7b0] sm:$0xff] }
 0x2f5   : > { %2119 = vmatpush1.msra.mxu0 %v1228_v3  ;;  %2205 = vmatprep.subr.mxu1 %v1361_v30  ;;  %v1332_v5 = vld [vmem:[#allocation8 + $0x370] sm:$0xff]  ;;  %v1465_v25 = vld [vmem:[#allocation8 + $0x798] sm:$0xff] }
 0x2f6   : > { %2120 = vmatprep.subr.mxu0 %v1225_v34  ;;  %2206 = vmatpush1.msra.mxu1 %v1360_v11  ;;  %v1329_v15 = vld [vmem:[#allocation8 + $0x358] sm:$0xff]  ;;  %v1464_v43 = vld [vmem:[#allocation8 + $0x790] sm:$0xff] }
 0x2f7   : > { %2121 = vmatpush1.msra.mxu0 %v1224_v9  ;;  %2207 = vmatprep.subr.mxu1 %v1357_v33  ;;  %v1328_v4 = vld [vmem:[#allocation8 + $0x350] sm:$0xff]  ;;  %v1461_v22 = vld [vmem:[#allocation8 + $0x778] sm:$0xff] }
 0x2f8   : > { %2122 = vmatprep.subr.mxu0 %v1349_v52  ;;  %2208 = vmatpush1.msra.mxu1 %v1356_v23  ;;  %v1325_v63 = vld [vmem:[#allocation8 + $0x338] sm:$0xff]  ;;  %v1460_v17 = vld [vmem:[#allocation8 + $0x770] sm:$0xff] }
 0x2f9   : > { %2123 = vmatpush2.msra.mxu0 %v1348_v44  ;;  %2209 = vmatprep.subr.mxu1 %v1353_v16  ;;  %v1324_v3 = vld [vmem:[#allocation8 + $0x330] sm:$0xff]  ;;  %v1457_v30 = vld [vmem:[#allocation8 + $0x758] sm:$0xff] }
 0x2fa   : > { %2124 = vmatprep.subr.mxu0 %v1345_v21  ;;  %2210 = vmatpush1.msra.mxu1 %v1352_v32  ;;  %v1321_v34 = vld [vmem:[#allocation8 + $0x318] sm:$0xff]  ;;  %v1456_v11 = vld [vmem:[#allocation8 + $0x750] sm:$0xff] }
 0x2fb   : > { %2125 = vmatpush2.msra.mxu0 %v1344_v42  ;;  %2211 = vmatprep.subr.mxu1 %v1477_v20  ;;  %v1320_v9 = vld [vmem:[#allocation8 + $0x310] sm:$0xff]  ;;  %v1453_v33 = vld [vmem:[#allocation8 + $0x738] sm:$0xff] }
 0x2fc   : > { %2126 = vmatprep.subr.mxu0 %v1341_v12  ;;  %2212 = vmatpush2.msra.mxu1 %v1476_v27  ;;  %v1317_v52 = vld [vmem:[#allocation8 + $0x2f8] sm:$0xff]  ;;  %v1452_v23 = vld [vmem:[#allocation8 + $0x730] sm:$0xff] }
 0x2fd   : > { %2127 = vmatpush2.msra.mxu0 %v1340_v55  ;;  %2213 = vmatprep.subr.mxu1 %v1473_v36  ;;  %v1316_v44 = vld [vmem:[#allocation8 + $0x2f0] sm:$0xff]  ;;  %v1449_v16 = vld [vmem:[#allocation8 + $0x718] sm:$0xff] }
 0x2fe   : > { %2128 = vmatprep.subr.mxu0 %v1337_v38  ;;  %2214 = vmatpush2.msra.mxu1 %v1472_v14  ;;  %v1313_v21 = vld [vmem:[#allocation8 + $0x2d8] sm:$0xff]  ;;  %v1448_v32 = vld [vmem:[#allocation8 + $0x710] sm:$0xff] }
 0x2ff   : > { %2129 = vmatpush2.msra.mxu0 %v1336_v47  ;;  %2215 = vmatprep.subr.mxu1 %v1469_v18  ;;  %v1312_v42 = vld [vmem:[#allocation8 + $0x2d0] sm:$0xff]  ;;  %v1445_v20 = vld [vmem:[#allocation8 + $0x6f8] sm:$0xff] }
 0x300   : > { %2130 = vmatprep.subr.mxu0 %v1333_v29  ;;  %2216 = vmatpush2.msra.mxu1 %v1468_v28  ;;  %v1309_v12 = vld [vmem:[#allocation8 + $0x2b8] sm:$0xff]  ;;  %v1444_v27 = vld [vmem:[#allocation8 + $0x6f0] sm:$0xff] }
 0x301   : > { %2131 = vmatpush2.msra.mxu0 %v1332_v5  ;;  %2217 = vmatprep.subr.mxu1 %v1465_v25  ;;  %v1308_v55 = vld [vmem:[#allocation8 + $0x2b0] sm:$0xff]  ;;  %v1441_v36 = vld [vmem:[#allocation8 + $0x6d8] sm:$0xff] }
 0x302   : > { %2132 = vmatprep.subr.mxu0 %v1329_v15  ;;  %2218 = vmatpush2.msra.mxu1 %v1464_v43  ;;  %v1305_v38 = vld [vmem:[#allocation8 + $0x298] sm:$0xff]  ;;  %v1440_v14 = vld [vmem:[#allocation8 + $0x6d0] sm:$0xff] }
 0x303   : > { %2133 = vmatpush2.msra.mxu0 %v1328_v4  ;;  %2219 = vmatprep.subr.mxu1 %v1461_v22  ;;  %v1304_v47 = vld [vmem:[#allocation8 + $0x290] sm:$0xff]  ;;  %v1437_v18 = vld [vmem:[#allocation8 + $0x6b8] sm:$0xff] }
 0x304   : > { %2134 = vmatprep.subr.mxu0 %v1325_v63  ;;  %2220 = vmatpush2.msra.mxu1 %v1460_v17  ;;  %v1301_v29 = vld [vmem:[#allocation8 + $0x278] sm:$0xff]  ;;  %v1436_v28 = vld [vmem:[#allocation8 + $0x6b0] sm:$0xff] }
 0x305   : > { %2135 = vmatpush2.msra.mxu0 %v1324_v3  ;;  %2221 = vmatprep.subr.mxu1 %v1457_v30  ;;  %v1300_v5 = vld [vmem:[#allocation8 + $0x270] sm:$0xff]  ;;  %v1433_v25 = vld [vmem:[#allocation8 + $0x698] sm:$0xff] }
 0x306   : > { %2136 = vmatprep.subr.mxu0 %v1321_v34  ;;  %2222 = vmatpush2.msra.mxu1 %v1456_v11  ;;  %v1297_v15 = vld [vmem:[#allocation8 + $0x258] sm:$0xff]  ;;  %v1432_v43 = vld [vmem:[#allocation8 + $0x690] sm:$0xff] }
 0x307   : > { %2137 = vmatpush2.msra.mxu0 %v1320_v9  ;;  %2223 = vmatprep.subr.mxu1 %v1453_v33  ;;  %v1296_v4 = vld [vmem:[#allocation8 + $0x250] sm:$0xff]  ;;  %v1429_v22 = vld [vmem:[#allocation8 + $0x678] sm:$0xff] }
 0x308   : > { %2138 = vmatprep.subr.mxu0 %v1317_v52  ;;  %2224 = vmatpush2.msra.mxu1 %v1452_v23  ;;  %v1293_v63 = vld [vmem:[#allocation8 + $0x238] sm:$0xff]  ;;  %v1428_v17 = vld [vmem:[#allocation8 + $0x670] sm:$0xff] }
 0x309   : > { %2139 = vmatpush2.msra.mxu0 %v1316_v44  ;;  %2225 = vmatprep.subr.mxu1 %v1449_v16  ;;  %v1292_v3 = vld [vmem:[#allocation8 + $0x230] sm:$0xff]  ;;  %v1425_v30 = vld [vmem:[#allocation8 + $0x658] sm:$0xff] }
 0x30a   : > { %2140 = vmatprep.subr.mxu0 %v1313_v21  ;;  %2226 = vmatpush2.msra.mxu1 %v1448_v32  ;;  %v1289_v34 = vld [vmem:[#allocation8 + $0x218] sm:$0xff]  ;;  %v1424_v11 = vld [vmem:[#allocation8 + $0x650] sm:$0xff] }
 0x30b   : > { %2141 = vmatpush2.msra.mxu0 %v1312_v42  ;;  %2227 = vmatprep.subr.mxu1 %v1445_v20  ;;  %v1288_v9 = vld [vmem:[#allocation8 + $0x210] sm:$0xff]  ;;  %v1421_v33 = vld [vmem:[#allocation8 + $0x638] sm:$0xff] }
 0x30c   : > { %2142 = vmatprep.subr.mxu0 %v1309_v12  ;;  %2228 = vmatpush2.msra.mxu1 %v1444_v27  ;;  %v1420_v52 = vld [vmem:[#allocation8 + $0x630] sm:$0xff]  ;;  %v1541_v23 = vld [vmem:[#allocation8 + $0x9f8] sm:$0xff] }
 0x30d   : > { %2143 = vmatpush2.msra.mxu0 %v1308_v55  ;;  %2229 = vmatprep.subr.mxu1 %v1441_v36  ;;  %v1417_v44 = vld [vmem:[#allocation8 + $0x618] sm:$0xff]  ;;  %v1540_v16 = vld [vmem:[#allocation8 + $0x9f0] sm:$0xff] }
 0x30e   : > { %2144 = vmatprep.subr.mxu0 %v1305_v38  ;;  %2230 = vmatpush2.msra.mxu1 %v1440_v14  ;;  %v1416_v21 = vld [vmem:[#allocation8 + $0x610] sm:$0xff]  ;;  %v1537_v32 = vld [vmem:[#allocation8 + $0x9d8] sm:$0xff] }
 0x30f   : > { %2145 = vmatpush2.msra.mxu0 %v1304_v47  ;;  %2231 = vmatprep.subr.mxu1 %v1437_v18  ;;  %v1536_v42 = vld [vmem:[#allocation8 + $0x9d0] sm:$0xff]  ;;  %v1669_v20 = vld [vmem:[#allocation8 + $0xdf8] sm:$0xff] }
 0x310   : > { %2146 = vmatprep.subr.mxu0 %v1301_v29  ;;  %2232 = vmatpush2.msra.mxu1 %v1436_v28  ;;  %v1533_v12 = vld [vmem:[#allocation8 + $0x9b8] sm:$0xff]  ;;  %v1668_v27 = vld [vmem:[#allocation8 + $0xdf0] sm:$0xff] }
 0x311   : > { %2147 = vmatpush2.msra.mxu0 %v1300_v5  ;;  %2233 = vmatprep.subr.mxu1 %v1433_v25  ;;  %v1665_v55 = vld [vmem:[#allocation8 + $0xdd8] sm:$0xff]  ;;  %v1664_v36 = vld [vmem:[#allocation8 + $0xdd0] sm:$0xff] }
 0x312   : > { %2148 = vmatprep.subr.mxu0 %v1297_v15  ;;  %2234 = vmatpush2.msra.mxu1 %v1432_v43  ;;  %v1528_v38 = vld [vmem:[#allocation8 + $0x990] sm:$0xff]  ;;  %v1661_v14 = vld [vmem:[#allocation8 + $0xdb8] sm:$0xff] }
 0x313   : > { %2149 = vmatpush2.msra.mxu0 %v1296_v4  ;;  %2235 = vmatprep.subr.mxu1 %v1429_v22  ;;  %v1657_v47 = vld [vmem:[#allocation8 + $0xd98] sm:$0xff]  ;;  %v1656_v18 = vld [vmem:[#allocation8 + $0xd90] sm:$0xff] }
 0x314   : > { %2150 = vmatprep.subr.mxu0 %v1293_v63  ;;  %2236 = vmatpush2.msra.mxu1 %v1428_v17  ;;  %v1520_v29 = vld [vmem:[#allocation8 + $0x950] sm:$0xff]  ;;  %v1653_v28 = vld [vmem:[#allocation8 + $0xd78] sm:$0xff] }
 0x315   : > { %2151 = vmatpush2.msra.mxu0 %v1292_v3  ;;  %2237 = vmatprep.subr.mxu1 %v1425_v30  ;;  %v1516_v5 = vld [vmem:[#allocation8 + $0x930] sm:$0xff]  ;;  %v1645_v43 = vld [vmem:[#allocation8 + $0xd38] sm:$0xff] }
 0x316   : > { %2152 = vmatprep.subr.mxu0 %v1289_v34  ;;  %2238 = vmatpush2.msra.mxu1 %v1424_v11  ;;  %v1648_v25 = vld [vmem:[#allocation8 + $0xd50] sm:$0xff]  ;;  %v1641_v22 = vld [vmem:[#allocation8 + $0xd18] sm:$0xff] }
 0x317   : > { %2153 = vmatpush2.msra.mxu0 %v1288_v9  ;;  %2239 = vmatprep.subr.mxu1 %v1421_v33  ;;  %v1512_v15 = vld [vmem:[#allocation8 + $0x910] sm:$0xff]  ;;  %v1501_v3 = vld [vmem:[#allocation8 + $0x8b8] sm:$0xff] }
 0x318   : > { %2155 = vmatmul.mubr.f32.vlgmr.msra.gmra.mxu0 %v7520_v2  ;;  %2240 = vmatpush2.msra.mxu1 %v1420_v52  ;;  %v1532_v2 = vld [vmem:[#allocation8 + $0x9b0] sm:$0xff]  ;;  %v1497_v11 = vld [vmem:[#allocation8 + $0x898] sm:$0xff] }
 0x319   : > { %2268 = vmatprep.subr.mxu0 %v1541_v23  ;;  %2160 = vmatprep.mubr.f32.mxu0 %v7544_v0  ;;  %v1529_v0 = vld [vmem:[#allocation8 + $0x998] sm:$0xff]  ;;  %v1644_v4 = vld [vmem:[#allocation8 + $0xd30] sm:$0xff] }
 0x31a   : > { %2241 = vmatprep.subr.mxu1 %v1417_v44  ;;  %2269 = vmatpush1.msra.mxu0 %v1540_v16  ;;  %v1640_v63 = vld [vmem:[#allocation8 + $0xd10] sm:$0xff]  ;;  %v1629_v52 = vld [vmem:[#allocation8 + $0xcb8] sm:$0xff] }
 0x31b   : > { %2242 = vmatpush2.msra.mxu1 %v1416_v21  ;;  %2270 = vmatprep.subr.mxu0 %v1537_v32  ;;  %v1504_v17 = vld [vmem:[#allocation8 + $0x8d0] sm:$0xff]  ;;  %v1625_v16 = vld [vmem:[#allocation8 + $0xc98] sm:$0xff] }
 0x31c   : > { %2244 = vmatmul.mubr.f32.vlgmr.msra.gmra.mxu1 %v7535_v61  ;;  %2271 = vmatpush1.msra.mxu0 %v1536_v42  ;;  %v1525_v61 = vld [vmem:[#allocation8 + $0x978] sm:$0xff]  ;;  %v1636_v30 = vld [vmem:[#allocation8 + $0xcf0] sm:$0xff] }
 0x31d   : > { %2357 = vmatprep.subr.mxu1 %v1669_v20  ;;  %2161 = vmatmul.mubr.f32.gmra.mxu0 %v7561_v54  ;;  %v1660_v54 = vld [vmem:[#allocation8 + $0xdb0] sm:$0xff]  ;;  %v1489_v21 = vld [vmem:[#allocation8 + $0x858] sm:$0xff] }
 0x31e   : > { %2249 = vmatprep.mubr.f32.mxu1 %v7572_v62  ;;  %2272 = vmatprep.subr.mxu0 %v1533_v12  ;;  %v1524_v62 = vld [vmem:[#allocation8 + $0x970] sm:$0xff]  ;;  %v1621_v20 = vld [vmem:[#allocation8 + $0xc78] sm:$0xff] }
 0x31f   : > { %2358 = vmatpush1.msra.mxu1 %v1668_v27  ;;  %2166 = vmatprep.mubr.f32.mxu0 %v7597_v48  ;;  %v1521_v48 = vld [vmem:[#allocation8 + $0x958] sm:$0xff]  ;;  %v1500_v34 = vld [vmem:[#allocation8 + $0x8b0] sm:$0xff] }
 0x320   : > { %2273 = vmatpush1.msra.mxu0 %v1532_v2  ;;  %2359 = vmatprep.subr.mxu1 %v1665_v55  ;;  %v1632_v9 = vld [vmem:[#allocation8 + $0xcd0] sm:$0xff]  ;;  %v1485_v12 = vld [vmem:[#allocation8 + $0x838] sm:$0xff] }
 0x321   : > { %2274 = vmatprep.subr.mxu0 %v1529_v0  ;;  %2360 = vmatpush1.msra.mxu1 %v1664_v36  ;;  %v1496_v33 = vld [vmem:[#allocation8 + $0x890] sm:$0xff]  ;;  %v1617_v55 = vld [vmem:[#allocation8 + $0xc58] sm:$0xff] }
 0x322   : > { %2250 = vmatmul.mubr.f32.gmra.mxu1 %v7593_v6  ;;  %2275 = vmatpush1.msra.mxu0 %v1528_v38  ;;  %v1517_v6 = vld [vmem:[#allocation8 + $0x938] sm:$0xff]  ;;  %v1628_v23 = vld [vmem:[#allocation8 + $0xcb0] sm:$0xff] }
 0x323   : > { %2361 = vmatprep.subr.mxu1 %v1661_v14  ;;  %2167 = vmatmul.mubr.f32.gmra.mxu0 %v7602_v1  ;;  %v1652_v1 = vld [vmem:[#allocation8 + $0xd70] sm:$0xff]  ;;  %v1481_v0 = vld [vmem:[#allocation8 + $0x818] sm:$0xff] }
 0x324   : > { %2255 = vmatprep.mubr.f32.mxu1 %v7618_v24  ;;  %2276 = vmatprep.subr.mxu0 %v1525_v61  ;;  %v1649_v24 = vld [vmem:[#allocation8 + $0xd58] sm:$0xff]  ;;  %v1492_v44 = vld [vmem:[#allocation8 + $0x870] sm:$0xff] }
 0x325   : > { %2362 = vmatpush1.msra.mxu1 %v1660_v54  ;;  %2172 = vmatprep.mubr.f32.mxu0 %v7636_v53  ;;  %v1513_v53 = vld [vmem:[#allocation8 + $0x918] sm:$0xff]  ;;  %v1624_v32 = vld [vmem:[#allocation8 + $0xc90] sm:$0xff] }
 0x326   : > { %2277 = vmatpush1.msra.mxu0 %v1524_v62  ;;  %2363 = vmatprep.subr.mxu1 %v1657_v47  ;;  %v1488_v42 = vld [vmem:[#allocation8 + $0x850] sm:$0xff]  ;;  %v1613_v14 = vld [vmem:[#allocation8 + $0xc38] sm:$0xff] }
 0x327   : > { %2278 = vmatprep.subr.mxu0 %v1521_v48  ;;  %2364 = vmatpush1.msra.mxu1 %v1656_v18  ;;  %v1620_v27 = vld [vmem:[#allocation8 + $0xc70] sm:$0xff]  ;;  %v1605_v61 = vld [vmem:[#allocation8 + $0xbf8] sm:$0xff] }
 0x328   : > { %2256 = vmatmul.mubr.f32.gmra.mxu1 %v7626_v37  ;;  %2279 = vmatpush1.msra.mxu0 %v1520_v29  ;;  %v1509_v37 = vld [vmem:[#allocation8 + $0x8f8] sm:$0xff]  ;;  %v1484_v2 = vld [vmem:[#allocation8 + $0x830] sm:$0xff] }
 0x329   : > { %2365 = vmatprep.subr.mxu1 %v1653_v28  ;;  %2173 = vmatmul.mubr.f32.gmra.mxu0 %v7642_v8  ;;  %v1508_v8 = vld [vmem:[#allocation8 + $0x8f0] sm:$0xff]  ;;  %v1609_v47 = vld [vmem:[#allocation8 + $0xc18] sm:$0xff] }
 0x32a   : > { %2261 = vmatprep.mubr.f32.mxu1 %v7651_v56  ;;  %2280 = vmatprep.subr.mxu0 %v1517_v6  ;;  %v1505_v56 = vld [vmem:[#allocation8 + $0x8d8] sm:$0xff]  ;;  %v1616_v36 = vld [vmem:[#allocation8 + $0xc50] sm:$0xff] }
 0x32b   : > { %2366 = vmatpush1.msra.mxu1 %v1652_v1  ;;  %2281 = vmatpush1.msra.mxu0 %v1516_v5  ;;  %v1480_v38 = vld [vmem:[#allocation8 + $0x810] sm:$0xff]  ;;  %v1601_v48 = vld [vmem:[#allocation8 + $0xbd8] sm:$0xff] }
 0x32c   : > { %2332 = vmatprep.mubr.f32.mxu0 %v7679_v60  ;;  %2367 = vmatprep.subr.mxu1 %v1649_v24  ;;  %v1637_v60 = vld [vmem:[#allocation8 + $0xcf8] sm:$0xff]  ;;  %v1612_v54 = vld [vmem:[#allocation8 + $0xc30] sm:$0xff] }
 0x32d   : > { %2282 = vmatprep.subr.mxu0 %v1513_v53  ;;  %2368 = vmatpush1.msra.mxu1 %v1648_v25  ;;  %v1604_v62 = vld [vmem:[#allocation8 + $0xbf0] sm:$0xff]  ;;  %v1733_v28 = vld [vmem:[#allocation8 + $0xff8] sm:$0xff] }
 0x32e   : > { %2262 = vmatmul.mubr.f32.gmra.mxu1 %v7658_v57  ;;  %2283 = vmatpush1.msra.mxu0 %v1512_v15  ;;  %v1633_v57 = vld [vmem:[#allocation8 + $0xcd8] sm:$0xff]  ;;  %v1608_v18 = vld [vmem:[#allocation8 + $0xc10] sm:$0xff] }
 0x32f   : > { %2369 = vmatprep.subr.mxu1 %v1645_v43  ;;  %2284 = vmatprep.subr.mxu0 %v1509_v37  ;;  %v1600_v29 = vld [vmem:[#allocation8 + $0xbd0] sm:$0xff]  ;;  %v1597_v6 = vld [vmem:[#allocation8 + $0xbb8] sm:$0xff] }
 0x330   : > { %2370 = vmatpush1.msra.mxu1 %v1644_v4  ;;  %2421 = vmatprep.mubr.f32.mxu1 %v7683_v58  ;;  %v1493_v58 = vld [vmem:[#allocation8 + $0x878] sm:$0xff]  ;;  %v1732_v1 = vld [vmem:[#allocation8 + $0xff0] sm:$0xff] }
 0x331   : > { %2285 = vmatpush1.msra.mxu0 %v1508_v8  ;;  %2371 = vmatprep.subr.mxu1 %v1641_v22  ;;  %v1596_v5 = vld [vmem:[#allocation8 + $0xbb0] sm:$0xff]  ;;  %v1729_v24 = vld [vmem:[#allocation8 + $0xfd8] sm:$0xff] }
 0x332   : > { %2286 = vmatprep.subr.mxu0 %v1505_v56  ;;  %2372 = vmatpush1.msra.mxu1 %v1640_v63  ;;  %v1593_v53 = vld [vmem:[#allocation8 + $0xb98] sm:$0xff]  ;;  %v1728_v25 = vld [vmem:[#allocation8 + $0xfd0] sm:$0xff] }
 0x333   : > { %2287 = vmatpush1.msra.mxu0 %v1504_v17  ;;  %2373 = vmatprep.subr.mxu1 %v1637_v60  ;;  %v1592_v15 = vld [vmem:[#allocation8 + $0xb90] sm:$0xff]  ;;  %v1725_v43 = vld [vmem:[#allocation8 + $0xfb8] sm:$0xff] }
 0x334   : > { %2288 = vmatprep.subr.mxu0 %v1501_v3  ;;  %2374 = vmatpush1.msra.mxu1 %v1636_v30  ;;  %v1589_v37 = vld [vmem:[#allocation8 + $0xb78] sm:$0xff]  ;;  %v1724_v4 = vld [vmem:[#allocation8 + $0xfb0] sm:$0xff] }
 0x335   : > { %2289 = vmatpush1.msra.mxu0 %v1500_v34  ;;  %2375 = vmatprep.subr.mxu1 %v1633_v57  ;;  %v1588_v8 = vld [vmem:[#allocation8 + $0xb70] sm:$0xff]  ;;  %v1721_v22 = vld [vmem:[#allocation8 + $0xf98] sm:$0xff] }
 0x336   : > { %2290 = vmatprep.subr.mxu0 %v1497_v11  ;;  %2376 = vmatpush1.msra.mxu1 %v1632_v9  ;;  %v1585_v56 = vld [vmem:[#allocation8 + $0xb58] sm:$0xff]  ;;  %v1720_v63 = vld [vmem:[#allocation8 + $0xf90] sm:$0xff] }
 0x337   : > { %2291 = vmatpush1.msra.mxu0 %v1496_v33  ;;  %2377 = vmatprep.subr.mxu1 %v1629_v52  ;;  %v1584_v17 = vld [vmem:[#allocation8 + $0xb50] sm:$0xff]  ;;  %v1717_v60 = vld [vmem:[#allocation8 + $0xf78] sm:$0xff] }
 0x338   : > { %2292 = vmatprep.subr.mxu0 %v1493_v58  ;;  %2378 = vmatpush1.msra.mxu1 %v1628_v23  ;;  %v1581_v3 = vld [vmem:[#allocation8 + $0xb38] sm:$0xff]  ;;  %v1716_v30 = vld [vmem:[#allocation8 + $0xf70] sm:$0xff] }
 0x339   : > { %2293 = vmatpush1.msra.mxu0 %v1492_v44  ;;  %2379 = vmatprep.subr.mxu1 %v1625_v16  ;;  %v1580_v34 = vld [vmem:[#allocation8 + $0xb30] sm:$0xff]  ;;  %v1713_v57 = vld [vmem:[#allocation8 + $0xf58] sm:$0xff] }
 0x33a   : > { %2294 = vmatprep.subr.mxu0 %v1489_v21  ;;  %2380 = vmatpush1.msra.mxu1 %v1624_v32  ;;  %v1577_v11 = vld [vmem:[#allocation8 + $0xb18] sm:$0xff]  ;;  %v1712_v9 = vld [vmem:[#allocation8 + $0xf50] sm:$0xff] }
 0x33b   : > { %2295 = vmatpush1.msra.mxu0 %v1488_v42  ;;  %2381 = vmatprep.subr.mxu1 %v1621_v20  ;;  %v1576_v33 = vld [vmem:[#allocation8 + $0xb10] sm:$0xff]  ;;  %v1709_v52 = vld [vmem:[#allocation8 + $0xf38] sm:$0xff] }
 0x33c   : > { %2296 = vmatprep.subr.mxu0 %v1485_v12  ;;  %2382 = vmatpush1.msra.mxu1 %v1620_v27  ;;  %v1573_v58 = vld [vmem:[#allocation8 + $0xaf8] sm:$0xff]  ;;  %v1708_v23 = vld [vmem:[#allocation8 + $0xf30] sm:$0xff] }
 0x33d   : > { %2297 = vmatpush1.msra.mxu0 %v1484_v2  ;;  %2383 = vmatprep.subr.mxu1 %v1617_v55  ;;  %v1572_v44 = vld [vmem:[#allocation8 + $0xaf0] sm:$0xff]  ;;  %v1705_v16 = vld [vmem:[#allocation8 + $0xf18] sm:$0xff] }
 0x33e   : > { %2298 = vmatprep.subr.mxu0 %v1481_v0  ;;  %2384 = vmatpush1.msra.mxu1 %v1616_v36  ;;  %v1569_v21 = vld [vmem:[#allocation8 + $0xad8] sm:$0xff]  ;;  %v1704_v32 = vld [vmem:[#allocation8 + $0xf10] sm:$0xff] }
 0x33f   : > { %2299 = vmatpush1.msra.mxu0 %v1480_v38  ;;  %2385 = vmatprep.subr.mxu1 %v1613_v14  ;;  %v1568_v42 = vld [vmem:[#allocation8 + $0xad0] sm:$0xff]  ;;  %v1701_v20 = vld [vmem:[#allocation8 + $0xef8] sm:$0xff] }
 0x340   : > { %2300 = vmatprep.subr.mxu0 %v1605_v61  ;;  %2386 = vmatpush1.msra.mxu1 %v1612_v54  ;;  %v1565_v12 = vld [vmem:[#allocation8 + $0xab8] sm:$0xff]  ;;  %v1700_v27 = vld [vmem:[#allocation8 + $0xef0] sm:$0xff] }
 0x341   : > { %2301 = vmatpush2.msra.mxu0 %v1604_v62  ;;  %2387 = vmatprep.subr.mxu1 %v1609_v47  ;;  %v1564_v2 = vld [vmem:[#allocation8 + $0xab0] sm:$0xff]  ;;  %v1697_v55 = vld [vmem:[#allocation8 + $0xed8] sm:$0xff] }
 0x342   : > { %2302 = vmatprep.subr.mxu0 %v1601_v48  ;;  %2388 = vmatpush1.msra.mxu1 %v1608_v18  ;;  %v1561_v0 = vld [vmem:[#allocation8 + $0xa98] sm:$0xff]  ;;  %v1696_v36 = vld [vmem:[#allocation8 + $0xed0] sm:$0xff] }
 0x343   : > { %2303 = vmatpush2.msra.mxu0 %v1600_v29  ;;  %2389 = vmatprep.subr.mxu1 %v1733_v28  ;;  %v1560_v38 = vld [vmem:[#allocation8 + $0xa90] sm:$0xff]  ;;  %v1693_v14 = vld [vmem:[#allocation8 + $0xeb8] sm:$0xff] }
 0x344   : > { %2304 = vmatprep.subr.mxu0 %v1597_v6  ;;  %2390 = vmatpush2.msra.mxu1 %v1732_v1  ;;  %v1557_v61 = vld [vmem:[#allocation8 + $0xa78] sm:$0xff]  ;;  %v1692_v54 = vld [vmem:[#allocation8 + $0xeb0] sm:$0xff] }
 0x345   : > { %2305 = vmatpush2.msra.mxu0 %v1596_v5  ;;  %2391 = vmatprep.subr.mxu1 %v1729_v24  ;;  %v1556_v62 = vld [vmem:[#allocation8 + $0xa70] sm:$0xff]  ;;  %v1689_v47 = vld [vmem:[#allocation8 + $0xe98] sm:$0xff] }
 0x346   : > { %2306 = vmatprep.subr.mxu0 %v1593_v53  ;;  %2392 = vmatpush2.msra.mxu1 %v1728_v25  ;;  %v1553_v48 = vld [vmem:[#allocation8 + $0xa58] sm:$0xff]  ;;  %v1688_v18 = vld [vmem:[#allocation8 + $0xe90] sm:$0xff] }
 0x347   : > { %2307 = vmatpush2.msra.mxu0 %v1592_v15  ;;  %2393 = vmatprep.subr.mxu1 %v1725_v43  ;;  %v1552_v29 = vld [vmem:[#allocation8 + $0xa50] sm:$0xff]  ;;  %v1685_v28 = vld [vmem:[#allocation8 + $0xe78] sm:$0xff] }
 0x348   : > { %2308 = vmatprep.subr.mxu0 %v1589_v37  ;;  %2394 = vmatpush2.msra.mxu1 %v1724_v4  ;;  %v1549_v6 = vld [vmem:[#allocation8 + $0xa38] sm:$0xff]  ;;  %v1684_v1 = vld [vmem:[#allocation8 + $0xe70] sm:$0xff] }
 0x349   : > { %2309 = vmatpush2.msra.mxu0 %v1588_v8  ;;  %2395 = vmatprep.subr.mxu1 %v1721_v22  ;;  %v1548_v5 = vld [vmem:[#allocation8 + $0xa30] sm:$0xff]  ;;  %v1681_v24 = vld [vmem:[#allocation8 + $0xe58] sm:$0xff] }
 0x34a   : > { %2310 = vmatprep.subr.mxu0 %v1585_v56  ;;  %2396 = vmatpush2.msra.mxu1 %v1720_v63  ;;  %v1545_v53 = vld [vmem:[#allocation8 + $0xa18] sm:$0xff]  ;;  %v1680_v25 = vld [vmem:[#allocation8 + $0xe50] sm:$0xff] }
 0x34b   : > { %2311 = vmatpush2.msra.mxu0 %v1584_v17  ;;  %2397 = vmatprep.subr.mxu1 %v1717_v60  ;;  %v1544_v15 = vld [vmem:[#allocation8 + $0xa10] sm:$0xff]  ;;  %v1677_v43 = vld [vmem:[#allocation8 + $0xe38] sm:$0xff] }
 0x34c   : > { %2312 = vmatprep.subr.mxu0 %v1581_v3  ;;  %2398 = vmatpush2.msra.mxu1 %v1716_v30  ;;  %v1676_v37 = vld [vmem:[#allocation8 + $0xe30] sm:$0xff]  ;;  %v1673_v4 = vld [vmem:[#allocation8 + $0xe18] sm:$0xff] }
 0x34d   : > { %2313 = vmatpush2.msra.mxu0 %v1580_v34  ;;  %2399 = vmatprep.subr.mxu1 %v1713_v57  ;;  %v1672_v8 = vld [vmem:[#allocation8 + $0xe10] sm:$0xff] }
 0x34e   : > { %2314 = vmatprep.subr.mxu0 %v1577_v11  ;;  %2400 = vmatpush2.msra.mxu1 %v1712_v9 }
 0x34f   : > { %2315 = vmatpush2.msra.mxu0 %v1576_v33  ;;  %2401 = vmatprep.subr.mxu1 %v1709_v52 }
 0x350   : > { %2316 = vmatprep.subr.mxu0 %v1573_v58  ;;  %2402 = vmatpush2.msra.mxu1 %v1708_v23 }
 0x351   : > { %2317 = vmatpush2.msra.mxu0 %v1572_v44  ;;  %2403 = vmatprep.subr.mxu1 %v1705_v16 }
 0x352   : > { %2318 = vmatprep.subr.mxu0 %v1569_v21  ;;  %2404 = vmatpush2.msra.mxu1 %v1704_v32 }
 0x353   : > { %2319 = vmatpush2.msra.mxu0 %v1568_v42  ;;  %2405 = vmatprep.subr.mxu1 %v1701_v20 }
 0x354   : > { %2320 = vmatprep.subr.mxu0 %v1565_v12  ;;  %2406 = vmatpush2.msra.mxu1 %v1700_v27 }
 0x355   : > { %2321 = vmatpush2.msra.mxu0 %v1564_v2  ;;  %2407 = vmatprep.subr.mxu1 %v1697_v55 }
 0x356   : > { %2322 = vmatprep.subr.mxu0 %v1561_v0  ;;  %2408 = vmatpush2.msra.mxu1 %v1696_v36 }
 0x357   : > { %2323 = vmatpush2.msra.mxu0 %v1560_v38  ;;  %2409 = vmatprep.subr.mxu1 %v1693_v14 }
 0x358   : > { %2324 = vmatprep.subr.mxu0 %v1557_v61  ;;  %2410 = vmatpush2.msra.mxu1 %v1692_v54 }
 0x359   : > { %2325 = vmatpush2.msra.mxu0 %v1556_v62  ;;  %2411 = vmatprep.subr.mxu1 %v1689_v47 }
 0x35a   : > { %2326 = vmatprep.subr.mxu0 %v1553_v48  ;;  %2412 = vmatpush2.msra.mxu1 %v1688_v18 }
 0x35b   : > { %2327 = vmatpush2.msra.mxu0 %v1552_v29  ;;  %2413 = vmatprep.subr.mxu1 %v1685_v28 }
 0x35c   : > { %2328 = vmatprep.subr.mxu0 %v1549_v6  ;;  %2414 = vmatpush2.msra.mxu1 %v1684_v1 }
 0x35d   : > { %2329 = vmatpush2.msra.mxu0 %v1548_v5  ;;  %2415 = vmatprep.subr.mxu1 %v1681_v24 }
 0x35e   : > { %2330 = vmatprep.subr.mxu0 %v1545_v53  ;;  %2416 = vmatpush2.msra.mxu1 %v1680_v25 }
 0x35f   : > { %2331 = vmatpush2.msra.mxu0 %v1544_v15  ;;  %2417 = vmatprep.subr.mxu1 %v1677_v43 }
 0x360   : > { %2333 = vmatmul.mubr.f32.vlgmr.msra.gmra.mxu0 %v7707_v45  ;;  %2418 = vmatpush2.msra.mxu1 %v1676_v37  ;;  %v9081_v45 = vmov 0.0  }
 0x361   : > { %2338 = vmatprep.mubr.f32.mxu0 %v7716_v26  ;;  %2419 = vmatprep.subr.mxu1 %v1673_v4  ;;  %v1800_v26 = vpop.f32.mrf.mxu0 }
 0x362   : > { %2420 = vmatpush2.msra.mxu1 %v1672_v8 }
 0x363   : > { %2422 = vmatmul.mubr.f32.vlgmr.msra.gmra.mxu1 %v7733_v50  ;;  %v1802_v50 = vpop.f32.mrf.mxu0 }
 0x364   : > { %2339 = vmatmul.mubr.f32.gmra.mxu0 %v7742_v13  ;;  %2427 = vmatprep.mubr.f32.mxu1 %v7749_v51  ;;  %v1889_v13 = vpop.f32.mrf.mxu1 }
 0x365   : > { %2344 = vmatprep.mubr.f32.mxu0 %v7754_v10  ;;  %v1806_v51 = vpop.f32.mrf.mxu0  ;;  %v1890_v17 = vadd.f32 %v1889_v13, %v1800_v26 }
 0x366   : > { %v1891_v10 = vpop.f32.mrf.mxu1 }
 0x367   : > { %2428 = vmatmul.mubr.f32.gmra.mxu1 %v7772_v46  ;;  %v1808_v46 = vpop.f32.mrf.mxu0 }
 0x368   : > { %2345 = vmatmul.mubr.f32.gmra.mxu0 %v7780_v49  ;;  %2433 = vmatprep.mubr.f32.mxu1 %v7785_v40  ;;  %v1895_v49 = vpop.f32.mrf.mxu1 }
 0x369   : > { %2350 = vmatprep.mubr.f32.mxu0 %v7790_v19  ;;  %v1812_v40 = vpop.f32.mrf.mxu0  ;;  %v1896_v9 = vadd.f32 %v1895_v49, %v1806_v51 }
 0x36a   : > { %v1897_v19 = vpop.f32.mrf.mxu1 }
 0x36b   : > { %2434 = vmatmul.mubr.f32.gmra.mxu1 %v7808_v39  ;;  %v1814_v39 = vpop.f32.mrf.mxu0  ;;  %v1898_v23 = vadd.f32 %v1897_v19, %v1808_v46 }
 0x36c   : > { %2351 = vmatmul.mubr.f32.gmra.mxu0 %v7812_v7  ;;  %2439 = vmatprep.mubr.f32.mxu1 %v7817_v59  ;;  %v1901_v22 = vpop.f32.mrf.mxu1 }
 0x36d   : > { %2692 = vmatprep.mubr.f32.mxu0 %v9081_v45  ;;  %v1818_v7 = vpop.f32.mrf.mxu0  ;;  %v1902_v20 = vadd.f32 %v1901_v22, %v1812_v40 }
 0x36e   : > { %v1903_v56 = vpop.f32.mrf.mxu1 }
 0x36f   : > { %2440 = vmatmul.mubr.f32.gmra.mxu1 %v7828_v31  ;;  %v1820_v59 = vpop.f32.mrf.mxu0  ;;  %v1892_v31 = vadd.f32 %v1891_v10, %v1802_v50  ;;  %v1904_v55 = vadd.f32 %v1903_v56, %v1814_v39 }
 0x370   : > { %2781 = vmatprep.mubr.f32.mxu1 %v9081_v45  ;;  %v1907_v63 = vpop.f32.mrf.mxu1 }
 0x371   : > { %v1908_v48 = vadd.f32 %v1907_v63, %v1818_v7 }
 0x372   : > { %v1909_v30 = vpop.f32.mrf.mxu1 }
 0x373   : > { %v1910_v28 = vadd.f32 %v1909_v30, %v1820_v59 }
 0x390   : > { %v1978_v60 = vpop.f32.mrf.mxu0 }
 0x391   : > { %v1979_v3 = vadd.f32 %v1978_v60, %v1890_v17 }
 0x392   : > { %v1980_v34 = vpop.f32.mrf.mxu0 }
 0x393   : > { %v1981_v57 = vadd.f32 %v1980_v34, %v1892_v31 }
 0x394   : > { %v2067_v11 = vpop.f32.mrf.mxu1 }
 0x395   : > { %v7864_v33 = vadd.f32 %v2067_v11, %v1979_v3  ;;  %v1984_v52 = vpop.f32.mrf.mxu0 }
 0x396   : > { %v2069_v58 = vpop.f32.mrf.mxu1  ;;  %v1985_v44 = vadd.f32 %v1984_v52, %v1896_v9 }
 0x397   : > { %v7866_v16 = vadd.f32 %v2069_v58, %v1981_v57  ;;  %v1986_v21 = vpop.f32.mrf.mxu0  ;;  %2522 = vrot.lane.b32.xlu1 %v7864_v33, %s6459_s8 }
 0x398   : > { %v1987_v32 = vadd.f32 %v1986_v21, %v1898_v23 }
 0x399   : > { %2530 = vrot.lane.b32.xlu0 %v7866_v16, %s6459_s8 }
 0x39a   : > { %v2073_v42 = vpop.f32.mrf.mxu1 }
 0x39b   : > { %v7872_v12 = vadd.f32 %v2073_v42, %v1985_v44  ;;  %v1990_v27 = vpop.f32.mrf.mxu0 }
 0x39c   : > { %v2075_v2 = vpop.f32.mrf.mxu1  ;;  %v1991_v0 = vadd.f32 %v1990_v27, %v1902_v20 }
 0x39d   : > { %v7874_v36 = vadd.f32 %v2075_v2, %v1987_v32  ;;  %v1992_v38 = vpop.f32.mrf.mxu0  ;;  %2524 = vrot.lane.b32.xlu1 %v7872_v12, %s6459_s8 }
 0x39e   : > { %v1993_v14 = vadd.f32 %v1992_v38, %v1904_v55 }
 0x39f   : > { %2532 = vrot.lane.b32.xlu0 %v7874_v36, %s6459_s8 }
 0x3a0   : > { %v2079_v61 = vpop.f32.mrf.mxu1 }
 0x3a1   : > { %v7880_v54 = vadd.f32 %v2079_v61, %v1991_v0  ;;  %v1996_v62 = vpop.f32.mrf.mxu0 }
 0x3a2   : > { %v2081_v47 = vpop.f32.mrf.mxu1  ;;  %v1997_v6 = vadd.f32 %v1996_v62, %v1908_v48 }
 0x3a3   : > { %v7882_v18 = vadd.f32 %v2081_v47, %v1993_v14  ;;  %2526 = vrot.lane.b32.xlu1 %v7880_v54, %s6459_s8  ;;  %v1998_v29 = vpop.f32.mrf.mxu0 }
 0x3a4   : > { %v1999_v5 = vadd.f32 %v1998_v29, %v1910_v28 }
 0x3a5   : > { %2534 = vrot.lane.b32.xlu0 %v7882_v18, %s6459_s8 }
 0x3a6   : > { %v2085_v1 = vpop.f32.mrf.mxu1 }
 0x3a7   : > { %2458 = vrot.lane.b32.xlu1 %v7880_v54, %s6460_s10  ;;  %v7890_v53 = vadd.f32 %v2085_v1, %v1997_v6 }
 0x3a8   : > { %v2087_v24 = vpop.f32.mrf.mxu1 }
 0x3a9   : > { %2466 = vrot.lane.b32.xlu0 %v7882_v18, %s6460_s10  ;;  %v7894_v25 = vadd.f32 %v2087_v24, %v1999_v5 }
 0x3ab   : > { %2528 = vrot.lane.b32.xlu1 %v7890_v53, %s6459_s8 }
 0x3ad   : > { %2536 = vrot.lane.b32.xlu0 %v7894_v25, %s6459_s8 }
 0x3af   : > { %2460 = vrot.lane.b32.xlu1 %v7890_v53, %s6460_s10 }
 0x3b1   : > { %2468 = vrot.lane.b32.xlu0 %v7894_v25, %s6460_s10 }
 0x3d8   : > { %v2156_v15 = vpop.f32.mrf.mxu0 }
 0x3da   : > { %v2158_v37 = vpop.f32.mrf.mxu0 }
 0x3dc   : > { %v2245_v43 = vpop.f32.mrf.mxu1 }
 0x3dd   : > { %v2162_v8 = vpop.f32.mrf.mxu0  ;;  %v2246_v22 = vadd.f32 %v2245_v43, %v2156_v15 }
 0x3de   : > { %v2247_v4 = vpop.f32.mrf.mxu1 }
 0x3df   : > { %v2164_v50 = vpop.f32.mrf.mxu0  ;;  %v2248_v56 = vadd.f32 %v2247_v4, %v2158_v37  ;;  %v5132_v4 = vld [vmem:[%s8972_s2 + $0x20] sm:$0xff] }
 0x3e2   : > { %v2251_v26 = vpop.f32.mrf.mxu1 }
 0x3e3   : > { %v2168_v51 = vpop.f32.mrf.mxu0  ;;  %v2252_v60 = vadd.f32 %v2251_v26, %v2162_v8  ;;  %v5133_v8 = vld [vmem:[%s8972_s2 + $0x28] sm:$0xff]  ;;  %v5134_v26 = vld [vmem:[%s8972_s2 + $0x30] sm:$0xff] }
 0x3e4   : > { %v2253_v13 = vpop.f32.mrf.mxu1 }
 0x3e5   : > { %v2170_v46 = vpop.f32.mrf.mxu0  ;;  %v2254_v57 = vadd.f32 %v2253_v13, %v2164_v50  ;;  %v5135_v50 = vld [vmem:[%s8972_s2 + $0x38] sm:$0xff] }
 0x3e8   : > { %v2257_v10 = vpop.f32.mrf.mxu1 }
 0x3e9   : > { %v2174_v40 = vpop.f32.mrf.mxu0  ;;  %v2258_v23 = vadd.f32 %v2257_v10, %v2168_v51 }
 0x3ea   : > { %v2259_v49 = vpop.f32.mrf.mxu1 }
 0x3eb   : > { %v2176_v39 = vpop.f32.mrf.mxu0  ;;  %v2260_v20 = vadd.f32 %v2259_v49, %v2170_v46 }
 0x3ee   : > { %v2263_v19 = vpop.f32.mrf.mxu1 }
 0x3ef   : > { %v2264_v38 = vadd.f32 %v2263_v19, %v2174_v40 }
 0x3f0   : > { %v2265_v59 = vpop.f32.mrf.mxu1 }
 0x3f1   : > { %v2266_v48 = vadd.f32 %v2265_v59, %v2176_v39 }
 0x409   : > { %v2523_v13 = vpop.permute.xlu1 %2522 }
 0x40b   : > { %v2531_v51 = vpop.permute.xlu0 %2530 }
 0x40f   : > { %v2525_v10 = vpop.permute.xlu1 %2524 }
 0x411   : > { %v2533_v46 = vpop.permute.xlu0 %2532 }
 0x415   : > { %v2527_v49 = vpop.permute.xlu1 %2526 }
 0x417   : > { %v2535_v40 = vpop.permute.xlu0 %2534 }
 0x419   : > { %v7972_v19 = vpop.permute.xlu1 %2458 }
 0x41b   : > { %v7974_v39 = vpop.permute.xlu0 %2466 }
 0x420   : > { %v2334_v7 = vpop.f32.mrf.mxu0 }
 0x421   : > { %v2335_v63 = vadd.f32 %v2334_v7, %v2246_v22  ;;  %v2529_v22 = vpop.permute.xlu1 %2528  ;;  %v2537_v7 = vpop.permute.xlu0 %2536 }
 0x422   : > { %v2336_v17 = vpop.f32.mrf.mxu0 }
 0x423   : > { %v2337_v31 = vadd.f32 %v2336_v17, %v2248_v56  ;;  %v2423_v3 = vpop.f32.mrf.mxu1 }
 0x424   : > { %v7904_v30 = vadd.f32 %v2423_v3, %v2335_v63  ;;  %v2340_v34 = vpop.f32.mrf.mxu0 }
 0x425   : > { %v2341_v11 = vadd.f32 %v2340_v34, %v2252_v60  ;;  %v2425_v9 = vpop.f32.mrf.mxu1  ;;  %v7976_v56 = vpop.permute.xlu1 %2460  ;;  %v7981_v60 = vadd.s32 128, %v6882_v35 }
 0x426   : > { %v7906_v52 = vadd.f32 %v2425_v9, %v2337_v31  ;;  %v2342_v58 = vpop.f32.mrf.mxu0  ;;  %2538 = vrot.lane.b32.xlu1 %v7904_v30, %s6459_s8  ;;  %v7978_v59 = vpop.permute.xlu0 %2468 }
 0x427   : > { %v2343_v44 = vadd.f32 %v2342_v58, %v2254_v57  ;;  %v2429_v21 = vpop.f32.mrf.mxu1  ;;  %9082 = vst [vmem:[#allocation16_spill] sm:$0xff] %v7981_v60  ;;  %v2447_v34 = vand.u32 255, %v7981_v60  ;;  %v2915_v58 = vld [vmem:[#allocation8 + $0x1c8] sm:$0xff] }
 0x428   : > { %v7910_v32 = vadd.f32 %v2429_v21, %v2341_v11  ;;  %v2346_v42 = vpop.f32.mrf.mxu0  ;;  %2546 = vrot.lane.b32.xlu0 %v7906_v52, %s6459_s8  ;;  %v2449_v11 = vand.u32 255, %v6993_v41  ;;  %v2565_v41 = vsel %vm600_vm0, %v2529_v22, %v2537_v7  ;;  %v2978_v21 = vld [vmem:[#allocation8 + $0x5c0] sm:$0xff] }
 0x429   : > { %v2347_v27 = vadd.f32 %v2346_v42, %v2258_v23  ;;  %v2431_v2 = vpop.f32.mrf.mxu1  ;;  %vm7985_vm7 = vcmp.ne.s32.totalorder %v2447_v34, 255  ;;  %v2917_v34 = vld [vmem:[#allocation8 + $0x1e8] sm:$0xff] }
 0x42a   : > { %v7914_v55 = vadd.f32 %v2431_v2, %v2343_v44  ;;  %v2348_v0 = vpop.f32.mrf.mxu0  ;;  %2540 = vrot.lane.b32.xlu1 %v7910_v32, %s6459_s8  ;;  %vm7991_vm8 = vcmp.ne.s32.totalorder %v2449_v11, 255  ;;  %v8141_v11 = vld [vmem:[#allocation8 + $0x1e0] sm:$0xff] }
 0x42b   : > { %v2349_v14 = vadd.f32 %v2348_v0, %v2260_v20  ;;  %v2435_v61 = vpop.f32.mrf.mxu1 }
 0x42c   : > { %v7918_v62 = vadd.f32 %v2435_v61, %v2347_v27  ;;  %v2352_v47 = vpop.f32.mrf.mxu0  ;;  %2548 = vrot.lane.b32.xlu0 %v7914_v55, %s6459_s8 }
 0x42d   : > { %v2353_v29 = vadd.f32 %v2352_v47, %v2264_v38  ;;  %v2437_v28 = vpop.f32.mrf.mxu1  ;;  %v2564_v38 = vsel %vm600_vm0, %v2527_v49, %v2535_v40 }
 0x42e   : > { %v7922_v6 = vadd.f32 %v2437_v28, %v2349_v14  ;;  %v2354_v1 = vpop.f32.mrf.mxu0  ;;  %2542 = vrot.lane.b32.xlu1 %v7918_v62, %s6459_s8 }
 0x42f   : > { %v2355_v5 = vadd.f32 %v2354_v1, %v2266_v48  ;;  %v2441_v24 = vpop.f32.mrf.mxu1  ;;  %v2563_v48 = vsel %vm600_vm0, %v2525_v10, %v2533_v46 }
 0x430   : > { %v7926_v15 = vadd.f32 %v2441_v24, %v2353_v29  ;;  %2550 = vrot.lane.b32.xlu0 %v7922_v6, %s6459_s8  ;;  %v2562_v24 = vsel %vm600_vm0, %v2523_v13, %v2531_v51 }
 0x431   : > { %v2443_v43 = vpop.f32.mrf.mxu1 }
 0x432   : > { %v7930_v37 = vadd.f32 %v2443_v43, %v2355_v5  ;;  %2544 = vrot.lane.b32.xlu1 %v7926_v15, %s6459_s8 }
 0x434   : > { %2552 = vrot.lane.b32.xlu0 %v7930_v37, %s6459_s8 }
 0x436   : > { %2474 = vrot.lane.b32.xlu1 %v7918_v62, %s6460_s10 }
 0x438   : > { %2482 = vrot.lane.b32.xlu0 %v7922_v6, %s6460_s10 }
 0x43a   : > { %2476 = vrot.lane.b32.xlu1 %v7926_v15, %s6460_s10 }
 0x43c   : > { %2464 = vrot.lane.b32.xlu0 %v7874_v36, %s6460_s10 }
 0x43e   : > { %2456 = vrot.lane.b32.xlu1 %v7872_v12, %s6460_s10 }
 0x440   : > { %2480 = vrot.lane.b32.xlu0 %v7914_v55, %s6460_s10 }
 0x442   : > { %2472 = vrot.lane.b32.xlu1 %v7910_v32, %s6460_s10 }
 0x444   : > { %2484 = vrot.lane.b32.xlu0 %v7930_v37, %s6460_s10 }
 0x446   : > { %2454 = vrot.lane.b32.xlu1 %v7864_v33, %s6460_s10 }
 0x448   : > { %2462 = vrot.lane.b32.xlu0 %v7866_v16, %s6460_s10 }
 0x44a   : > { %2470 = vrot.lane.b32.xlu1 %v7904_v30, %s6460_s10 }
 0x44c   : > { %2478 = vrot.lane.b32.xlu0 %v7906_v52, %s6460_s10 }
 0x44e   : > { %2598 = vperm.xlu1 %6068, %v5132_v4  }
 0x450   : > { %2603 = vperm.xlu0 %6067, %v5133_v8  }
 0x452   : > { %2608 = vperm.xlu1 %6068, %v5134_v26  }
 0x454   : > { %2613 = vperm.xlu0 %6067, %v5135_v50   ;;  %v377_v50 = vadd.s32 256, %v6882_v35 }
 0x498   : > { %v2539_v63 = vpop.permute.xlu1 %2538 }
 0x499   : > { %v2558_v28 = vsel %vm600_vm0, %v2531_v51, %v2539_v63 }
 0x49a   : > { %v2547_v17 = vpop.permute.xlu0 %2546 }
 0x49b   : > { %v2566_v4 = vsel %vm600_vm0, %v2547_v17, %v2523_v13  ;;  %v2554_v26 = vsel %vm600_vm0, %v2539_v63, %v2547_v17  ;;  %v2588_v17 = vld [vmem:[#allocation6 + $0x28] sm:$0xff] }
 0x49c   : > { %v2541_v31 = vpop.permute.xlu1 %2540 }
 0x49d   : > { %v2559_v14 = vsel %vm600_vm0, %v2533_v46, %v2541_v31 }
 0x49e   : > { %v2549_v3 = vpop.permute.xlu0 %2548 }
 0x49f   : > { %v2567_v1 = vsel %vm600_vm0, %v2549_v3, %v2525_v10  ;;  %v2555_v43 = vsel %vm600_vm0, %v2541_v31, %v2549_v3  ;;  %v2448_v10 = vand.u32 255, %v377_v50  ;;  %v2589_v31 = vld [vmem:[#allocation6 + $0x30] sm:$0xff]  ;;  %v2590_v3 = vld [vmem:[#allocation6 + $0x38] sm:$0xff]  ;;  %v2903_v50 = vld [vmem:[#allocation8 + $0x108] sm:$0xff] }
 0x4a0   : > { %v2543_v57 = vpop.permute.xlu1 %2542 }
 0x4a1   : > { %v2560_v20 = vsel %vm600_vm0, %v2535_v40, %v2543_v57  ;;  %vm8068_vm10 = vcmp.ne.s32.totalorder %v2448_v10, 0  ;;  %v2901_v10 = vld [vmem:[#allocation8 + $0xe8] sm:$0xff] }
 0x4a2   : > { %v2551_v9 = vpop.permute.xlu0 %2550 }
 0x4a3   : > { %v2568_v61 = vsel %vm600_vm0, %v2551_v9, %v2527_v49  ;;  %v2556_v29 = vsel %vm600_vm0, %v2543_v57, %v2551_v9  ;;  %v2981_v57 = vld [vmem:[#allocation8 + $0x5e8] sm:$0xff]  ;;  %v2980_v9 = vld [vmem:[#allocation8 + $0x5e0] sm:$0xff] }
 0x4a4   : > { %v2545_v23 = vpop.permute.xlu1 %2544 }
 0x4a5   : > { %v2561_v44 = vsel %vm600_vm0, %v2537_v7, %v2545_v23  ;;  %v2587_v7 = vld [vmem:[#allocation6 + $0x20] sm:$0xff] }
 0x4a6   : > { %5137 = vmatprep.subr.msk.mxu0 %vm7985_vm7, %v2561_v44  ;;  %v2553_v42 = vpop.permute.xlu0 %2552  ;;  %v8144_v44 = vld [vmem:[#allocation8 + $0x1c0] sm:$0xff] }
 0x4a7   : > { %2637 = vmatpush1.msra.mxu0 %v2565_v41  ;;  %v2569_v27 = vsel %vm600_vm0, %v2553_v42, %v2529_v22  ;;  %v2557_v2 = vsel %vm600_vm0, %v2545_v23, %v2553_v42  ;;  %v2979_v23 = vld [vmem:[#allocation8 + $0x5c8] sm:$0xff] }
 0x4a8   : > { %v8005_v0 = vpop.permute.xlu1 %2474  ;;  %5139 = vmatprep.subr.msk.mxu0 %vm7985_vm7, %v2560_v20  ;;  %5157 = vmatprep.subr.msk.mxu1 %vm7991_vm8, %v2569_v27  ;;  %v2913_v42 = vld [vmem:[#allocation8 + $0x1a8] sm:$0xff]  ;;  %v8146_v20 = vld [vmem:[#allocation8 + $0x1a0] sm:$0xff] }
 0x4a9   : > { %2639 = vmatpush1.msra.mxu0 %v2564_v38  ;;  %2726 = vmatpush1.msra.mxu1 %v2557_v2  ;;  %v2977_v41 = vld [vmem:[#allocation8 + $0x5a8] sm:$0xff]  ;;  %v2976_v27 = vld [vmem:[#allocation8 + $0x5a0] sm:$0xff] }
 0x4aa   : > { %5141 = vmatprep.subr.msk.mxu0 %vm7985_vm7, %v2559_v14  ;;  %5159 = vmatprep.subr.msk.mxu1 %vm7991_vm8, %v2568_v61  ;;  %v2483_v47 = vpop.permute.xlu0 %2482  ;;  %v2911_v2 = vld [vmem:[#allocation8 + $0x188] sm:$0xff]  ;;  %v8149_v38 = vld [vmem:[#allocation8 + $0x180] sm:$0xff] }
 0x4ab   : > { %2641 = vmatpush1.msra.mxu0 %v2563_v48  ;;  %2728 = vmatpush1.msra.mxu1 %v2556_v29  ;;  %v2974_v14 = vld [vmem:[#allocation8 + $0x580] sm:$0xff]  ;;  %v2909_v61 = vld [vmem:[#allocation8 + $0x168] sm:$0xff] }
 0x4ac   : > { %v2477_v5 = vpop.permute.xlu1 %2476  ;;  %5143 = vmatprep.subr.msk.mxu0 %vm7985_vm7, %v2558_v28  ;;  %5161 = vmatprep.subr.msk.mxu1 %vm7991_vm8, %v2567_v1  ;;  %v8152_v48 = vld [vmem:[#allocation8 + $0x160] sm:$0xff]  ;;  %v2907_v28 = vld [vmem:[#allocation8 + $0x148] sm:$0xff] }
 0x4ad   : > { %2643 = vmatpush1.msra.mxu0 %v2562_v24  ;;  %2730 = vmatpush1.msra.mxu1 %v2555_v43  ;;  %v2972_v29 = vld [vmem:[#allocation8 + $0x560] sm:$0xff]  ;;  %v2971_v1 = vld [vmem:[#allocation8 + $0x548] sm:$0xff] }
 0x4ae   : > { %2644 = vmatprep.subr.mxu0 %v7894_v25  ;;  %5163 = vmatprep.subr.msk.mxu1 %vm7991_vm8, %v2566_v4  ;;  %v2465_v8 = vpop.permute.xlu0 %2464  ;;  %v2446_v25 = vand.u32 255, %v6882_v35  ;;  %v2970_v24 = vld [vmem:[#allocation8 + $0x540] sm:$0xff]  ;;  %v2905_v43 = vld [vmem:[#allocation8 + $0x128] sm:$0xff] }
 0x4af   : > { %2645 = vmatpush1.msra.mxu0 %v7890_v53  ;;  %2732 = vmatpush1.msra.mxu1 %v2554_v26  ;;  %v2969_v4 = vld [vmem:[#allocation8 + $0x528] sm:$0xff]  ;;  %v2968_v26 = vld [vmem:[#allocation8 + $0x520] sm:$0xff] }
 0x4b0   : > { %v2457_v51 = vpop.permute.xlu1 %2456  ;;  %2646 = vmatprep.subr.mxu0 %v7882_v18  ;;  %2733 = vmatprep.subr.mxu1 %v7930_v37  ;;  %vm8063_vm9 = vcmp.ne.s32.totalorder %v2446_v25, 0  ;;  %v8161_v25 = vld [vmem:[#allocation8 + $0x100] sm:$0xff] }
 0x4b1   : > { %2647 = vmatpush1.msra.mxu0 %v7880_v54  ;;  %2734 = vmatpush1.msra.mxu1 %v7926_v15  ;;  %v2495_v37 = vsel %vm463_vm1, %v2457_v51, %v2465_v8  ;;  %v2964_v54 = vld [vmem:[#allocation8 + $0x4e0] sm:$0xff] }
 0x4b2   : > { %2648 = vmatprep.subr.mxu0 %v7874_v36  ;;  %2735 = vmatprep.subr.mxu1 %v7922_v6  ;;  %v2481_v13 = vpop.permute.xlu0 %2480  ;;  %v2497_v36 = vsel %vm463_vm1, %v7976_v56, %v7978_v59  ;;  %v2492_v6 = vsel %vm463_vm1, %v7974_v39, %v8005_v0 }
 0x4b3   : > { %2649 = vmatpush1.msra.mxu0 %v7872_v12  ;;  %2736 = vmatpush1.msra.mxu1 %v7918_v62  ;;  %v2488_v62 = vsel %vm463_vm1, %v8005_v0, %v2483_v47  ;;  %v2499_v46 = vsel %vm463_vm1, %v2481_v13, %v2457_v51  ;;  %v2975_v0 = vld [vmem:[#allocation8 + $0x588] sm:$0xff] }
 0x4b4   : > { %v2473_v53 = vpop.permute.xlu1 %2472  ;;  %2650 = vmatprep.subr.mxu0 %v7866_v16  ;;  %2737 = vmatprep.subr.mxu1 %v7914_v55  ;;  %v2967_v51 = vld [vmem:[#allocation8 + $0x508] sm:$0xff] }
 0x4b5   : > { %2651 = vmatpush1.msra.mxu0 %v7864_v33  ;;  %2738 = vmatpush1.msra.mxu1 %v7910_v32  ;;  %v2493_v32 = vsel %vm463_vm1, %v7978_v59, %v2477_v5  ;;  %v2487_v49 = vsel %vm463_vm1, %v2473_v53, %v2481_v13  ;;  %v2966_v13 = vld [vmem:[#allocation8 + $0x500] sm:$0xff]  ;;  %v2963_v16 = vld [vmem:[#allocation8 + $0x4c8] sm:$0xff] }
 0x4b6   : > { %2652 = vmatprep.subr.mxu0 %v2497_v36  ;;  %2739 = vmatprep.subr.mxu1 %v7906_v52  ;;  %v2485_v12 = vpop.permute.xlu0 %2484  ;;  %v2496_v52 = vsel %vm463_vm1, %v7972_v19, %v7974_v39  ;;  %v8164_v36 = vld [vmem:[#allocation8 + $0xe0] sm:$0xff] }
 0x4b7   : > { %v2501_v33 = vsel %vm463_vm1, %v2485_v12, %v7976_v56  ;;  %2740 = vmatpush1.msra.mxu1 %v7904_v30  ;;  %v2489_v18 = vsel %vm463_vm1, %v2477_v5, %v2485_v12  ;;  %v2500_v30 = vsel %vm463_vm1, %v2483_v47, %v7972_v19  ;;  %v2491_v19 = vsel %vm463_vm1, %v2465_v8, %v2473_v53  ;;  %v2973_v47 = vld [vmem:[#allocation8 + $0x568] sm:$0xff]  ;;  %v8155_v5 = vld [vmem:[#allocation8 + $0x140] sm:$0xff] }
 0x4b8   : > { %v2455_v55 = vpop.permute.xlu1 %2454  ;;  %5145 = vmatpush1.msk.msra.mxu0 %vm8063_vm9, %v2501_v33  ;;  %2741 = vmatprep.subr.mxu1 %v2489_v18  ;;  %v8158_v8 = vld [vmem:[#allocation8 + $0x120] sm:$0xff]  ;;  %v2965_v53 = vld [vmem:[#allocation8 + $0x4e8] sm:$0xff] }
 0x4b9   : > { %2654 = vmatprep.subr.mxu0 %v2496_v52  ;;  %5165 = vmatpush1.msk.msra.mxu1 %vm8068_vm10, %v2493_v32  ;;  %v2899_v12 = vld [vmem:[#allocation8 + $0xc8] sm:$0xff]  ;;  %v8167_v33 = vld [vmem:[#allocation8 + $0xc0] sm:$0xff] }
 0x4ba   : > { %5147 = vmatpush1.msk.msra.mxu0 %vm8063_vm9, %v2500_v30  ;;  %2743 = vmatprep.subr.mxu1 %v2488_v62  ;;  %v2463_v15 = vpop.permute.xlu0 %2462  ;;  %v2962_v18 = vld [vmem:[#allocation8 + $0x4c0] sm:$0xff]  ;;  %v2897_v32 = vld [vmem:[#allocation8 + $0xa8] sm:$0xff] }
 0x4bb   : > { %2656 = vmatprep.subr.mxu0 %v2495_v37  ;;  %5167 = vmatpush1.msk.msra.mxu1 %vm8068_vm10, %v2492_v6  ;;  %v2494_v40 = vsel %vm463_vm1, %v2455_v55, %v2463_v15  ;;  %v8170_v52 = vld [vmem:[#allocation8 + $0xa0] sm:$0xff]  ;;  %v2895_v62 = vld [vmem:[#allocation8 + $0x88] sm:$0xff] }
 0x4bc   : > { %5149 = vmatpush1.msk.msra.mxu0 %vm8063_vm9, %v2499_v46  ;;  %2745 = vmatprep.subr.mxu1 %v2487_v49  ;;  %v2471_v39 = vpop.permute.xlu1 %2470  ;;  %v2960_v30 = vld [vmem:[#allocation8 + $0x4a0] sm:$0xff]  ;;  %v2959_v6 = vld [vmem:[#allocation8 + $0x488] sm:$0xff] }
 0x4bd   : > { %2658 = vmatprep.subr.mxu0 %v2494_v40  ;;  %5169 = vmatpush1.msk.msra.mxu1 %vm8068_vm10, %v2491_v19  ;;  %v2490_v63 = vsel %vm463_vm1, %v2463_v15, %v2471_v39  ;;  %v8173_v15 = vld [vmem:[#allocation8 + $0x80] sm:$0xff]  ;;  %v2893_v46 = vld [vmem:[#allocation8 + $0x68] sm:$0xff] }
 0x4be   : > { %v2479_v22 = vpop.permute.xlu0 %2478  ;;  %v2958_v37 = vld [vmem:[#allocation8 + $0x480] sm:$0xff]  ;;  %v2957_v49 = vld [vmem:[#allocation8 + $0x468] sm:$0xff] }
 0x4bf   : > { %v2498_v56 = vsel %vm463_vm1, %v2479_v22, %v2455_v55  ;;  %v2486_v59 = vsel %vm463_vm1, %v2471_v39, %v2479_v22  ;;  %v2961_v55 = vld [vmem:[#allocation8 + $0x4a8] sm:$0xff]  ;;  %v8176_v40 = vld [vmem:[#allocation8 + $0x60] sm:$0xff] }
 0x4c0   : > { %5151 = vmatpush1.msk.msra.mxu0 %vm8063_vm9, %v2498_v56  ;;  %2747 = vmatprep.subr.mxu1 %v2486_v59  ;;  %v2956_v19 = vld [vmem:[#allocation8 + $0x460] sm:$0xff]  ;;  %v2891_v39 = vld [vmem:[#allocation8 + $0x48] sm:$0xff] }
 0x4c1   : > { %5152 = vmatmul.mubr.msk.f32.vlgmr.msra.gmra.mxu0 %vm693_vm4, %v2587_v7  ;;  %5171 = vmatpush1.msk.msra.mxu1 %vm8068_vm10, %v2490_v63  ;;  %v2955_v22 = vld [vmem:[#allocation8 + $0x448] sm:$0xff]  ;;  %v2954_v56 = vld [vmem:[#allocation8 + $0x440] sm:$0xff]  ;;  %vm4960_vm10 = vcmask 8192  }
 0x4c2   : > { %5172 = vmatmul.mubr.msk.f32.vlgmr.msra.gmra.mxu1 %vm693_vm4, %v2587_v7  ;;  %2698 = vmatprep.mubr.f32.mxu0 %v9081_v45  ;;  %v8179_v7 = vld [vmem:[#allocation8 + $0x40] sm:$0xff]  ;;  %v2889_v59 = vld [vmem:[#allocation8 + $0x28] sm:$0xff] }
 0x4c3   : > { %2787 = vmatprep.mubr.f32.mxu1 %v9081_v45  ;;  %3014 = vmatprep.subr.mxu0 %v2917_v34  ;;  %9091 = vst [vmem:[#allocation17_spill] sm:$0xff] %v8179_v7  ;;  %v2953_v63 = vld [vmem:[#allocation8 + $0x428] sm:$0xff] }
 0x4c4   : > { %3103 = vmatprep.subr.mxu1 %v2981_v57  ;;  %3015 = vmatpush1.msra.mxu0 %v8141_v11  ;;  %v2951_v34 = vld [vmem:[#allocation8 + $0x408] sm:$0xff]  ;;  %v8185_v57 = vld [vmem:[#allocation8] sm:$0xff] }
 0x4c5   : > { %5153 = vmatmul.mubr.msk.f32.gmra.mxu0 %vm693_vm4, %v2588_v17  ;;  %3104 = vmatpush1.msra.mxu1 %v2980_v9  ;;  %9093 = vst [vmem:[#allocation19_spill] sm:$0xff] %v8185_v57  ;;  %v2950_v9 = vld [vmem:[#allocation8 + $0x400] sm:$0xff] }
 0x4c6   : > { %5173 = vmatmul.mubr.msk.f32.gmra.mxu1 %vm693_vm4, %v2588_v17  ;;  %2704 = vmatprep.mubr.f32.mxu0 %v9081_v45  ;;  %v8182_v17 = vld [vmem:[#allocation8 + $0x20] sm:$0xff] }
 0x4c7   : > { %2793 = vmatprep.mubr.f32.mxu1 %v9081_v45  ;;  %3016 = vmatprep.subr.mxu0 %v2915_v58  ;;  %9092 = vst [vmem:[#allocation18_spill] sm:$0xff] %v8182_v17  ;;  %v2949_v58 = vld [vmem:[#allocation8 + $0x3e8] sm:$0xff] }
 0x4c8   : > { %3105 = vmatprep.subr.mxu1 %v2979_v23  ;;  %3017 = vmatpush1.msra.mxu0 %v8144_v44  ;;  %v3013_v23 = vld [vmem:[#allocation8 + $0x7e8] sm:$0xff] }
 0x4c9   : > { %5154 = vmatmul.mubr.msk.f32.gmra.mxu0 %vm693_vm4, %v2589_v31  ;;  %3106 = vmatpush1.msra.mxu1 %v2978_v21  ;;  %v8188_v21 = vld [vmem:[#allocation8 + $0x3e0] sm:$0xff] }
 0x4ca   : > { %5174 = vmatmul.mubr.msk.f32.gmra.mxu1 %vm693_vm4, %v2589_v31  ;;  %2710 = vmatprep.mubr.f32.mxu0 %v9081_v45  ;;  %v2952_v31 = vld [vmem:[#allocation8 + $0x420] sm:$0xff] }
 0x4cb   : > { %2799 = vmatprep.mubr.f32.mxu1 %v9081_v45  ;;  %3018 = vmatprep.subr.mxu0 %v2913_v42  ;;  %v3012_v42 = vld [vmem:[#allocation8 + $0x7e0] sm:$0xff] }
 0x4cc   : > { %3107 = vmatprep.subr.mxu1 %v2977_v41  ;;  %3019 = vmatpush1.msra.mxu0 %v8146_v20  ;;  %v2947_v41 = vld [vmem:[#allocation8 + $0x3c8] sm:$0xff] }
 0x4cd   : > { %5155 = vmatmul.mubr.msk.f32.gmra.mxu0 %vm693_vm4, %v2590_v3  ;;  %3108 = vmatpush1.msra.mxu1 %v2976_v27  ;;  %v3011_v27 = vld [vmem:[#allocation8 + $0x7c8] sm:$0xff] }
 0x4ce   : > { %5175 = vmatmul.mubr.msk.f32.gmra.mxu1 %vm693_vm4, %v2590_v3  ;;  %3020 = vmatprep.subr.mxu0 %v2911_v2  ;;  %v2887_v3 = vld [vmem:[#allocation8 + $0x8] sm:$0xff]  ;;  %v8191_v2 = vld [vmem:[#allocation8 + $0x3c0] sm:$0xff] }
 0x4cf   : > { %3109 = vmatprep.subr.mxu1 %v2975_v0  ;;  %3021 = vmatpush1.msra.mxu0 %v8149_v38  ;;  %v3010_v0 = vld [vmem:[#allocation8 + $0x7c0] sm:$0xff] }
 0x4d0   : > { %3110 = vmatpush1.msra.mxu1 %v2974_v14  ;;  %3022 = vmatprep.subr.mxu0 %v2909_v61  ;;  %v2945_v14 = vld [vmem:[#allocation8 + $0x3a8] sm:$0xff] }
 0x4d1   : > { %3111 = vmatprep.subr.mxu1 %v2973_v47  ;;  %3023 = vmatpush1.msra.mxu0 %v8152_v48  ;;  %v3009_v61 = vld [vmem:[#allocation8 + $0x7a8] sm:$0xff]  ;;  %v8194_v47 = vld [vmem:[#allocation8 + $0x3a0] sm:$0xff] }
 0x4d2   : > { %3112 = vmatpush1.msra.mxu1 %v2972_v29  ;;  %3024 = vmatprep.subr.mxu0 %v2907_v28  ;;  %v3008_v29 = vld [vmem:[#allocation8 + $0x7a0] sm:$0xff]  ;;  %v2943_v28 = vld [vmem:[#allocation8 + $0x388] sm:$0xff] }
 0x4d3   : > { %3113 = vmatprep.subr.mxu1 %v2971_v1  ;;  %3025 = vmatpush1.msra.mxu0 %v8155_v5  ;;  %v3007_v1 = vld [vmem:[#allocation8 + $0x788] sm:$0xff] }
 0x4d4   : > { %3114 = vmatpush1.msra.mxu1 %v2970_v24  ;;  %3026 = vmatprep.subr.mxu0 %v2905_v43  ;;  %v8197_v24 = vld [vmem:[#allocation8 + $0x380] sm:$0xff] }
 0x4d5   : > { %3115 = vmatprep.subr.mxu1 %v2969_v4  ;;  %3027 = vmatpush1.msra.mxu0 %v8158_v8  ;;  %v3006_v43 = vld [vmem:[#allocation8 + $0x780] sm:$0xff]  ;;  %v2941_v4 = vld [vmem:[#allocation8 + $0x368] sm:$0xff] }
 0x4d6   : > { %3116 = vmatpush1.msra.mxu1 %v2968_v26  ;;  %3028 = vmatprep.subr.mxu0 %v2903_v50  ;;  %v3005_v26 = vld [vmem:[#allocation8 + $0x768] sm:$0xff]  ;;  %v8200_v50 = vld [vmem:[#allocation8 + $0x360] sm:$0xff] }
 0x4d7   : > { %3117 = vmatprep.subr.mxu1 %v2967_v51  ;;  %3029 = vmatpush1.msra.mxu0 %v8161_v25  ;;  %v3004_v51 = vld [vmem:[#allocation8 + $0x760] sm:$0xff] }
 0x4d8   : > { %3118 = vmatpush1.msra.mxu1 %v2966_v13  ;;  %3030 = vmatprep.subr.mxu0 %v2901_v10  ;;  %v2939_v13 = vld [vmem:[#allocation8 + $0x348] sm:$0xff] }
 0x4d9   : > { %3119 = vmatprep.subr.mxu1 %v2965_v53  ;;  %3031 = vmatpush1.msra.mxu0 %v8164_v36  ;;  %v3003_v10 = vld [vmem:[#allocation8 + $0x748] sm:$0xff]  ;;  %v8203_v53 = vld [vmem:[#allocation8 + $0x340] sm:$0xff] }
 0x4da   : > { %3120 = vmatpush1.msra.mxu1 %v2964_v54  ;;  %3032 = vmatprep.subr.mxu0 %v2899_v12  ;;  %v3002_v54 = vld [vmem:[#allocation8 + $0x740] sm:$0xff]  ;;  %v2937_v12 = vld [vmem:[#allocation8 + $0x328] sm:$0xff] }
 0x4db   : > { %3121 = vmatprep.subr.mxu1 %v2963_v16  ;;  %3033 = vmatpush1.msra.mxu0 %v8167_v33  ;;  %v3001_v16 = vld [vmem:[#allocation8 + $0x728] sm:$0xff] }
 0x4dc   : > { %3122 = vmatpush1.msra.mxu1 %v2962_v18  ;;  %3034 = vmatprep.subr.mxu0 %v2897_v32  ;;  %v8206_v18 = vld [vmem:[#allocation8 + $0x320] sm:$0xff] }
 0x4dd   : > { %3123 = vmatprep.subr.mxu1 %v2961_v55  ;;  %3035 = vmatpush1.msra.mxu0 %v8170_v52  ;;  %v3000_v32 = vld [vmem:[#allocation8 + $0x720] sm:$0xff]  ;;  %v2935_v55 = vld [vmem:[#allocation8 + $0x308] sm:$0xff] }
 0x4de   : > { %3124 = vmatpush1.msra.mxu1 %v2960_v30  ;;  %3036 = vmatprep.subr.mxu0 %v2895_v62  ;;  %v2999_v30 = vld [vmem:[#allocation8 + $0x708] sm:$0xff]  ;;  %v8209_v62 = vld [vmem:[#allocation8 + $0x300] sm:$0xff] }
 0x4df   : > { %3125 = vmatprep.subr.mxu1 %v2959_v6  ;;  %3037 = vmatpush1.msra.mxu0 %v8173_v15  ;;  %v2998_v6 = vld [vmem:[#allocation8 + $0x700] sm:$0xff] }
 0x4e0   : > { %3126 = vmatpush1.msra.mxu1 %v2958_v37  ;;  %3038 = vmatprep.subr.mxu0 %v2893_v46  ;;  %v2933_v37 = vld [vmem:[#allocation8 + $0x2e8] sm:$0xff] }
 0x4e1   : > { %3127 = vmatprep.subr.mxu1 %v2957_v49  ;;  %3039 = vmatpush1.msra.mxu0 %v8176_v40  ;;  %v2997_v46 = vld [vmem:[#allocation8 + $0x6e8] sm:$0xff]  ;;  %v8212_v49 = vld [vmem:[#allocation8 + $0x2e0] sm:$0xff] }
 0x4e2   : > { %3128 = vmatpush1.msra.mxu1 %v2956_v19  ;;  %3040 = vmatprep.subr.mxu0 %v2891_v39  ;;  %v2996_v19 = vld [vmem:[#allocation8 + $0x6e0] sm:$0xff]  ;;  %v2931_v39 = vld [vmem:[#allocation8 + $0x2c8] sm:$0xff] }
 0x4e3   : > { %3129 = vmatprep.subr.mxu1 %v2955_v22  ;;  %3041 = vmatpush1.msra.mxu0 %v8179_v7  ;;  %v2995_v22 = vld [vmem:[#allocation8 + $0x6c8] sm:$0xff] }
 0x4e4   : > { %3130 = vmatpush1.msra.mxu1 %v2954_v56  ;;  %3042 = vmatprep.subr.mxu0 %v2889_v59  ;;  %v8215_v56 = vld [vmem:[#allocation8 + $0x2c0] sm:$0xff] }
 0x4e5   : > { %3131 = vmatprep.subr.mxu1 %v2953_v63  ;;  %3043 = vmatpush1.msra.mxu0 %v8182_v17  ;;  %v2994_v59 = vld [vmem:[#allocation8 + $0x6c0] sm:$0xff]  ;;  %v2929_v63 = vld [vmem:[#allocation8 + $0x2a8] sm:$0xff] }
 0x4e6   : > { %3132 = vmatpush1.msra.mxu1 %v2952_v31  ;;  %3044 = vmatprep.subr.mxu0 %v2887_v3  ;;  %v2993_v31 = vld [vmem:[#allocation8 + $0x6a8] sm:$0xff]  ;;  %v8218_v3 = vld [vmem:[#allocation8 + $0x2a0] sm:$0xff] }
 0x4e7   : > { %3133 = vmatprep.subr.mxu1 %v2951_v34  ;;  %3045 = vmatpush1.msra.mxu0 %v8185_v57  ;;  %v2992_v34 = vld [vmem:[#allocation8 + $0x6a0] sm:$0xff] }
 0x4e8   : > { %3134 = vmatpush1.msra.mxu1 %v2950_v9  ;;  %3046 = vmatprep.subr.mxu0 %v2949_v58  ;;  %v2927_v9 = vld [vmem:[#allocation8 + $0x288] sm:$0xff] }
 0x4e9   : > { %3135 = vmatprep.subr.mxu1 %v3013_v23  ;;  %3047 = vmatpush2.msra.mxu0 %v8188_v21  ;;  %v2991_v58 = vld [vmem:[#allocation8 + $0x688] sm:$0xff]  ;;  %v8221_v23 = vld [vmem:[#allocation8 + $0x280] sm:$0xff] }
 0x4ea   : > { %3136 = vmatpush2.msra.mxu1 %v3012_v42  ;;  %3048 = vmatprep.subr.mxu0 %v2947_v41  ;;  %v2990_v42 = vld [vmem:[#allocation8 + $0x680] sm:$0xff]  ;;  %v2925_v41 = vld [vmem:[#allocation8 + $0x268] sm:$0xff] }
 0x4eb   : > { %3137 = vmatprep.subr.mxu1 %v3011_v27  ;;  %3049 = vmatpush2.msra.mxu0 %v8191_v2  ;;  %v2989_v27 = vld [vmem:[#allocation8 + $0x668] sm:$0xff] }
 0x4ec   : > { %3138 = vmatpush2.msra.mxu1 %v3010_v0  ;;  %3050 = vmatprep.subr.mxu0 %v2945_v14  ;;  %v8225_v0 = vld [vmem:[#allocation8 + $0x260] sm:$0xff] }
 0x4ed   : > { %3139 = vmatprep.subr.mxu1 %v3009_v61  ;;  %3051 = vmatpush2.msra.mxu0 %v8194_v47  ;;  %v2988_v14 = vld [vmem:[#allocation8 + $0x660] sm:$0xff]  ;;  %v2923_v61 = vld [vmem:[#allocation8 + $0x248] sm:$0xff] }
 0x4ee   : > { %3140 = vmatpush2.msra.mxu1 %v3008_v29  ;;  %3052 = vmatprep.subr.mxu0 %v2943_v28  ;;  %v2987_v29 = vld [vmem:[#allocation8 + $0x648] sm:$0xff]  ;;  %v8228_v28 = vld [vmem:[#allocation8 + $0x240] sm:$0xff] }
 0x4ef   : > { %3141 = vmatprep.subr.mxu1 %v3007_v1  ;;  %3053 = vmatpush2.msra.mxu0 %v8197_v24  ;;  %9094 = vst [vmem:[#allocation20_spill] sm:$0xff] %v8228_v28  ;;  %v2986_v1 = vld [vmem:[#allocation8 + $0x640] sm:$0xff] }
 0x4f0   : > { %3142 = vmatpush2.msra.mxu1 %v3006_v43  ;;  %3054 = vmatprep.subr.mxu0 %v2941_v4  ;;  %v2921_v43 = vld [vmem:[#allocation8 + $0x228] sm:$0xff] }
 0x4f1   : > { %3143 = vmatprep.subr.mxu1 %v3005_v26  ;;  %3055 = vmatpush2.msra.mxu0 %v8200_v50  ;;  %v2985_v4 = vld [vmem:[#allocation8 + $0x628] sm:$0xff]  ;;  %v8231_v26 = vld [vmem:[#allocation8 + $0x220] sm:$0xff] }
 0x4f2   : > { %3144 = vmatpush2.msra.mxu1 %v3004_v51  ;;  %3056 = vmatprep.subr.mxu0 %v2939_v13  ;;  %9095 = vst [vmem:[#allocation21_spill] sm:$0xff] %v8231_v26  ;;  %v2984_v51 = vld [vmem:[#allocation8 + $0x620] sm:$0xff]  ;;  %v2599_v13 = vpop.permute.xlu1 %2598 }
 0x4f3   : > { %3145 = vmatprep.subr.mxu1 %v3003_v10  ;;  %3057 = vmatpush2.msra.mxu0 %v8203_v53 }
 0x4f4   : > { %3146 = vmatpush2.msra.mxu1 %v3002_v54  ;;  %3058 = vmatprep.subr.mxu0 %v2937_v12  ;;  %v2919_v54 = vld [vmem:[#allocation8 + $0x208] sm:$0xff] }
 0x4f5   : > { %3147 = vmatprep.subr.mxu1 %v3001_v16  ;;  %3059 = vmatpush2.msra.mxu0 %v8206_v18  ;;  %v2983_v12 = vld [vmem:[#allocation8 + $0x608] sm:$0xff] }
 0x4f6   : > { %3148 = vmatpush2.msra.mxu1 %v3000_v32  ;;  %3060 = vmatprep.subr.mxu0 %v2935_v55  ;;  %v8236_v55 = vld [vmem:[#allocation8 + $0x200] sm:$0xff] }
 0x4f7   : > { %3149 = vmatprep.subr.mxu1 %v2999_v30  ;;  %3061 = vmatpush2.msra.mxu0 %v8209_v62  ;;  %9096 = vst [vmem:[#allocation22_spill] sm:$0xff] %v8236_v55  ;;  %v2982_v30 = vld [vmem:[#allocation8 + $0x600] sm:$0xff] }
 0x4f8   : > { %3150 = vmatpush2.msra.mxu1 %v2998_v6  ;;  %3062 = vmatprep.subr.mxu0 %v2933_v37 }
 0x4f9   : > { %3151 = vmatprep.subr.mxu1 %v2997_v46  ;;  %3063 = vmatpush2.msra.mxu0 %v8212_v49 }
 0x4fa   : > { %3152 = vmatpush2.msra.mxu1 %v2996_v19  ;;  %3064 = vmatprep.subr.mxu0 %v2931_v39  ;;  %v2604_v39 = vpop.permute.xlu0 %2603 }
 0x4fb   : > { %3153 = vmatprep.subr.mxu1 %v2995_v22  ;;  %3065 = vmatpush2.msra.mxu0 %v8215_v56 }
 0x4fc   : > { %3154 = vmatpush2.msra.mxu1 %v2994_v59  ;;  %3066 = vmatprep.subr.mxu0 %v2929_v63 }
 0x4fd   : > { %3155 = vmatprep.subr.mxu1 %v2993_v31  ;;  %3067 = vmatpush2.msra.mxu0 %v8218_v3 }
 0x4fe   : > { %3156 = vmatpush2.msra.mxu1 %v2992_v34  ;;  %3068 = vmatprep.subr.mxu0 %v2927_v9 }
 0x4ff   : > { %3157 = vmatprep.subr.mxu1 %v2991_v58  ;;  %3069 = vmatpush2.msra.mxu0 %v8221_v23 }
 0x500   : > { %3158 = vmatpush2.msra.mxu1 %v2990_v42  ;;  %3070 = vmatprep.subr.mxu0 %v2925_v41 }
 0x501   : > { %3159 = vmatprep.subr.mxu1 %v2989_v27  ;;  %3071 = vmatpush2.msra.mxu0 %v8225_v0 }
 0x502   : > { %3160 = vmatpush2.msra.mxu1 %v2988_v14  ;;  %3072 = vmatprep.subr.mxu0 %v2923_v61 }
 0x503   : > { %3161 = vmatprep.subr.mxu1 %v2987_v29  ;;  %3073 = vmatpush2.msra.mxu0 %v8228_v28  ;;  %v2609_v29 = vpop.permute.xlu1 %2608 }
 0x504   : > { %3162 = vmatpush2.msra.mxu1 %v2986_v1  ;;  %3074 = vmatprep.subr.mxu0 %v2921_v43 }
 0x505   : > { %3163 = vmatprep.subr.mxu1 %v2985_v4  ;;  %3075 = vmatpush2.msra.mxu0 %v8231_v26 }
 0x506   : > { %3164 = vmatpush2.msra.mxu1 %v2984_v51  ;;  %3076 = vmatprep.subr.mxu0 %v2919_v54 }
 0x507   : > { %3165 = vmatprep.subr.mxu1 %v2983_v12  ;;  %3077 = vmatpush2.msra.mxu0 %v8236_v55 }
 0x508   : > { %3166 = vmatpush2.msra.mxu1 %v2982_v30 }
 0x509   : > { %5363 = vmatprep.subr.mxu1 %v8188_v21 }
 0x581   : > { %v2694_v10 = vpop.f32.mrf.mxu0 }
 0x582   : > { %v8234_v16 = vadd.f32 %v2694_v10, %v2599_v13  ;;  %v2783_v32 = vpop.f32.mrf.mxu1 }
 0x583   : > { %v8238_v6 = vadd.f32 %v2783_v32, %v2599_v13  ;;  %v2696_v37 = vpop.f32.mrf.mxu0 }
 0x584   : > { %v8241_v46 = vadd.f32 %v2696_v37, %v2599_v13  ;;  %v2785_v19 = vpop.f32.mrf.mxu1  ;;  %v9015_v63 = vmax.f32 %v8234_v16, 0.0  ;;  %v9098_v55 = vmax.f32 %v8234_v16, 0.0 }
 0x585   : > { %v8244_v22 = vadd.f32 %v2785_v19, %v2599_v13  ;;  %v2700_v59 = vpop.f32.mrf.mxu0  ;;  %v2808_v58 = vmax.f32 %v8238_v6, 0.0 }
 0x586   : > { %v9022_v31 = vmax.f32 %v8241_v46, 0.0  ;;  %v8248_v34 = vadd.f32 %v2700_v59, %v2604_v39  ;;  %v2789_v9 = vpop.f32.mrf.mxu1 }
 0x587   : > { %v9012_v42 = vmax.f32 %v8244_v22, 0.0  ;;  %v8252_v41 = vadd.f32 %v2789_v9, %v2604_v39  ;;  %v2702_v27 = vpop.f32.mrf.mxu0  ;;  %v2614_v9 = vpop.permute.xlu0 %2613  ;;  %v9099_v28 = vmax.f32 %v8244_v22, 0.0 }
 0x588   : > { %v6139_v21 = vpack.i.bf16 %v9022_v31, %v9015_v63  ;;  %v8258_v14 = vadd.f32 %v2702_v27, %v2604_v39  ;;  %v2791_v61 = vpop.f32.mrf.mxu1  ;;  %v9013_v51 = vmax.f32 %v8248_v34, 0.0 }
 0x589   : > { %v6144_v1 = vpack.i.bf16 %v9012_v42, %v2808_v58  ;;  %v8264_v43 = vadd.f32 %v2791_v61, %v2604_v39  ;;  %v2706_v4 = vpop.f32.mrf.mxu0  ;;  %v9016_v12 = vmax.f32 %v8252_v41, 0.0 }
 0x58a   : > { %v9014_v13 = vmax.f32 %v8258_v14, 0.0  ;;  %v8268_v10 = vadd.f32 %v2706_v4, %v2609_v29  ;;  %6140 = vrot.lane.b32.xlu1 %v6139_v21, %s6459_s8  ;;  %v2795_v54 = vpop.f32.mrf.mxu1  ;;  %v9100_v22 = vmax.f32 %v8258_v14, 0.0 }
 0x58b   : > { %v9017_v32 = vmax.f32 %v8264_v43, 0.0  ;;  %v8273_v30 = vadd.f32 %v2795_v54, %v2609_v29  ;;  %v2708_v37 = vpop.f32.mrf.mxu0  ;;  %6145 = vrot.lane.b32.xlu0 %v6144_v1, %s6459_s8 }
 0x58c   : > { %v6149_v19 = vpack.i.bf16 %v9014_v13, %v9013_v51  ;;  %v8280_v39 = vadd.f32 %v2708_v37, %v2609_v29  ;;  %v2797_v59 = vpop.f32.mrf.mxu1  ;;  %v9018_v4 = vmax.f32 %v8268_v10, 0.0 }
 0x58d   : > { %v6154_v27 = vpack.i.bf16 %v9017_v32, %v9016_v12  ;;  %v8286_v21 = vadd.f32 %v2797_v59, %v2609_v29  ;;  %v2712_v61 = vpop.f32.mrf.mxu0  ;;  %v9019_v37 = vmax.f32 %v8273_v30, 0.0 }
 0x58e   : > { %v9021_v1 = vmax.f32 %v8280_v39, 0.0  ;;  %v8290_v54 = vadd.f32 %v2712_v61, %v2614_v9  ;;  %v2801_v42 = vpop.f32.mrf.mxu1  ;;  %6150 = vrot.lane.b32.xlu1 %v6149_v19, %s6459_s8 }
 0x58f   : > { %v9020_v51 = vmax.f32 %v8286_v21, 0.0  ;;  %v8295_v13 = vadd.f32 %v2801_v42, %v2614_v9  ;;  %v2714_v63 = vpop.f32.mrf.mxu0  ;;  %6155 = vrot.lane.b32.xlu0 %v6154_v27, %s6459_s8 }
 0x590   : > { %v6159_v29 = vpack.i.bf16 %v9021_v1, %v9018_v4  ;;  %v8302_v59 = vadd.f32 %v2714_v63, %v2614_v9  ;;  %v2803_v61 = vpop.f32.mrf.mxu1  ;;  %v9023_v42 = vmax.f32 %v8290_v54, 0.0 }
 0x591   : > { %v6164_v19 = vpack.i.bf16 %v9020_v51, %v9019_v37  ;;  %v8308_v12 = vadd.f32 %v2803_v61, %v2614_v9  ;;  %v9025_v27 = vmax.f32 %v8295_v13, 0.0 }
 0x592   : > { %v9024_v32 = vmax.f32 %v8302_v59, 0.0  ;;  %6160 = vrot.lane.b32.xlu1 %v6159_v29, %s6459_s8 }
 0x593   : > { %v9026_v4 = vmax.f32 %v8308_v12, 0.0  ;;  %6165 = vrot.lane.b32.xlu0 %v6164_v19, %s6459_s8 }
 0x594   : > { %v6169_v63 = vpack.i.bf16 %v9024_v32, %v9023_v42 }
 0x595   : > { %v6174_v9 = vpack.i.bf16 %v9026_v4, %v9025_v27 }
 0x596   : > { %6170 = vrot.lane.b32.xlu1 %v6169_v63, %s6459_s8 }
 0x597   : > { %6175 = vrot.lane.b32.xlu0 %v6174_v9, %s6459_s8 }
 0x5fc   : > { %v6141_v29 = vpop.permute.xlu1 %6140 }
 0x5fd   : > { %v6143_v61 = vunpack.i.h.bf16 %v6141_v29  ;;  %v6142_v37 = vunpack.i.l.bf16 %v6141_v29  ;;  %v6146_v51 = vpop.permute.xlu0 %6145 }
 0x5fe   : > { %v6148_v1 = vunpack.i.h.bf16 %v6146_v51  ;;  %v6147_v19 = vunpack.i.l.bf16 %v6146_v51  ;;  %v9097_v51 = vmax.f32 %v8241_v46, 0.0 }
 0x5ff   : > { %v2862_v31 = vsel %vm600_vm0, %v6142_v37, %v6143_v61 }
 0x600   : > { %v2854_v42 = vsel %vm600_vm0, %v6147_v19, %v6148_v1  ;;  %v6151_v32 = vpop.permute.xlu1 %6150  ;;  %v2858_v27 = vsel %vm600_vm0, %v6143_v61, %v6147_v19  ;;  %v2866_v63 = vsel %vm600_vm0, %v6148_v1, %v6142_v37  ;;  %v2870_v17 = vmax.f32 %v9098_v55, %v2862_v31 }
 0x601   : > { %v2872_v9 = vmax.f32 %v2808_v58, %v2854_v42  ;;  %v6153_v29 = vunpack.i.h.bf16 %v6151_v32  ;;  %v6152_v4 = vunpack.i.l.bf16 %v6151_v32  ;;  %v6156_v60 = vpop.permute.xlu0 %6155  ;;  %v2871_v57 = vmax.f32 %v9097_v51, %v2858_v27 }
 0x602   : > { %v6158_v26 = vunpack.i.h.bf16 %v6156_v60  ;;  %v6157_v7 = vunpack.i.l.bf16 %v6156_v60  ;;  %v2873_v61 = vmax.f32 %v9099_v28, %v2866_v63  ;;  %v9105_v51 = vmax.f32 %v8286_v21, 0.0 }
 0x603   : > { %3078 = vmatprep.mubr.f32.mxu0 %v2871_v57  ;;  %v2863_v1 = vsel %vm600_vm0, %v6152_v4, %v6153_v29  ;;  %v9101_v57 = vmax.f32 %v8264_v43, 0.0 }
 0x604   : > { %3167 = vmatprep.mubr.f32.mxu1 %v2873_v61  ;;  %v6161_v6 = vpop.permute.xlu1 %6160  ;;  %3079 = vmatmul.mubr.f32.vlgmr.msra.gmra.mxu0 %v2870_v17  ;;  %v2859_v58 = vsel %vm600_vm0, %v6153_v29, %v6157_v7  ;;  %v2867_v46 = vsel %vm600_vm0, %v6158_v26, %v6152_v4  ;;  %v9102_v17 = vmax.f32 %v8248_v34, 0.0  ;;  %v2855_v27 = vsel %vm600_vm0, %v6157_v7, %v6158_v26 }
 0x605   : > { %v6163_v16 = vunpack.i.h.bf16 %v6161_v6  ;;  %v6162_v55 = vunpack.i.l.bf16 %v6161_v6  ;;  %3168 = vmatmul.mubr.f32.vlgmr.msra.gmra.mxu1 %v2872_v9  ;;  %v6166_v60 = vpop.permute.xlu0 %6165  ;;  %v2875_v28 = vmax.f32 %v9100_v22, %v2859_v58  ;;  %v2877_v31 = vmax.f32 %v9101_v57, %v2867_v46 }
 0x606   : > { %v6168_v32 = vunpack.i.h.bf16 %v6166_v60  ;;  %v6167_v37 = vunpack.i.l.bf16 %v6166_v60  ;;  %v2874_v42 = vmax.f32 %v9102_v17, %v2863_v1  ;;  %5364 = vmatpush3.msra.mxu1 %v8141_v11  ;;  %v9103_v4 = vmax.f32 %v8252_v41, 0.0 }
 0x607   : > { %3084 = vmatprep.mubr.f32.mxu0 %v2875_v28  ;;  %3173 = vmatprep.mubr.f32.mxu1 %v2877_v31  ;;  %v2864_v14 = vsel %vm600_vm0, %v6162_v55, %v6163_v16  ;;  %v9104_v41 = vmax.f32 %v8280_v39, 0.0  ;;  %v9106_v58 = vmax.f32 %v8268_v10, 0.0  ;;  %v9110_v28 = vmax.f32 %v8295_v13, 0.0 }
 0x608   : > { %v2876_v19 = vmax.f32 %v9103_v4, %v2855_v27  ;;  %v6171_v43 = vpop.permute.xlu1 %6170  ;;  %3085 = vmatmul.mubr.f32.gmra.mxu0 %v2874_v42  ;;  %v2860_v63 = vsel %vm600_vm0, %v6163_v16, %v6167_v37  ;;  %v2868_v34 = vsel %vm600_vm0, %v6168_v32, %v6162_v55  ;;  %v2856_v7 = vsel %vm600_vm0, %v6167_v37, %v6168_v32  ;;  %v5176_v4 = vld [vmem:[%s8972_s2 + $0x40] sm:$0xff] }
 0x609   : > { %v6173_v11 = vunpack.i.h.bf16 %v6171_v43  ;;  %v6172_v26 = vunpack.i.l.bf16 %v6171_v43  ;;  %v6176_v9 = vpop.permute.xlu0 %6175  ;;  %v2879_v29 = vmax.f32 %v9104_v41, %v2860_v63  ;;  %v2881_v61 = vmax.f32 %v9105_v51, %v2868_v34  ;;  %5365 = vmatprep.subr.mxu1 %v8191_v2  ;;  %v5179_v43 = vld [vmem:[%s8972_s2 + $0x58] sm:$0xff]  ;;  %v9118_v34 = vld [vmem:[#allocation16_spill] sm:$0xff] }
 0x60a   : > { %3174 = vmatmul.mubr.f32.gmra.mxu1 %v2876_v19  ;;  %v6178_v1 = vunpack.i.h.bf16 %v6176_v9  ;;  %v6177_v6 = vunpack.i.l.bf16 %v6176_v9  ;;  %v2878_v46 = vmax.f32 %v9106_v58, %v2864_v14  ;;  %v9107_v16 = vmax.f32 %v8273_v30, 0.0  ;;  %v5177_v19 = vld [vmem:[%s8972_s2 + $0x48] sm:$0xff]  ;;  %v5178_v14 = vld [vmem:[%s8972_s2 + $0x50] sm:$0xff] }
 0x60b   : > { %5366 = vmatpush3.msra.mxu1 %v8144_v44  ;;  %3090 = vmatprep.mubr.f32.mxu0 %v2879_v29  ;;  %v2865_v39 = vsel %vm600_vm0, %v6172_v26, %v6173_v11  ;;  %v9108_v30 = vmax.f32 %v8302_v59, 0.0  ;;  %v9109_v44 = vmax.f32 %v8308_v12, 0.0  ;;  %v9111_v31 = vmax.f32 %v8290_v54, 0.0 }
 0x60c   : > { %v2880_v55 = vmax.f32 %v9107_v16, %v2856_v7  ;;  %3179 = vmatprep.mubr.f32.mxu1 %v2881_v61  ;;  %3091 = vmatmul.mubr.f32.gmra.mxu0 %v2878_v46  ;;  %v2861_v21 = vsel %vm600_vm0, %v6173_v11, %v6177_v6  ;;  %v2869_v2 = vsel %vm600_vm0, %v6178_v1, %v6172_v26  ;;  %v3193_v7 = vand.u32 127, %v9118_v34 }
 0x60d   : > { %v2857_v10 = vsel %vm600_vm0, %v6177_v6, %v6178_v1  ;;  %v2883_v60 = vmax.f32 %v9108_v30, %v2861_v21  ;;  %v2885_v22 = vmax.f32 %v9109_v44, %v2869_v2  ;;  %5367 = vmatprep.subr.mxu1 %v8194_v47  ;;  %v2882_v32 = vmax.f32 %v9111_v31, %v2865_v39 }
 0x60e   : > { %3180 = vmatmul.mubr.f32.gmra.mxu1 %v2880_v55  ;;  %v2884_v57 = vmax.f32 %v9110_v28, %v2857_v10  ;;  %vm8463_vm11 = vcmp.ne.s32.totalorder %v3193_v7, 127  ;;  %vm8502_vm13 = vcmp.ne.s32.totalorder %v3193_v7, 0 }
 0x60f   : > { %5368 = vmatpush3.msra.mxu1 %v8146_v20  ;;  %3096 = vmatprep.mubr.f32.mxu0 %v2883_v60  ;;  %v9112_v20 = vld [vmem:[#allocation20_spill] sm:$0xff] }
 0x610   : > { %3185 = vmatprep.mubr.f32.mxu1 %v2885_v22  ;;  %3097 = vmatmul.mubr.f32.gmra.mxu0 %v2882_v32 }
 0x611   : > { %5369 = vmatprep.subr.mxu1 %v8197_v24  ;;  %3368 = vmatprep.mubr.f32.mxu0 %v9081_v45 }
 0x612   : > { %3186 = vmatmul.mubr.f32.gmra.mxu1 %v2884_v57 }
 0x613   : > { %5370 = vmatpush3.msra.mxu1 %v8149_v38  ;;  %v9113_v38 = vld [vmem:[#allocation17_spill] sm:$0xff] }
 0x614   : > { %5371 = vmatprep.subr.mxu1 %v8200_v50 }
 0x615   : > { %5372 = vmatpush3.msra.mxu1 %v8152_v48  ;;  %v9114_v48 = vld [vmem:[#allocation21_spill] sm:$0xff] }
 0x616   : > { %5373 = vmatprep.subr.mxu1 %v8203_v53 }
 0x617   : > { %5374 = vmatpush3.msra.mxu1 %v8155_v5  ;;  %v9115_v5 = vld [vmem:[#allocation18_spill] sm:$0xff] }
 0x618   : > { %5375 = vmatprep.subr.mxu1 %v8206_v18 }
 0x619   : > { %5376 = vmatpush3.msra.mxu1 %v8158_v8  ;;  %v9116_v8 = vld [vmem:[#allocation22_spill] sm:$0xff] }
 0x61a   : > { %5377 = vmatprep.subr.mxu1 %v8209_v62 }
 0x61b   : > { %5378 = vmatpush3.msra.mxu1 %v8161_v25  ;;  %v9117_v25 = vld [vmem:[#allocation19_spill] sm:$0xff] }
 0x61c   : > { %5379 = vmatprep.subr.mxu1 %v8212_v49 }
 0x61d   : > { %5380 = vmatpush3.msra.mxu1 %v8164_v36 }
 0x61e   : > { %5381 = vmatprep.subr.mxu1 %v8215_v56 }
 0x61f   : > { %5382 = vmatpush3.msra.mxu1 %v8167_v33 }
 0x620   : > { %5383 = vmatprep.subr.mxu1 %v8218_v3 }
 0x621   : > { %5384 = vmatpush3.msra.mxu1 %v8170_v52 }
 0x622   : > { %5385 = vmatprep.subr.mxu1 %v8221_v23 }
 0x623   : > { %5386 = vmatpush3.msra.mxu1 %v8173_v15 }
 0x624   : > { %5387 = vmatprep.subr.mxu1 %v8225_v0 }
 0x625   : > { %5388 = vmatpush3.msra.mxu1 %v8176_v40 }
 0x626   : > { %5389 = vmatprep.subr.mxu1 %v9112_v20 }
 0x627   : > { %5390 = vmatpush3.msra.mxu1 %v9113_v38 }
 0x628   : > { %5391 = vmatprep.subr.mxu1 %v9114_v48 }
 0x629   : > { %5392 = vmatpush3.msra.mxu1 %v9115_v5 }
 0x62a   : > { %5393 = vmatprep.subr.mxu1 %v9116_v8 }
 0x62b   : > { %5394 = vmatpush3.msra.mxu1 %v9117_v25 }
 0x6c4   : > { %v3080_v36 = vpop.f32.mrf.mxu0 }
 0x6c5   : > { %v3169_v33 = vpop.f32.mrf.mxu1 }
 0x6c6   : > { %v3082_v52 = vpop.f32.mrf.mxu0  ;;  %v8433_v42 = vadd.f32 %v3169_v33, %v3080_v36 }
 0x6c7   : > { %v3171_v15 = vpop.f32.mrf.mxu1 }
 0x6c8   : > { %v3086_v47 = vpop.f32.mrf.mxu0  ;;  %v3172_v27 = vadd.f32 %v3171_v15, %v3082_v52  ;;  %v3263_v52 = vld [vmem:[#allocation6 + $0x40] sm:$0xff]  ;;  %v3264_v15 = vld [vmem:[#allocation6 + $0x48] sm:$0xff] }
 0x6ca   : > { %v3175_v24 = vpop.f32.mrf.mxu1  ;;  %v3088_v50 = vpop.f32.mrf.mxu0 }
 0x6cb   : > { %v3176_v37 = vadd.f32 %v3175_v24, %v3086_v47  ;;  %v3265_v47 = vld [vmem:[#allocation6 + $0x50] sm:$0xff]  ;;  %v3266_v24 = vld [vmem:[#allocation6 + $0x58] sm:$0xff] }
 0x6cc   : > { %v3177_v40 = vpop.f32.mrf.mxu1  ;;  %v3092_v53 = vpop.f32.mrf.mxu0 }
 0x6cd   : > { %v3178_v17 = vadd.f32 %v3177_v40, %v3088_v50 }
 0x6ce   : > { %v3181_v18 = vpop.f32.mrf.mxu1  ;;  %v3094_v49 = vpop.f32.mrf.mxu0 }
 0x6cf   : > { %v8422_v62 = vadd.f32 %v3181_v18, %v3092_v53 }
 0x6d0   : > { %v3183_v56 = vpop.f32.mrf.mxu1  ;;  %v3098_v23 = vpop.f32.mrf.mxu0 }
 0x6d1   : > { %v8424_v3 = vadd.f32 %v3183_v56, %v3094_v49  ;;  %3234 = vrot.lane.b32.xlu1 %v8422_v62, %s6459_s8 }
 0x6d2   : > { %v3187_v0 = vpop.f32.mrf.mxu1  ;;  %v3100_v12 = vpop.f32.mrf.mxu0 }
 0x6d3   : > { %v3188_v13 = vadd.f32 %v3187_v0, %v3098_v23  ;;  %3242 = vrot.lane.b32.xlu0 %v8424_v3, %s6459_s8 }
 0x6d4   : > { %v3189_v54 = vpop.f32.mrf.mxu1 }
 0x6d5   : > { %v3190_v59 = vadd.f32 %v3189_v54, %v3100_v12  ;;  %3236 = vrot.lane.b32.xlu1 %v3188_v13, %s6459_s8 }
 0x6d7   : > { %3244 = vrot.lane.b32.xlu0 %v3190_v59, %s6459_s8 }
 0x6d9   : > { %3232 = vrot.lane.b32.xlu1 %v3176_v37, %s6459_s8 }
 0x6db   : > { %3240 = vrot.lane.b32.xlu0 %v3178_v17, %s6459_s8 }
 0x6dd   : > { %3230 = vrot.lane.b32.xlu1 %v8433_v42, %s6459_s8 }
 0x6df   : > { %3238 = vrot.lane.b32.xlu0 %v3172_v27, %s6459_s8 }
 0x6e1   : > { %3202 = vrot.lane.b32.xlu1 %v3188_v13, %s6460_s10 }
 0x6e3   : > { %3208 = vrot.lane.b32.xlu0 %v8424_v3, %s6460_s10 }
 0x6e5   : > { %3200 = vrot.lane.b32.xlu1 %v8422_v62, %s6460_s10 }
 0x6e7   : > { %3210 = vrot.lane.b32.xlu0 %v3190_v59, %s6460_s10 }
 0x6e9   : > { %3198 = vrot.lane.b32.xlu1 %v3176_v37, %s6460_s10 }
 0x6eb   : > { %3206 = vrot.lane.b32.xlu0 %v3178_v17, %s6460_s10 }
 0x6ed   : > { %3196 = vrot.lane.b32.xlu1 %v8433_v42, %s6460_s10 }
 0x6ef   : > { %3204 = vrot.lane.b32.xlu0 %v3172_v27, %s6460_s10 }
 0x6f1   : > { %3274 = vperm.xlu1 %6068, %v5176_v4  }
 0x6f3   : > { %3279 = vperm.xlu0 %6067, %v5177_v19  }
 0x6f5   : > { %3284 = vperm.xlu1 %6068, %v5178_v14  }
 0x6f7   : > { %3289 = vperm.xlu0 %6067, %v5179_v43  }
 0x743   : > { %v3235_v63 = vpop.permute.xlu1 %3234 }
 0x745   : > { %v3243_v11 = vpop.permute.xlu0 %3242 }
 0x746   : > { %v3252_v1 = vsel %vm600_vm0, %v3243_v11, %v3235_v63  ;;  %v3248_v6 = vsel %vm600_vm0, %v3235_v63, %v3243_v11 }
 0x747   : > { %v3237_v26 = vpop.permute.xlu1 %3236 }
 0x749   : > { %v3245_v41 = vpop.permute.xlu0 %3244 }
 0x74a   : > { %v3249_v29 = vsel %vm600_vm0, %v3237_v26, %v3245_v41  ;;  %v3253_v51 = vsel %vm600_vm0, %v3245_v41, %v3237_v26 }
 0x74b   : > { %5181 = vmatprep.subr.msk.mxu0 %vm8463_vm11, %v3253_v51  ;;  %v3233_v61 = vpop.permute.xlu1 %3232 }
 0x74c   : > { %5183 = vmatpush1.msk.msra.mxu0 %vm5350_vm12, %v3249_v29 }
 0x74d   : > { %5185 = vmatprep.subr.msk.mxu0 %vm8463_vm11, %v3252_v1  ;;  %v3241_v58 = vpop.permute.xlu0 %3240 }
 0x74e   : > { %v3247_v46 = vsel %vm600_vm0, %v3233_v61, %v3241_v58  ;;  %v3251_v16 = vsel %vm600_vm0, %v3241_v58, %v3233_v61  ;;  %5187 = vmatpush1.msk.msra.mxu0 %vm5350_vm12, %v3248_v6 }
 0x74f   : > { %5189 = vmatprep.subr.msk.mxu0 %vm8463_vm11, %v3251_v16  ;;  %v3231_v55 = vpop.permute.xlu1 %3230 }
 0x750   : > { %5191 = vmatpush1.msk.msra.mxu0 %vm5350_vm12, %v3247_v46 }
 0x751   : > { %v3239_v39 = vpop.permute.xlu0 %3238 }
 0x752   : > { %v3246_v21 = vsel %vm600_vm0, %v3231_v55, %v3239_v39  ;;  %v3250_v2 = vsel %vm600_vm0, %v3239_v39, %v3231_v55 }
 0x753   : > { %5193 = vmatprep.subr.msk.mxu0 %vm8463_vm11, %v3250_v2  ;;  %v3203_v10 = vpop.permute.xlu1 %3202 }
 0x754   : > { %5195 = vmatpush1.msk.msra.mxu0 %vm5350_vm12, %v3246_v21 }
 0x755   : > { %v3209_v30 = vpop.permute.xlu0 %3208  ;;  %3320 = vmatprep.subr.mxu0 %v3190_v59 }
 0x756   : > { %3321 = vmatpush1.msra.mxu0 %v3188_v13 }
 0x757   : > { %3322 = vmatprep.subr.mxu0 %v8424_v3  ;;  %v3201_v60 = vpop.permute.xlu1 %3200 }
 0x758   : > { %3323 = vmatpush1.msra.mxu0 %v8422_v62  ;;  %v3214_v20 = vsel %vm463_vm1, %v3201_v60, %v3209_v30  ;;  %v3218_v38 = vsel %vm463_vm1, %v3209_v30, %v3201_v60 }
 0x759   : > { %v3211_v44 = vpop.permute.xlu0 %3210  ;;  %3324 = vmatprep.subr.mxu0 %v3178_v17 }
 0x75a   : > { %3325 = vmatpush1.msra.mxu0 %v3176_v37  ;;  %v3215_v57 = vsel %vm463_vm1, %v3203_v10, %v3211_v44  ;;  %v3219_v31 = vsel %vm463_vm1, %v3211_v44, %v3203_v10 }
 0x75b   : > { %3326 = vmatprep.subr.mxu0 %v3172_v27  ;;  %v3199_v28 = vpop.permute.xlu1 %3198 }
 0x75c   : > { %3327 = vmatpush1.msra.mxu0 %v8433_v42 }
 0x75d   : > { %v3207_v32 = vpop.permute.xlu0 %3206  ;;  %5197 = vmatprep.subr.msk.mxu0 %vm8502_vm13, %v3215_v57 }
 0x75e   : > { %5199 = vmatpush1.msk.msra.mxu0 %vm5352_vm14, %v3219_v31  ;;  %v3213_v48 = vsel %vm463_vm1, %v3199_v28, %v3207_v32  ;;  %v3217_v5 = vsel %vm463_vm1, %v3207_v32, %v3199_v28 }
 0x75f   : > { %5201 = vmatprep.subr.msk.mxu0 %vm8502_vm13, %v3214_v20  ;;  %v3197_v8 = vpop.permute.xlu1 %3196 }
 0x760   : > { %5203 = vmatpush1.msk.msra.mxu0 %vm5352_vm14, %v3218_v38 }
 0x761   : > { %v3205_v25 = vpop.permute.xlu0 %3204  ;;  %5205 = vmatprep.subr.msk.mxu0 %vm8502_vm13, %v3213_v48 }
 0x762   : > { %v3212_v36 = vsel %vm463_vm1, %v3197_v8, %v3205_v25  ;;  %v3216_v33 = vsel %vm463_vm1, %v3205_v25, %v3197_v8  ;;  %5207 = vmatpush1.msk.msra.mxu0 %vm5352_vm14, %v3217_v5 }
 0x763   : > { %5209 = vmatprep.subr.msk.mxu0 %vm8502_vm13, %v3212_v36 }
 0x764   : > { %5211 = vmatpush1.msk.msra.mxu0 %vm5352_vm14, %v3216_v33 }
 0x765   : > { %5212 = vmatmul.mubr.msk.f32.vlgmr.msra.gmra.mxu0 %vm693_vm4, %v3263_v52 }
 0x766   : > { %3374 = vmatprep.mubr.f32.mxu0 %v9081_v45 }
 0x769   : > { %5213 = vmatmul.mubr.msk.f32.gmra.mxu0 %vm693_vm4, %v3264_v15 }
 0x76a   : > { %3380 = vmatprep.mubr.f32.mxu0 %v9081_v45 }
 0x76c   : > { %v3275_v50 = vpop.permute.xlu1 %3274 }
 0x76d   : > { %5214 = vmatmul.mubr.msk.f32.gmra.mxu0 %vm693_vm4, %v3265_v47 }
 0x76e   : > { %3386 = vmatprep.mubr.f32.mxu0 %v9081_v45  ;;  %v3280_v49 = vpop.permute.xlu0 %3279 }
 0x770   : > { %v3285_v59 = vpop.permute.xlu1 %3284 }
 0x771   : > { %5215 = vmatmul.mubr.msk.f32.gmra.mxu0 %vm693_vm4, %v3266_v24 }
 0x772   : > { %v3290_v43 = vpop.permute.xlu0 %3289 }
 0x825   : > { %v3370_v40 = vpop.f32.mrf.mxu0 }
 0x826   : > { %v3371_v53 = vadd.f32 %v3370_v40, %v3275_v50 }
 0x827   : > { %v3372_v18 = vpop.f32.mrf.mxu0 }
 0x828   : > { %v3373_v62 = vadd.f32 %v3372_v18, %v3275_v50  ;;  %v3393_v3 = vmax.f32 %v3371_v53, 0.0 }
 0x829   : > { %v3376_v56 = vpop.f32.mrf.mxu0 }
 0x82a   : > { %v3394_v23 = vmax.f32 %v3373_v62, 0.0  ;;  %v3377_v0 = vadd.f32 %v3376_v56, %v3280_v49 }
 0x82b   : > { %v3378_v13 = vpop.f32.mrf.mxu0 }
 0x82c   : > { %v6179_v12 = vpack.i.bf16 %v3394_v23, %v3393_v3  ;;  %v3379_v54 = vadd.f32 %v3378_v13, %v3280_v49  ;;  %v3395_v17 = vmax.f32 %v3377_v0, 0.0  ;;  %v5217_v13 = vld [vmem:[%s8972_s2 + $0x68] sm:$0xff] }
 0x82d   : > { %v3382_v37 = vpop.f32.mrf.mxu0 }
 0x82e   : > { %v3396_v42 = vmax.f32 %v3379_v54, 0.0  ;;  %v3383_v27 = vadd.f32 %v3382_v37, %v3285_v59  ;;  %6180 = vrot.lane.b32.xlu1 %v6179_v12, %s6459_s8  ;;  %v3578_v12 = vld [vmem:[#allocation6 + $0x60] sm:$0xff]  ;;  %v5218_v37 = vld [vmem:[%s8972_s2 + $0x70] sm:$0xff] }
 0x82f   : > { %v3384_v4 = vpop.f32.mrf.mxu0  ;;  %5628 = vmatprep.mubr.msk.f32.mxu0 %vm693_vm4, %v3578_v12  ;;  %v5216_v54 = vld [vmem:[%s8972_s2 + $0x60] sm:$0xff] }
 0x830   : > { %v6184_v19 = vpack.i.bf16 %v3396_v42, %v3395_v17  ;;  %v3385_v14 = vadd.f32 %v3384_v4, %v3285_v59  ;;  %v3397_v34 = vmax.f32 %v3383_v27, 0.0  ;;  %v5219_v59 = vld [vmem:[%s8972_s2 + $0x78] sm:$0xff] }
 0x831   : > { %v3388_v63 = vpop.f32.mrf.mxu0 }
 0x832   : > { %v3398_v7 = vmax.f32 %v3385_v14, 0.0  ;;  %v3389_v11 = vadd.f32 %v3388_v63, %v3290_v43  ;;  %6185 = vrot.lane.b32.xlu0 %v6184_v19, %s6459_s8 }
 0x833   : > { %v3390_v26 = vpop.f32.mrf.mxu0 }
 0x834   : > { %v6189_v9 = vpack.i.bf16 %v3398_v7, %v3397_v34  ;;  %v3391_v41 = vadd.f32 %v3390_v26, %v3290_v43  ;;  %v3399_v29 = vmax.f32 %v3389_v11, 0.0  ;;  %v3580_v11 = vld [vmem:[#allocation6 + $0x70] sm:$0xff]  ;;  %v3581_v26 = vld [vmem:[#allocation6 + $0x78] sm:$0xff] }
 0x836   : > { %v3400_v51 = vmax.f32 %v3391_v41, 0.0  ;;  %6190 = vrot.lane.b32.xlu1 %v6189_v9, %s6459_s8  ;;  %v8592_v9 = vld [vmem:[#allocation8 + $0x1e0] sm:$0xff] }
 0x837   : > { %v8594_v41 = vld [vmem:[#allocation8 + $0x1c0] sm:$0xff]  ;;  %5634 = vmatprep.subr.mxu1 %v8592_v9 }
 0x838   : > { %v6194_v61 = vpack.i.bf16 %v3400_v51, %v3399_v29 }
 0x83a   : > { %6195 = vrot.lane.b32.xlu0 %v6194_v61, %s6459_s8  ;;  %v8606_v61 = vld [vmem:[#allocation8 + $0x160] sm:$0xff] }
 0x8a0   : > { %v6181_v1 = vpop.permute.xlu1 %6180 }
 0x8a1   : > { %v6183_v6 = vunpack.i.h.bf16 %v6181_v1  ;;  %v6182_v58 = vunpack.i.l.bf16 %v6181_v1  ;;  %v8610_v1 = vld [vmem:[#allocation8 + $0x140] sm:$0xff] }
 0x8a3   : > { %v3417_v46 = vsel %vm600_vm0, %v6182_v58, %v6183_v6  ;;  %v3421_v16 = vsel %vm600_vm0, %v6183_v6, %v6182_v58  ;;  %v8614_v6 = vld [vmem:[#allocation8 + $0x120] sm:$0xff] }
 0x8a4   : > { %v3425_v55 = vmax.f32 %v3393_v3, %v3417_v46  ;;  %v6186_v39 = vpop.permute.xlu0 %6185  ;;  %v3426_v21 = vmax.f32 %v3394_v23, %v3421_v16  ;;  %v8618_v58 = vld [vmem:[#allocation8 + $0x100] sm:$0xff] }
 0x8a5   : > { %v6188_v2 = vunpack.i.h.bf16 %v6186_v39  ;;  %v6187_v10 = vunpack.i.l.bf16 %v6186_v39  ;;  %v8622_v46 = vld [vmem:[#allocation8 + $0xe0] sm:$0xff] }
 0x8a6   : > { %3529 = vmatprep.mubr.f32.mxu1 %v3426_v21  ;;  %v8626_v16 = vld [vmem:[#allocation8 + $0xc0] sm:$0xff] }
 0x8a7   : > { %3530 = vmatmul.mubr.f32.vlgmr.msra.gmra.mxu1 %v3425_v55  ;;  %v3422_v30 = vsel %vm600_vm0, %v6188_v2, %v6187_v10  ;;  %v3418_v60 = vsel %vm600_vm0, %v6187_v10, %v6188_v2  ;;  %v8630_v55 = vld [vmem:[#allocation8 + $0xa0] sm:$0xff] }
 0x8a8   : > { %v6191_v44 = vpop.permute.xlu1 %6190  ;;  %v3428_v22 = vmax.f32 %v3396_v42, %v3422_v30  ;;  %v3427_v28 = vmax.f32 %v3395_v17, %v3418_v60  ;;  %v3550_v17 = vand.u32 63, %v6882_v35  ;;  %5635 = vmatpush3.msra.mxu1 %v8592_v9  ;;  %v8634_v39 = vld [vmem:[#allocation8 + $0x80] sm:$0xff] }
 0x8a9   : > { %v6193_v57 = vunpack.i.h.bf16 %v6191_v44  ;;  %v6192_v31 = vunpack.i.l.bf16 %v6191_v44  ;;  %5636 = vmatprep.subr.mxu1 %v8594_v41  ;;  %v8638_v21 = vld [vmem:[#allocation8 + $0x60] sm:$0xff] }
 0x8aa   : > { %3534 = vmatprep.mubr.f32.mxu1 %v3428_v22  ;;  %vm5353_vm15 = vcmp.ne.s32.totalorder %v3550_v17, 63  ;;  %5637 = vmatpush3.msra.mxu1 %v8594_v41  ;;  %v8642_v2 = vld [vmem:[#allocation8 + $0x40] sm:$0xff] }
 0x8ab   : > { %3535 = vmatmul.mubr.f32.gmra.mxu1 %v3427_v28  ;;  %v3423_v32 = vsel %vm600_vm0, %v6193_v57, %v6192_v31  ;;  %v3419_v20 = vsel %vm600_vm0, %v6192_v31, %v6193_v57  ;;  %v8648_v10 = vld [vmem:[#allocation8 + $0x20] sm:$0xff] }
 0x8ac   : > { %v6196_v38 = vpop.permute.xlu0 %6195  ;;  %v3430_v48 = vmax.f32 %v3398_v7, %v3423_v32  ;;  %v3429_v5 = vmax.f32 %v3397_v34, %v3419_v20  ;;  %v3579_v7 = vld [vmem:[#allocation6 + $0x68] sm:$0xff]  ;;  %v8651_v60 = vld [vmem:[#allocation8] sm:$0xff] }
 0x8ad   : > { %v6198_v8 = vunpack.i.h.bf16 %v6196_v38  ;;  %v6197_v25 = vunpack.i.l.bf16 %v6196_v38 }
 0x8ae   : > { %3539 = vmatprep.mubr.f32.mxu1 %v3430_v48 }
 0x8af   : > { %3540 = vmatmul.mubr.f32.gmra.mxu1 %v3429_v5  ;;  %v3424_v36 = vsel %vm600_vm0, %v6198_v8, %v6197_v25  ;;  %v3420_v33 = vsel %vm600_vm0, %v6197_v25, %v6198_v8  ;;  %vm5354_vm0 = vcmp.ne.s32.totalorder %v3550_v17, 0  ;;  %v5241_v17 = vld [vmem:[%s8972_s2 + $0x88] sm:$0xff] }
 0x8b0   : > { %v3432_v52 = vmax.f32 %v3400_v51, %v3424_v36  ;;  %v3431_v15 = vmax.f32 %v3399_v29, %v3420_v33  ;;  %v8598_v29 = vld [vmem:[#allocation8 + $0x1a0] sm:$0xff] }
 0x8b1   : > { %v8602_v51 = vld [vmem:[#allocation8 + $0x180] sm:$0xff]  ;;  %5638 = vmatprep.subr.mxu1 %v8598_v29 }
 0x8b2   : > { %3544 = vmatprep.mubr.f32.mxu1 %v3432_v52  ;;  %5639 = vmatpush3.msra.mxu1 %v8598_v29 }
 0x8b3   : > { %3545 = vmatmul.mubr.f32.gmra.mxu1 %v3431_v15  ;;  %5640 = vmatprep.subr.mxu1 %v8602_v51 }
 0x8b4   : > { %5641 = vmatpush3.msra.mxu1 %v8602_v51 }
 0x8b5   : > { %5642 = vmatprep.subr.mxu1 %v8606_v61 }
 0x8b6   : > { %5643 = vmatpush3.msra.mxu1 %v8606_v61 }
 0x8b7   : > { %5644 = vmatprep.subr.mxu1 %v8610_v1 }
 0x8b8   : > { %5645 = vmatpush3.msra.mxu1 %v8610_v1 }
 0x8b9   : > { %5646 = vmatprep.subr.mxu1 %v8614_v6 }
 0x8ba   : > { %5647 = vmatpush3.msra.mxu1 %v8614_v6 }
 0x8bb   : > { %5648 = vmatprep.subr.mxu1 %v8618_v58 }
 0x8bc   : > { %5649 = vmatpush3.msra.mxu1 %v8618_v58 }
 0x8bd   : > { %5650 = vmatprep.subr.mxu1 %v8622_v46 }
 0x8be   : > { %5651 = vmatpush3.msra.mxu1 %v8622_v46 }
 0x8bf   : > { %5652 = vmatprep.subr.mxu1 %v8626_v16 }
 0x8c0   : > { %5653 = vmatpush3.msra.mxu1 %v8626_v16 }
 0x8c1   : > { %5654 = vmatprep.subr.mxu1 %v8630_v55 }
 0x8c2   : > { %5655 = vmatpush3.msra.mxu1 %v8630_v55 }
 0x8c3   : > { %5656 = vmatprep.subr.mxu1 %v8634_v39 }
 0x8c4   : > { %5657 = vmatpush3.msra.mxu1 %v8634_v39 }
 0x8c5   : > { %5658 = vmatprep.subr.mxu1 %v8638_v21 }
 0x8c6   : > { %5659 = vmatpush3.msra.mxu1 %v8638_v21 }
 0x8c7   : > { %5660 = vmatprep.subr.mxu1 %v8642_v2 }
 0x8c8   : > { %5661 = vmatpush3.msra.mxu1 %v8642_v2 }
 0x8c9   : > { %5662 = vmatprep.subr.mxu1 %v8648_v10 }
 0x8ca   : > { %5663 = vmatpush3.msra.mxu1 %v8648_v10 }
 0x8cb   : > { %5664 = vmatprep.subr.mxu1 %v8651_v60 }
 0x8cc   : > { %5665 = vmatpush3.msra.mxu1 %v8651_v60 }
 0x8cd   : > { %5702 = vmatprep.subr.mxu1 %v8592_v9 }
 0x967   : > { %v5395_v47 = vpop.f32.mrf.mxu1 }
 0x969   : > { %v5396_v24 = vpop.f32.mrf.mxu1 }
 0x96a   : > { %v5397_v3 = vadd.f32 %v5396_v24, %v5395_v47 }
 0x96b   : > { %v5398_v50 = vpop.f32.mrf.mxu1 }
 0x96d   : > { %v5399_v40 = vpop.f32.mrf.mxu1 }
 0x96e   : > { %v5400_v0 = vadd.f32 %v5399_v40, %v5398_v50 }
 0x96f   : > { %v5401_v53 = vpop.f32.mrf.mxu1 }
 0x971   : > { %v5402_v18 = vpop.f32.mrf.mxu1 }
 0x972   : > { %v5403_v62 = vadd.f32 %v5402_v18, %v5401_v53 }
 0x973   : > { %v5404_v49 = vpop.f32.mrf.mxu1 }
 0x974   : > { %3569 = vrot.lane.b32.xlu0 %v5403_v62, %s6459_s8 }
 0x975   : > { %v5405_v56 = vpop.f32.mrf.mxu1 }
 0x976   : > { %v5406_v23 = vadd.f32 %v5405_v56, %v5404_v49 }
 0x978   : > { %3571 = vrot.lane.b32.xlu1 %v5406_v23, %s6459_s8  ;;  %3565 = vrot.lane.b32.xlu0 %v5397_v3, %s6459_s8 }
 0x97c   : > { %3567 = vrot.lane.b32.xlu1 %v5400_v0, %s6459_s8  ;;  %3556 = vrot.lane.b32.xlu0 %v5403_v62, %s6460_s10 }
 0x980   : > { %3558 = vrot.lane.b32.xlu1 %v5406_v23, %s6460_s10  ;;  %3552 = vrot.lane.b32.xlu0 %v5397_v3, %s6460_s10 }
 0x984   : > { %3554 = vrot.lane.b32.xlu1 %v5400_v0, %s6460_s10  ;;  %3594 = vperm.xlu0 %6067, %v5217_v13  }
 0x988   : > { %3589 = vperm.xlu1 %6068, %v5216_v54   ;;  %3604 = vperm.xlu0 %6067, %v5219_v59   ;;  %v3849_v59 = vld [vmem:[#allocation6 + $0x80] sm:$0xff] }
 0x98c   : > { %3599 = vperm.xlu1 %6068, %v5218_v37   ;;  %v5240_v37 = vld [vmem:[%s8972_s2 + $0x80] sm:$0xff] }
 0x9e6   : > { %v3570_v42 = vpop.permute.xlu0 %3569 }
 0x9ea   : > { %v3572_v27 = vpop.permute.xlu1 %3571  ;;  %v3566_v19 = vpop.permute.xlu0 %3565 }
 0x9eb   : > { %5604 = vmatprep.subr.msk.mxu0 %vm5353_vm15, %v3572_v27 }
 0x9ec   : > { %5605 = vmatpush3.msk.msra.mxu0 %vm5353_vm15, %v3572_v27  ;;  %v5243_v27 = vld [vmem:[%s8972_s2 + $0x98] sm:$0xff] }
 0x9ed   : > { %5606 = vmatprep.subr.msk.mxu0 %vm5353_vm15, %v3570_v42 }
 0x9ee   : > { %5607 = vmatpush3.msk.msra.mxu0 %vm5353_vm15, %v3570_v42  ;;  %v3568_v4 = vpop.permute.xlu1 %3567  ;;  %v3557_v43 = vpop.permute.xlu0 %3556  ;;  %v5242_v42 = vld [vmem:[%s8972_s2 + $0x90] sm:$0xff] }
 0x9ef   : > { %5608 = vmatprep.subr.msk.mxu0 %vm5353_vm15, %v3568_v4 }
 0x9f0   : > { %5609 = vmatpush3.msk.msra.mxu0 %vm5353_vm15, %v3568_v4  ;;  %v3821_v4 = vand.u32 31, %v6882_v35 }
 0x9f1   : > { %5610 = vmatprep.subr.msk.mxu0 %vm5353_vm15, %v3566_v19 }
 0x9f2   : > { %5611 = vmatpush3.msk.msra.mxu0 %vm5353_vm15, %v3566_v19  ;;  %v3559_v14 = vpop.permute.xlu1 %3558  ;;  %v3553_v34 = vpop.permute.xlu0 %3552  ;;  %vm5355_vm1 = vcmp.ne.s32.totalorder %v3821_v4, 31  ;;  %vm5356_vm2 = vcmp.ne.s32.totalorder %v3821_v4, 0  ;;  %v5265_v4 = vld [vmem:[%s8972_s2 + $0xa8] sm:$0xff] }
 0x9f3   : > { %5612 = vmatprep.subr.mxu0 %v5406_v23 }
 0x9f4   : > { %5613 = vmatpush3.msra.mxu0 %v5406_v23 }
 0x9f5   : > { %5614 = vmatprep.subr.mxu0 %v5403_v62 }
 0x9f6   : > { %5615 = vmatpush3.msra.mxu0 %v5403_v62  ;;  %v3555_v63 = vpop.permute.xlu1 %3554 }
 0x9f7   : > { %5616 = vmatprep.subr.mxu0 %v5400_v0 }
 0x9f8   : > { %5617 = vmatpush3.msra.mxu0 %v5400_v0 }
 0x9f9   : > { %5618 = vmatprep.subr.mxu0 %v5397_v3 }
 0x9fa   : > { %5619 = vmatpush3.msra.mxu0 %v5397_v3 }
 0x9fb   : > { %5620 = vmatprep.subr.msk.mxu0 %vm5354_vm0, %v3559_v14 }
 0x9fc   : > { %5621 = vmatpush3.msk.msra.mxu0 %vm5354_vm0, %v3559_v14 }
 0x9fd   : > { %5622 = vmatprep.subr.msk.mxu0 %vm5354_vm0, %v3557_v43 }
 0x9fe   : > { %5623 = vmatpush3.msk.msra.mxu0 %vm5354_vm0, %v3557_v43 }
 0x9ff   : > { %5624 = vmatprep.subr.msk.mxu0 %vm5354_vm0, %v3555_v63  ;;  %v3595_v30 = vpop.permute.xlu0 %3594 }
 0xa00   : > { %5625 = vmatpush3.msk.msra.mxu0 %vm5354_vm0, %v3555_v63 }
 0xa01   : > { %5626 = vmatprep.subr.msk.mxu0 %vm5354_vm0, %v3553_v34 }
 0xa02   : > { %5627 = vmatpush3.msk.msra.mxu0 %vm5354_vm0, %v3553_v34 }
 0xa03   : > { %5629 = vmatmul.mubr.msk.f32.vlgmr.msra.gmra.mxu0 %vm693_vm4, %v3579_v7  ;;  %v3590_v44 = vpop.permute.xlu1 %3589  ;;  %v3605_v32 = vpop.permute.xlu0 %3604 }
 0xa04   : > { %5631 = vmatprep.mubr.msk.f32.mxu0 %vm693_vm4, %v3580_v11 }
 0xa07   : > { %5632 = vmatmul.mubr.msk.f32.gmra.mxu0 %vm693_vm4, %v3581_v26  ;;  %v3600_v8 = vpop.permute.xlu1 %3599 }
 0xa08   : > { %5696 = vmatprep.mubr.msk.f32.mxu0 %vm693_vm4, %v3849_v59 }
 0xac3   : > { %v5630_v22 = vpop.f32.mrf.mxu0 }
 0xac4   : > { %v3691_v28 = vadd.f32 %v5630_v22, %v3595_v30  ;;  %v3850_v30 = vld [vmem:[#allocation6 + $0x88] sm:$0xff]  ;;  %v3852_v22 = vld [vmem:[#allocation6 + $0x98] sm:$0xff] }
 0xac5   : > { %v3685_v57 = vpop.f32.mrf.mxu0 }
 0xac6   : > { %v3686_v31 = vadd.f32 %v3685_v57, %v3590_v44  ;;  %v3705_v38 = vmax.f32 %v3691_v28, 0.0  ;;  %v3851_v44 = vld [vmem:[#allocation6 + $0x90] sm:$0xff] }
 0xac7   : > { %v5633_v20 = vpop.f32.mrf.mxu0 }
 0xac8   : > { %v3704_v48 = vmax.f32 %v3686_v31, 0.0  ;;  %v3701_v5 = vadd.f32 %v5633_v20, %v3605_v32 }
 0xac9   : > { %v3695_v25 = vpop.f32.mrf.mxu0 }
 0xaca   : > { %v6199_v36 = vpack.i.bf16 %v3705_v38, %v3704_v48  ;;  %v3696_v33 = vadd.f32 %v3695_v25, %v3600_v8  ;;  %v3707_v52 = vmax.f32 %v3701_v5, 0.0 }
 0xacc   : > { %v3706_v15 = vmax.f32 %v3696_v33, 0.0  ;;  %6200 = vrot.lane.b32.xlu1 %v6199_v36, %s6459_s8 }
 0xace   : > { %v6204_v47 = vpack.i.bf16 %v3707_v52, %v3706_v15 }
 0xad0   : > { %6205 = vrot.lane.b32.xlu0 %v6204_v47, %s6459_s8 }
 0xb3e   : > { %v6201_v24 = vpop.permute.xlu1 %6200 }
 0xb3f   : > { %v6203_v50 = vunpack.i.h.bf16 %v6201_v24  ;;  %v6202_v40 = vunpack.i.l.bf16 %v6201_v24 }
 0xb41   : > { %v3717_v53 = vmax.f32 %v3705_v38, %v6203_v50  ;;  %v3716_v18 = vmax.f32 %v3704_v48, %v6202_v40 }
 0xb42   : > { %v6206_v62 = vpop.permute.xlu0 %6205 }
 0xb43   : > { %v6208_v49 = vunpack.i.h.bf16 %v6206_v62  ;;  %v6207_v56 = vunpack.i.l.bf16 %v6206_v62  ;;  %5666 = vmatprep.mubr.f32.mxu1 %v3716_v18 }
 0xb44   : > { %5667 = vmatmul.mubr.f32.vlgmr.msra.gmra.mxu1 %v3717_v53 }
 0xb45   : > { %v3719_v3 = vmax.f32 %v3707_v52, %v6208_v49  ;;  %v3718_v23 = vmax.f32 %v3706_v15, %v6207_v56  ;;  %5703 = vmatpush3.msra.mxu1 %v8592_v9 }
 0xb46   : > { %5704 = vmatprep.subr.mxu1 %v8594_v41 }
 0xb47   : > { %5669 = vmatprep.mubr.f32.mxu1 %v3718_v23  ;;  %5705 = vmatpush3.msra.mxu1 %v8594_v41 }
 0xb48   : > { %5670 = vmatmul.mubr.f32.gmra.mxu1 %v3719_v3  ;;  %5706 = vmatprep.subr.mxu1 %v8598_v29 }
 0xb49   : > { %5707 = vmatpush3.msra.mxu1 %v8598_v29 }
 0xb4a   : > { %5708 = vmatprep.subr.mxu1 %v8602_v51 }
 0xb4b   : > { %5709 = vmatpush3.msra.mxu1 %v8602_v51 }
 0xb4c   : > { %5710 = vmatprep.subr.mxu1 %v8606_v61 }
 0xb4d   : > { %5711 = vmatpush3.msra.mxu1 %v8606_v61 }
 0xb4e   : > { %5712 = vmatprep.subr.mxu1 %v8610_v1 }
 0xb4f   : > { %5713 = vmatpush3.msra.mxu1 %v8610_v1 }
 0xb50   : > { %5714 = vmatprep.subr.mxu1 %v8614_v6 }
 0xb51   : > { %5715 = vmatpush3.msra.mxu1 %v8614_v6 }
 0xb52   : > { %5716 = vmatprep.subr.mxu1 %v8618_v58 }
 0xb53   : > { %5717 = vmatpush3.msra.mxu1 %v8618_v58 }
 0xb54   : > { %5718 = vmatprep.subr.mxu1 %v8622_v46 }
 0xb55   : > { %5719 = vmatpush3.msra.mxu1 %v8622_v46 }
 0xb56   : > { %5720 = vmatprep.subr.mxu1 %v8626_v16 }
 0xb57   : > { %5721 = vmatpush3.msra.mxu1 %v8626_v16 }
 0xb58   : > { %5722 = vmatprep.subr.mxu1 %v8630_v55 }
 0xb59   : > { %5723 = vmatpush3.msra.mxu1 %v8630_v55 }
 0xb5a   : > { %5724 = vmatprep.subr.mxu1 %v8634_v39 }
 0xb5b   : > { %5725 = vmatpush3.msra.mxu1 %v8634_v39 }
 0xb5c   : > { %5726 = vmatprep.subr.mxu1 %v8638_v21 }
 0xb5d   : > { %5727 = vmatpush3.msra.mxu1 %v8638_v21 }
 0xb5e   : > { %5728 = vmatprep.subr.mxu1 %v8642_v2 }
 0xb5f   : > { %5729 = vmatpush3.msra.mxu1 %v8642_v2 }
 0xb60   : > { %5730 = vmatprep.subr.mxu1 %v8648_v10 }
 0xb61   : > { %5731 = vmatpush3.msra.mxu1 %v8648_v10 }
 0xb62   : > { %5732 = vmatprep.subr.mxu1 %v8651_v60 }
 0xb63   : > { %5733 = vmatpush3.msra.mxu1 %v8651_v60 }
 0xc04   : > { %v5668_v0 = vpop.f32.mrf.mxu1 }
 0xc06   : > { %v3802_v13 = vpop.f32.mrf.mxu1 }
 0xc08   : > { %v5671_v12 = vpop.f32.mrf.mxu1 }
 0xc09   : > { %3842 = vrot.lane.b32.xlu1 %v5671_v12, %s6459_s8 }
 0xc0a   : > { %v3812_v54 = vpop.f32.mrf.mxu1 }
 0xc0b   : > { %3840 = vrot.lane.b32.xlu0 %v3812_v54, %s6459_s8 }
 0xc0d   : > { %3838 = vrot.lane.b32.xlu1 %v5668_v0, %s6459_s8 }
 0xc0f   : > { %3836 = vrot.lane.b32.xlu0 %v3802_v13, %s6459_s8 }
 0xc11   : > { %3829 = vrot.lane.b32.xlu1 %v5671_v12, %s6460_s10 }
 0xc13   : > { %3827 = vrot.lane.b32.xlu0 %v3812_v54, %s6460_s10 }
 0xc15   : > { %3825 = vrot.lane.b32.xlu1 %v5668_v0, %s6460_s10 }
 0xc17   : > { %3823 = vrot.lane.b32.xlu0 %v3802_v13, %s6460_s10 }
 0xc19   : > { %3860 = vperm.xlu1 %6068, %v5240_v37  }
 0xc1b   : > { %3865 = vperm.xlu0 %6067, %v5241_v17  }
 0xc1d   : > { %3870 = vperm.xlu1 %6068, %v5242_v42   ;;  %v4104_v42 = vld [vmem:[#allocation6 + $0xa0] sm:$0xff] }
 0xc1f   : > { %3875 = vperm.xlu0 %6067, %v5243_v27   ;;  %v5264_v27 = vld [vmem:[%s8972_s2 + $0xa0] sm:$0xff] }
 0xc7b   : > { %v3843_v19 = vpop.permute.xlu1 %3842 }
 0xc7c   : > { %5672 = vmatprep.subr.msk.mxu0 %vm5355_vm1, %v3843_v19 }
 0xc7d   : > { %5673 = vmatpush3.msk.msra.mxu0 %vm5355_vm1, %v3843_v19  ;;  %v3841_v14 = vpop.permute.xlu0 %3840  ;;  %v5266_v19 = vld [vmem:[%s8972_s2 + $0xb0] sm:$0xff] }
 0xc7e   : > { %5674 = vmatprep.subr.msk.mxu0 %vm5355_vm1, %v3841_v14 }
 0xc7f   : > { %v3839_v43 = vpop.permute.xlu1 %3838  ;;  %5675 = vmatpush3.msk.msra.mxu0 %vm5355_vm1, %v3841_v14  ;;  %v5267_v14 = vld [vmem:[%s8972_s2 + $0xb8] sm:$0xff] }
 0xc80   : > { %5676 = vmatprep.subr.msk.mxu0 %vm5355_vm1, %v3839_v43 }
 0xc81   : > { %5677 = vmatpush3.msk.msra.mxu0 %vm5355_vm1, %v3839_v43  ;;  %v3837_v63 = vpop.permute.xlu0 %3836  ;;  %v4076_v43 = vand.u32 15, %v6882_v35 }
 0xc82   : > { %5678 = vmatprep.subr.msk.mxu0 %vm5355_vm1, %v3837_v63 }
 0xc83   : > { %5679 = vmatpush3.msk.msra.mxu0 %vm5355_vm1, %v3837_v63  ;;  %v3830_v34 = vpop.permute.xlu1 %3829  ;;  %vm5357_vm3 = vcmp.ne.s32.totalorder %v4076_v43, 15  ;;  %vm5358_vm5 = vcmp.ne.s32.totalorder %v4076_v43, 0  ;;  %v5289_v43 = vld [vmem:[%s8972_s2 + $0xc8] sm:$0xff] }
 0xc84   : > { %5680 = vmatprep.subr.mxu0 %v5671_v12 }
 0xc85   : > { %5681 = vmatpush3.msra.mxu0 %v5671_v12  ;;  %v3828_v7 = vpop.permute.xlu0 %3827 }
 0xc86   : > { %5682 = vmatprep.subr.mxu0 %v3812_v54 }
 0xc87   : > { %5683 = vmatpush3.msra.mxu0 %v3812_v54  ;;  %v3826_v11 = vpop.permute.xlu1 %3825 }
 0xc88   : > { %5684 = vmatprep.subr.mxu0 %v5668_v0 }
 0xc89   : > { %5685 = vmatpush3.msra.mxu0 %v5668_v0  ;;  %v3824_v26 = vpop.permute.xlu0 %3823 }
 0xc8a   : > { %5686 = vmatprep.subr.mxu0 %v3802_v13 }
 0xc8b   : > { %5687 = vmatpush3.msra.mxu0 %v3802_v13 }
 0xc8c   : > { %5688 = vmatprep.subr.msk.mxu0 %vm5356_vm2, %v3830_v34 }
 0xc8d   : > { %5689 = vmatpush3.msk.msra.mxu0 %vm5356_vm2, %v3830_v34 }
 0xc8e   : > { %5690 = vmatprep.subr.msk.mxu0 %vm5356_vm2, %v3828_v7 }
 0xc8f   : > { %5691 = vmatpush3.msk.msra.mxu0 %vm5356_vm2, %v3828_v7 }
 0xc90   : > { %5692 = vmatprep.subr.msk.mxu0 %vm5356_vm2, %v3826_v11 }
 0xc91   : > { %5693 = vmatpush3.msk.msra.mxu0 %vm5356_vm2, %v3826_v11 }
 0xc92   : > { %5694 = vmatprep.subr.msk.mxu0 %vm5356_vm2, %v3824_v26 }
 0xc93   : > { %5695 = vmatpush3.msk.msra.mxu0 %vm5356_vm2, %v3824_v26 }
 0xc94   : > { %5697 = vmatmul.mubr.msk.f32.vlgmr.msra.gmra.mxu0 %vm693_vm4, %v3850_v30  ;;  %v3861_v57 = vpop.permute.xlu1 %3860 }
 0xc95   : > { %5699 = vmatprep.mubr.msk.f32.mxu0 %vm693_vm4, %v3851_v44 }
 0xc96   : > { %v3866_v28 = vpop.permute.xlu0 %3865 }
 0xc98   : > { %5700 = vmatmul.mubr.msk.f32.gmra.mxu0 %vm693_vm4, %v3852_v22  ;;  %v3871_v33 = vpop.permute.xlu1 %3870 }
 0xc99   : > { %5764 = vmatprep.mubr.msk.f32.mxu0 %vm693_vm4, %v4104_v42 }
 0xc9a   : > { %v3876_v48 = vpop.permute.xlu0 %3875 }
 0xd54   : > { %v5698_v31 = vpop.f32.mrf.mxu0 }
 0xd55   : > { %v3962_v32 = vadd.f32 %v5698_v31, %v3866_v28  ;;  %v4105_v28 = vld [vmem:[#allocation6 + $0xa8] sm:$0xff]  ;;  %v4107_v31 = vld [vmem:[#allocation6 + $0xb8] sm:$0xff] }
 0xd56   : > { %v3956_v20 = vpop.f32.mrf.mxu0 }
 0xd57   : > { %v3957_v38 = vadd.f32 %v3956_v20, %v3861_v57  ;;  %v3976_v8 = vmax.f32 %v3962_v32, 0.0  ;;  %v4106_v57 = vld [vmem:[#allocation6 + $0xb0] sm:$0xff] }
 0xd58   : > { %v5701_v5 = vpop.f32.mrf.mxu0 }
 0xd59   : > { %v3975_v25 = vmax.f32 %v3957_v38, 0.0  ;;  %v3972_v36 = vadd.f32 %v5701_v5, %v3876_v48 }
 0xd5a   : > { %v3966_v52 = vpop.f32.mrf.mxu0 }
 0xd5b   : > { %v6209_v15 = vpack.i.bf16 %v3976_v8, %v3975_v25  ;;  %v3967_v47 = vadd.f32 %v3966_v52, %v3871_v33  ;;  %v3978_v24 = vmax.f32 %v3972_v36, 0.0 }
 0xd5d   : > { %v3977_v50 = vmax.f32 %v3967_v47, 0.0  ;;  %6210 = vrot.lane.b32.xlu1 %v6209_v15, %s6459_s8 }
 0xd5f   : > { %v6214_v40 = vpack.i.bf16 %v3978_v24, %v3977_v50 }
 0xd61   : > { %6215 = vrot.lane.b32.xlu0 %v6214_v40, %s6459_s8 }
 0xdcf   : > { %v6211_v53 = vpop.permute.xlu1 %6210 }
 0xdd0   : > { %v6213_v18 = vunpack.i.h.bf16 %v6211_v53  ;;  %v6212_v62 = vunpack.i.l.bf16 %v6211_v53 }
 0xdd2   : > { %v3988_v49 = vmax.f32 %v3976_v8, %v6213_v18  ;;  %v3987_v56 = vmax.f32 %v3975_v25, %v6212_v62 }
 0xdd3   : > { %v6216_v3 = vpop.permute.xlu0 %6215 }
 0xdd4   : > { %v6218_v23 = vunpack.i.h.bf16 %v6216_v3  ;;  %v6217_v0 = vunpack.i.l.bf16 %v6216_v3  ;;  %5734 = vmatprep.mubr.f32.mxu1 %v3987_v56 }
 0xdd5   : > { %5735 = vmatmul.mubr.f32.vlgmr.msra.gmra.mxu1 %v3988_v49 }
 0xdd6   : > { %v3990_v13 = vmax.f32 %v3978_v24, %v6218_v23  ;;  %v3989_v12 = vmax.f32 %v3977_v50, %v6217_v0 }
 0xdd8   : > { %5737 = vmatprep.mubr.f32.mxu1 %v3989_v12 }
 0xdd9   : > { %5738 = vmatmul.mubr.f32.gmra.mxu1 %v3990_v13 }
 0xe95   : > { %v5736_v54 = vpop.f32.mrf.mxu1 }
 0xe97   : > { %v4057_v59 = vpop.f32.mrf.mxu1 }
 0xe99   : > { %v5739_v37 = vpop.f32.mrf.mxu1 }
 0xe9a   : > { %4097 = vrot.lane.b32.xlu1 %v5739_v37, %s6459_s8 }
 0xe9b   : > { %v4067_v17 = vpop.f32.mrf.mxu1 }
 0xe9c   : > { %4095 = vrot.lane.b32.xlu0 %v4067_v17, %s6459_s8 }
 0xe9e   : > { %4093 = vrot.lane.b32.xlu1 %v5736_v54, %s6459_s8 }
 0xea0   : > { %4091 = vrot.lane.b32.xlu0 %v4057_v59, %s6459_s8 }
 0xea2   : > { %4084 = vrot.lane.b32.xlu1 %v5739_v37, %s6460_s10 }
 0xea4   : > { %4082 = vrot.lane.b32.xlu0 %v4067_v17, %s6460_s10 }
 0xea6   : > { %4080 = vrot.lane.b32.xlu1 %v5736_v54, %s6460_s10 }
 0xea8   : > { %4078 = vrot.lane.b32.xlu0 %v4057_v59, %s6460_s10 }
 0xeaa   : > { %4115 = vperm.xlu1 %6068, %v5264_v27  }
 0xeac   : > { %4120 = vperm.xlu0 %6067, %v5265_v4  }
 0xeae   : > { %4125 = vperm.xlu1 %6068, %v5266_v19   ;;  %v4359_v19 = vld [vmem:[#allocation6 + $0xc0] sm:$0xff] }
 0xeaf   : > { %5832 = vmatprep.mubr.msk.f32.mxu1 %vm693_vm4, %v4359_v19  ;;  %v4615_v19 = vld [vmem:[#allocation6 + $0xe8] sm:$0xff] }
 0xeb0   : > { %4130 = vperm.xlu0 %6067, %v5267_v14   ;;  %v5288_v14 = vld [vmem:[%s8972_s2 + $0xc0] sm:$0xff] }
 0xf0c   : > { %v4098_v63 = vpop.permute.xlu1 %4097 }
 0xf0d   : > { %5740 = vmatprep.subr.msk.mxu0 %vm5357_vm3, %v4098_v63 }
 0xf0e   : > { %5741 = vmatpush3.msk.msra.mxu0 %vm5357_vm3, %v4098_v63  ;;  %v4096_v34 = vpop.permute.xlu0 %4095  ;;  %v5290_v63 = vld [vmem:[%s8972_s2 + $0xd0] sm:$0xff] }
 0xf0f   : > { %5742 = vmatprep.subr.msk.mxu0 %vm5357_vm3, %v4096_v34 }
 0xf10   : > { %v4094_v7 = vpop.permute.xlu1 %4093  ;;  %5743 = vmatpush3.msk.msra.mxu0 %vm5357_vm3, %v4096_v34  ;;  %v5291_v34 = vld [vmem:[%s8972_s2 + $0xd8] sm:$0xff] }
 0xf11   : > { %5744 = vmatprep.subr.msk.mxu0 %vm5357_vm3, %v4094_v7 }
 0xf12   : > { %5745 = vmatpush3.msk.msra.mxu0 %vm5357_vm3, %v4094_v7  ;;  %v4092_v11 = vpop.permute.xlu0 %4091  ;;  %v4331_v7 = vand.u32 7, %v6882_v35 }
 0xf13   : > { %5746 = vmatprep.subr.msk.mxu0 %vm5357_vm3, %v4092_v11 }
 0xf14   : > { %5747 = vmatpush3.msk.msra.mxu0 %vm5357_vm3, %v4092_v11  ;;  %v4085_v26 = vpop.permute.xlu1 %4084  ;;  %vm5359_vm6 = vcmp.ne.s32.totalorder %v4331_v7, 7  ;;  %vm5360_vm7 = vcmp.ne.s32.totalorder %v4331_v7, 0  ;;  %v6255_v7 = vld [vmem:[#allocation8 + $0x1a0] sm:$0xff] }
 0xf15   : > { %5748 = vmatprep.subr.mxu0 %v5739_v37 }
 0xf16   : > { %5749 = vmatpush3.msra.mxu0 %v5739_v37  ;;  %v4083_v30 = vpop.permute.xlu0 %4082 }
 0xf17   : > { %5750 = vmatprep.subr.mxu0 %v4067_v17 }
 0xf18   : > { %5751 = vmatpush3.msra.mxu0 %v4067_v17  ;;  %v4081_v44 = vpop.permute.xlu1 %4080 }
 0xf19   : > { %5752 = vmatprep.subr.mxu0 %v5736_v54 }
 0xf1a   : > { %5753 = vmatpush3.msra.mxu0 %v5736_v54  ;;  %v4079_v22 = vpop.permute.xlu0 %4078 }
 0xf1b   : > { %5754 = vmatprep.subr.mxu0 %v4057_v59 }
 0xf1c   : > { %5755 = vmatpush3.msra.mxu0 %v4057_v59 }
 0xf1d   : > { %5756 = vmatprep.subr.msk.mxu0 %vm5358_vm5, %v4085_v26 }
 0xf1e   : > { %5757 = vmatpush3.msk.msra.mxu0 %vm5358_vm5, %v4085_v26 }
 0xf1f   : > { %5758 = vmatprep.subr.msk.mxu0 %vm5358_vm5, %v4083_v30 }
 0xf20   : > { %5759 = vmatpush3.msk.msra.mxu0 %vm5358_vm5, %v4083_v30 }
 0xf21   : > { %5760 = vmatprep.subr.msk.mxu0 %vm5358_vm5, %v4081_v44 }
 0xf22   : > { %5761 = vmatpush3.msk.msra.mxu0 %vm5358_vm5, %v4081_v44 }
 0xf23   : > { %5762 = vmatprep.subr.msk.mxu0 %vm5358_vm5, %v4079_v22 }
 0xf24   : > { %5763 = vmatpush3.msk.msra.mxu0 %vm5358_vm5, %v4079_v22 }
 0xf25   : > { %5765 = vmatmul.mubr.msk.f32.vlgmr.msra.gmra.mxu0 %vm693_vm4, %v4105_v28  ;;  %5770 = vmatprep.subr.mxu0 %v8592_v9  ;;  %v4116_v20 = vpop.permute.xlu1 %4115 }
 0xf26   : > { %5767 = vmatprep.mubr.msk.f32.mxu0 %vm693_vm4, %v4106_v57  ;;  %5771 = vmatpush3.msra.mxu0 %v8592_v9 }
 0xf27   : > { %5772 = vmatprep.subr.mxu0 %v8594_v41  ;;  %v4121_v32 = vpop.permute.xlu0 %4120 }
 0xf28   : > { %5773 = vmatpush3.msra.mxu0 %v8594_v41 }
 0xf29   : > { %5768 = vmatmul.mubr.msk.f32.gmra.mxu0 %vm693_vm4, %v4107_v31  ;;  %5774 = vmatprep.subr.mxu0 %v8598_v29  ;;  %v4126_v47 = vpop.permute.xlu1 %4125 }
 0xf2a   : > { %5775 = vmatpush3.msra.mxu0 %v8598_v29 }
 0xf2b   : > { %5776 = vmatprep.subr.mxu0 %v8602_v51  ;;  %v4131_v25 = vpop.permute.xlu0 %4130 }
 0xf2c   : > { %5777 = vmatpush3.msra.mxu0 %v8602_v51 }
 0xf2d   : > { %5778 = vmatprep.subr.mxu0 %v8606_v61 }
 0xf2e   : > { %5779 = vmatpush3.msra.mxu0 %v8606_v61 }
 0xf2f   : > { %5780 = vmatprep.subr.mxu0 %v8610_v1 }
 0xf30   : > { %5781 = vmatpush3.msra.mxu0 %v8610_v1 }
 0xf31   : > { %5782 = vmatprep.subr.mxu0 %v8614_v6 }
 0xf32   : > { %5783 = vmatpush3.msra.mxu0 %v8614_v6 }
 0xf33   : > { %5784 = vmatprep.subr.mxu0 %v8618_v58 }
 0xf34   : > { %5785 = vmatpush3.msra.mxu0 %v8618_v58 }
 0xf35   : > { %5786 = vmatprep.subr.mxu0 %v8622_v46 }
 0xf36   : > { %5787 = vmatpush3.msra.mxu0 %v8622_v46 }
 0xf37   : > { %5788 = vmatprep.subr.mxu0 %v8626_v16 }
 0xf38   : > { %5789 = vmatpush3.msra.mxu0 %v8626_v16 }
 0xf39   : > { %5790 = vmatprep.subr.mxu0 %v8630_v55 }
 0xf3a   : > { %5791 = vmatpush3.msra.mxu0 %v8630_v55 }
 0xf3b   : > { %5792 = vmatprep.subr.mxu0 %v8634_v39 }
 0xf3c   : > { %5793 = vmatpush3.msra.mxu0 %v8634_v39 }
 0xf3d   : > { %5794 = vmatprep.subr.mxu0 %v8638_v21 }
 0xf3e   : > { %5795 = vmatpush3.msra.mxu0 %v8638_v21 }
 0xf3f   : > { %5796 = vmatprep.subr.mxu0 %v8642_v2 }
 0xf40   : > { %5797 = vmatpush3.msra.mxu0 %v8642_v2 }
 0xf41   : > { %5798 = vmatprep.subr.mxu0 %v8648_v10 }
 0xf42   : > { %5799 = vmatpush3.msra.mxu0 %v8648_v10 }
 0xf43   : > { %5800 = vmatprep.subr.mxu0 %v8651_v60 }
 0xf44   : > { %5801 = vmatpush3.msra.mxu0 %v8651_v60 }
 0xfe5   : > { %v5766_v38 = vpop.f32.mrf.mxu0 }
 0xfe6   : > { %v4217_v48 = vadd.f32 %v5766_v38, %v4121_v32  ;;  %v4360_v32 = vld [vmem:[#allocation6 + $0xc8] sm:$0xff]  ;;  %v4362_v38 = vld [vmem:[#allocation6 + $0xd8] sm:$0xff] }
 0xfe7   : > { %v4211_v5 = vpop.f32.mrf.mxu0 }
 0xfe8   : > { %v4212_v8 = vadd.f32 %v4211_v5, %v4116_v20  ;;  %v4231_v33 = vmax.f32 %v4217_v48, 0.0  ;;  %v4361_v20 = vld [vmem:[#allocation6 + $0xd0] sm:$0xff] }
 0xfe9   : > { %v5769_v36 = vpop.f32.mrf.mxu0 }
 0xfea   : > { %v4230_v52 = vmax.f32 %v4212_v8, 0.0  ;;  %v4227_v15 = vadd.f32 %v5769_v36, %v4131_v25 }
 0xfeb   : > { %v4221_v24 = vpop.f32.mrf.mxu0 }
 0xfec   : > { %v6219_v50 = vpack.i.bf16 %v4231_v33, %v4230_v52  ;;  %v4222_v40 = vadd.f32 %v4221_v24, %v4126_v47  ;;  %v4233_v53 = vmax.f32 %v4227_v15, 0.0 }
 0xfee   : > { %v4232_v18 = vmax.f32 %v4222_v40, 0.0  ;;  %6220 = vrot.lane.b32.xlu1 %v6219_v50, %s6459_s8 }
 0xff0   : > { %v6224_v62 = vpack.i.bf16 %v4233_v53, %v4232_v18 }
 0xff2   : > { %6225 = vrot.lane.b32.xlu0 %v6224_v62, %s6459_s8 }
0x1060   : > { %v6221_v49 = vpop.permute.xlu1 %6220 }
0x1061   : > { %v6223_v56 = vunpack.i.h.bf16 %v6221_v49  ;;  %v6222_v3 = vunpack.i.l.bf16 %v6221_v49 }
0x1063   : > { %v4243_v23 = vmax.f32 %v4231_v33, %v6223_v56  ;;  %v4242_v0 = vmax.f32 %v4230_v52, %v6222_v3  ;;  %v4614_v56 = vld [vmem:[#allocation6 + $0xe0] sm:$0xff] }
0x1064   : > { %v6226_v13 = vpop.permute.xlu0 %6225  ;;  %v5312_v3 = vld [vmem:[%s8972_s2 + $0xe0] sm:$0xff] }
0x1065   : > { %v6228_v12 = vunpack.i.h.bf16 %v6226_v13  ;;  %v6227_v54 = vunpack.i.l.bf16 %v6226_v13  ;;  %5802 = vmatprep.mubr.f32.mxu0 %v4242_v0  ;;  %v5314_v0 = vld [vmem:[%s8972_s2 + $0xf0] sm:$0xff]  ;;  %v5315_v13 = vld [vmem:[%s8972_s2 + $0xf8] sm:$0xff] }
0x1066   : > { %5803 = vmatmul.mubr.f32.vlgmr.msra.gmra.mxu0 %v4243_v23  ;;  %v5313_v23 = vld [vmem:[%s8972_s2 + $0xe8] sm:$0xff] }
0x1067   : > { %v4245_v59 = vmax.f32 %v4233_v53, %v6228_v12  ;;  %v4244_v37 = vmax.f32 %v4232_v18, %v6227_v54  ;;  %v4586_v12 = vand.u32 3, %v6882_v35 }
0x1069   : > { %5805 = vmatprep.mubr.f32.mxu0 %v4244_v37  ;;  %vm5361_vm8 = vcmp.ne.s32.totalorder %v4586_v12, 3  ;;  %vm5362_vm9 = vcmp.ne.s32.totalorder %v4586_v12, 0  ;;  %v4867_v12 = vld [vmem:[%s8975_s5 + $0x48] sm:$0xff] }
0x106a   : > { %5806 = vmatmul.mubr.f32.gmra.mxu0 %v4245_v59 }
0x106b   : > { %5900 = vmatprep.mubr.msk.f32.mxu0 %vm693_vm4, %v4614_v56 }
0x1126   : > { %v5804_v17 = vpop.f32.mrf.mxu0 }
0x1128   : > { %v4312_v42 = vpop.f32.mrf.mxu0 }
0x112a   : > { %v5807_v27 = vpop.f32.mrf.mxu0 }
0x112b   : > { %4352 = vrot.lane.b32.xlu1 %v5807_v27, %s6459_s8 }
0x112c   : > { %v4322_v4 = vpop.f32.mrf.mxu0 }
0x112d   : > { %4350 = vrot.lane.b32.xlu0 %v4322_v4, %s6459_s8 }
0x112f   : > { %4348 = vrot.lane.b32.xlu1 %v5804_v17, %s6459_s8 }
0x1131   : > { %4346 = vrot.lane.b32.xlu0 %v4312_v42, %s6459_s8 }
0x1133   : > { %4339 = vrot.lane.b32.xlu1 %v5807_v27, %s6460_s10 }
0x1135   : > { %4337 = vrot.lane.b32.xlu0 %v4322_v4, %s6460_s10 }
0x1137   : > { %4335 = vrot.lane.b32.xlu1 %v5804_v17, %s6460_s10 }
0x1139   : > { %4333 = vrot.lane.b32.xlu0 %v4312_v42, %s6460_s10 }
0x113b   : > { %4370 = vperm.xlu1 %6068, %v5288_v14   ;;  %v4616_v14 = vld [vmem:[#allocation6 + $0xf0] sm:$0xff] }
0x113d   : > { %4375 = vperm.xlu0 %6067, %v5289_v43   ;;  %v6253_v43 = vld [vmem:[#allocation8 + $0x1e0] sm:$0xff] }
0x113f   : > { %4380 = vperm.xlu1 %6068, %v5290_v63   ;;  %v4617_v63 = vld [vmem:[#allocation6 + $0xf8] sm:$0xff] }
0x1141   : > { %4385 = vperm.xlu0 %6067, %v5291_v34   ;;  %v6254_v34 = vld [vmem:[#allocation8 + $0x1c0] sm:$0xff] }
0x119d   : > { %v4353_v11 = vpop.permute.xlu1 %4352 }
0x119e   : > { %5808 = vmatprep.subr.msk.mxu1 %vm5359_vm6, %v4353_v11 }
0x119f   : > { %5809 = vmatpush3.msk.msra.mxu1 %vm5359_vm6, %v4353_v11  ;;  %v4351_v26 = vpop.permute.xlu0 %4350  ;;  %v6256_v11 = vld [vmem:[#allocation8 + $0x180] sm:$0xff] }
0x11a0   : > { %5810 = vmatprep.subr.msk.mxu1 %vm5359_vm6, %v4351_v26 }
0x11a1   : > { %v4349_v30 = vpop.permute.xlu1 %4348  ;;  %5811 = vmatpush3.msk.msra.mxu1 %vm5359_vm6, %v4351_v26  ;;  %v6257_v26 = vld [vmem:[#allocation8 + $0x160] sm:$0xff] }
0x11a2   : > { %5812 = vmatprep.subr.msk.mxu1 %vm5359_vm6, %v4349_v30 }
0x11a3   : > { %5813 = vmatpush3.msk.msra.mxu1 %vm5359_vm6, %v4349_v30  ;;  %v4347_v44 = vpop.permute.xlu0 %4346  ;;  %v6258_v30 = vld [vmem:[#allocation8 + $0x140] sm:$0xff] }
0x11a4   : > { %5814 = vmatprep.subr.msk.mxu1 %vm5359_vm6, %v4347_v44 }
0x11a5   : > { %5815 = vmatpush3.msk.msra.mxu1 %vm5359_vm6, %v4347_v44  ;;  %v4340_v22 = vpop.permute.xlu1 %4339  ;;  %v6259_v44 = vld [vmem:[#allocation8 + $0x120] sm:$0xff] }
0x11a6   : > { %5816 = vmatprep.subr.mxu1 %v5807_v27 }
0x11a7   : > { %5817 = vmatpush3.msra.mxu1 %v5807_v27  ;;  %v4338_v28 = vpop.permute.xlu0 %4337 }
0x11a8   : > { %5818 = vmatprep.subr.mxu1 %v4322_v4 }
0x11a9   : > { %5819 = vmatpush3.msra.mxu1 %v4322_v4  ;;  %v4336_v57 = vpop.permute.xlu1 %4335 }
0x11aa   : > { %5820 = vmatprep.subr.mxu1 %v5804_v17 }
0x11ab   : > { %5821 = vmatpush3.msra.mxu1 %v5804_v17  ;;  %v4334_v31 = vpop.permute.xlu0 %4333 }
0x11ac   : > { %5822 = vmatprep.subr.mxu1 %v4312_v42 }
0x11ad   : > { %5823 = vmatpush3.msra.mxu1 %v4312_v42 }
0x11ae   : > { %5824 = vmatprep.subr.msk.mxu1 %vm5360_vm7, %v4340_v22 }
0x11af   : > { %5825 = vmatpush3.msk.msra.mxu1 %vm5360_vm7, %v4340_v22  ;;  %v6260_v22 = vld [vmem:[#allocation8 + $0x100] sm:$0xff] }
0x11b0   : > { %5826 = vmatprep.subr.msk.mxu1 %vm5360_vm7, %v4338_v28 }
0x11b1   : > { %5827 = vmatpush3.msk.msra.mxu1 %vm5360_vm7, %v4338_v28  ;;  %v6261_v28 = vld [vmem:[#allocation8 + $0xe0] sm:$0xff] }
0x11b2   : > { %5828 = vmatprep.subr.msk.mxu1 %vm5360_vm7, %v4336_v57 }
0x11b3   : > { %5829 = vmatpush3.msk.msra.mxu1 %vm5360_vm7, %v4336_v57  ;;  %v6262_v57 = vld [vmem:[#allocation8 + $0xc0] sm:$0xff] }
0x11b4   : > { %5830 = vmatprep.subr.msk.mxu1 %vm5360_vm7, %v4334_v31 }
0x11b5   : > { %5831 = vmatpush3.msk.msra.mxu1 %vm5360_vm7, %v4334_v31  ;;  %v6263_v31 = vld [vmem:[#allocation8 + $0xa0] sm:$0xff] }
0x11b6   : > { %5833 = vmatmul.mubr.msk.f32.vlgmr.msra.gmra.mxu1 %vm693_vm4, %v4360_v32  ;;  %5838 = vmatprep.subr.mxu1 %v8592_v9  ;;  %v6264_v32 = vld [vmem:[#allocation8 + $0x80] sm:$0xff] }
0x11b7   : > { %5835 = vmatprep.mubr.msk.f32.mxu1 %vm693_vm4, %v4361_v20  ;;  %5839 = vmatpush3.msra.mxu1 %v8592_v9  ;;  %v6265_v20 = vld [vmem:[#allocation8 + $0x60] sm:$0xff] }
0x11b8   : > { %5840 = vmatprep.subr.mxu1 %v8594_v41  ;;  %v4376_v9 = vpop.permute.xlu0 %4375 }
0x11b9   : > { %5841 = vmatpush3.msra.mxu1 %v8594_v41  ;;  %v4371_v41 = vpop.permute.xlu1 %4370 }
0x11ba   : > { %5836 = vmatmul.mubr.msk.f32.gmra.mxu1 %vm693_vm4, %v4362_v38  ;;  %5842 = vmatprep.subr.mxu1 %v8598_v29  ;;  %v6266_v38 = vld [vmem:[#allocation8 + $0x40] sm:$0xff] }
0x11bb   : > { %5843 = vmatpush3.msra.mxu1 %v8598_v29 }
0x11bc   : > { %5844 = vmatprep.subr.mxu1 %v8602_v51 }
0x11bd   : > { %5845 = vmatpush3.msra.mxu1 %v8602_v51 }
0x11be   : > { %5846 = vmatprep.subr.mxu1 %v8606_v61 }
0x11bf   : > { %5847 = vmatpush3.msra.mxu1 %v8606_v61 }
0x11c0   : > { %5848 = vmatprep.subr.mxu1 %v8610_v1 }
0x11c1   : > { %5849 = vmatpush3.msra.mxu1 %v8610_v1 }
0x11c2   : > { %5850 = vmatprep.subr.mxu1 %v8614_v6 }
0x11c3   : > { %5851 = vmatpush3.msra.mxu1 %v8614_v6  ;;  %v4386_v6 = vpop.permute.xlu0 %4385 }
0x11c4   : > { %5852 = vmatprep.subr.mxu1 %v8618_v58 }
0x11c5   : > { %5853 = vmatpush3.msra.mxu1 %v8618_v58 }
0x11c6   : > { %5854 = vmatprep.subr.mxu1 %v8622_v46 }
0x11c7   : > { %5855 = vmatpush3.msra.mxu1 %v8622_v46 }
0x11c8   : > { %5856 = vmatprep.subr.mxu1 %v8626_v16 }
0x11c9   : > { %5857 = vmatpush3.msra.mxu1 %v8626_v16 }
0x11ca   : > { %5858 = vmatprep.subr.mxu1 %v8630_v55 }
0x11cb   : > { %5859 = vmatpush3.msra.mxu1 %v8630_v55 }
0x11cc   : > { %5860 = vmatprep.subr.mxu1 %v8634_v39 }
0x11cd   : > { %5861 = vmatpush3.msra.mxu1 %v8634_v39  ;;  %v4381_v39 = vpop.permute.xlu1 %4380 }
0x11ce   : > { %5862 = vmatprep.subr.mxu1 %v8638_v21 }
0x11cf   : > { %5863 = vmatpush3.msra.mxu1 %v8638_v21 }
0x11d0   : > { %5864 = vmatprep.subr.mxu1 %v8642_v2 }
0x11d1   : > { %5865 = vmatpush3.msra.mxu1 %v8642_v2 }
0x11d2   : > { %5866 = vmatprep.subr.mxu1 %v8648_v10 }
0x11d3   : > { %5867 = vmatpush3.msra.mxu1 %v8648_v10 }
0x11d4   : > { %5868 = vmatprep.subr.mxu1 %v8651_v60 }
0x11d5   : > { %5869 = vmatpush3.msra.mxu1 %v8651_v60 }
0x11d6   : > { %5944 = vmatprep.subr.mxu1 %v9081_v45 }
0x1276   : > { %v5834_v29 = vpop.f32.mrf.mxu1 }
0x1277   : > { %v4472_v51 = vadd.f32 %v5834_v29, %v4376_v9  ;;  %v6267_v9 = vld [vmem:[#allocation8 + $0x20] sm:$0xff] }
0x1278   : > { %v4466_v61 = vpop.f32.mrf.mxu1 }
0x1279   : > { %v4467_v1 = vadd.f32 %v4466_v61, %v4371_v41  ;;  %v4486_v46 = vmax.f32 %v4472_v51, 0.0  ;;  %v6268_v41 = vld [vmem:[#allocation8] sm:$0xff] }
0x127a   : > { %v5837_v58 = vpop.f32.mrf.mxu1 }
0x127b   : > { %v4485_v16 = vmax.f32 %v4467_v1, 0.0  ;;  %v4482_v55 = vadd.f32 %v5837_v58, %v4386_v6 }
0x127c   : > { %v4476_v21 = vpop.f32.mrf.mxu1 }
0x127d   : > { %v6229_v2 = vpack.i.bf16 %v4486_v46, %v4485_v16  ;;  %v4477_v10 = vadd.f32 %v4476_v21, %v4381_v39  ;;  %v4488_v48 = vmax.f32 %v4482_v55, 0.0 }
0x127f   : > { %v4487_v5 = vmax.f32 %v4477_v10, 0.0  ;;  %6230 = vrot.lane.b32.xlu1 %v6229_v2, %s6459_s8 }
0x1281   : > { %v6234_v60 = vpack.i.bf16 %v4488_v48, %v4487_v5 }
0x1283   : > { %6235 = vrot.lane.b32.xlu0 %v6234_v60, %s6459_s8 }
0x12f1   : > { %v6231_v8 = vpop.permute.xlu1 %6230 }
0x12f2   : > { %v6233_v25 = vunpack.i.h.bf16 %v6231_v8  ;;  %v6232_v36 = vunpack.i.l.bf16 %v6231_v8 }
0x12f4   : > { %v4498_v33 = vmax.f32 %v4486_v46, %v6233_v25  ;;  %v4497_v52 = vmax.f32 %v4485_v16, %v6232_v36  ;;  %v4873_v25 = vld [vmem:[%s8975_s5 + $0x78] sm:$0xff]  ;;  %v4872_v36 = vld [vmem:[%s8975_s5 + $0x70] sm:$0xff] }
0x12f5   : > { %v6236_v15 = vpop.permute.xlu0 %6235 }
0x12f6   : > { %v6238_v47 = vunpack.i.h.bf16 %v6236_v15  ;;  %v6237_v24 = vunpack.i.l.bf16 %v6236_v15  ;;  %5870 = vmatprep.mubr.f32.mxu1 %v4497_v52  ;;  %v4871_v15 = vld [vmem:[%s8975_s5 + $0x68] sm:$0xff] }
0x12f7   : > { %5871 = vmatmul.mubr.f32.vlgmr.msra.gmra.mxu1 %v4498_v33  ;;  %v4874_v33 = vld [vmem:[#allocation2] sm:$0x1] }
0x12f8   : > { %v4500_v50 = vmax.f32 %v4488_v48, %v6238_v47  ;;  %v4499_v40 = vmax.f32 %v4487_v5, %v6237_v24  ;;  %5945 = vmatpush3.msra.mxu1 %v4873_v25 }
0x12f9   : > { %5946 = vmatprep.subr.mxu1 %v9081_v45 }
0x12fa   : > { %5873 = vmatprep.mubr.f32.mxu1 %v4499_v40  ;;  %5947 = vmatpush3.msra.mxu1 %v4872_v36 }
0x12fb   : > { %5874 = vmatmul.mubr.f32.gmra.mxu1 %v4500_v50  ;;  %5948 = vmatprep.subr.mxu1 %v9081_v45 }
0x12fc   : > { %5949 = vmatpush3.msra.mxu1 %v4871_v15 }
0x12fd   : > { %5950 = vmatprep.subr.mxu1 %v9081_v45 }
0x13b7   : > { %v5872_v53 = vpop.f32.mrf.mxu1 }
0x13b9   : > { %v4567_v18 = vpop.f32.mrf.mxu1 }
0x13bb   : > { %v5875_v62 = vpop.f32.mrf.mxu1 }
0x13bc   : > { %4607 = vrot.lane.b32.xlu1 %v5875_v62, %s6459_s8 }
0x13bd   : > { %v4577_v49 = vpop.f32.mrf.mxu1 }
0x13be   : > { %4605 = vrot.lane.b32.xlu0 %v4577_v49, %s6459_s8 }
0x13c0   : > { %4603 = vrot.lane.b32.xlu1 %v5872_v53, %s6459_s8 }
0x13c2   : > { %4601 = vrot.lane.b32.xlu0 %v4567_v18, %s6459_s8 }
0x13c4   : > { %4594 = vrot.lane.b32.xlu1 %v5875_v62, %s6460_s10 }
0x13c6   : > { %4592 = vrot.lane.b32.xlu0 %v4577_v49, %s6460_s10 }
0x13c8   : > { %4590 = vrot.lane.b32.xlu1 %v5872_v53, %s6460_s10 }
0x13ca   : > { %4588 = vrot.lane.b32.xlu0 %v4567_v18, %s6460_s10 }
0x13cc   : > { %4625 = vperm.xlu1 %6068, %v5312_v3  }
0x13ce   : > { %4630 = vperm.xlu0 %6067, %v5313_v23   ;;  %v4870_v23 = vld [vmem:[%s8975_s5 + $0x60] sm:$0xff] }
0x13cf   : > { %5951 = vmatpush3.msra.mxu1 %v4870_v23 }
0x13d0   : > { %4635 = vperm.xlu1 %6068, %v5314_v0   ;;  %5952 = vmatprep.subr.mxu1 %v9081_v45  ;;  %v4869_v0 = vld [vmem:[%s8975_s5 + $0x58] sm:$0xff] }
0x13d1   : > { %5953 = vmatpush3.msra.mxu1 %v4869_v0 }
0x13d2   : > { %4640 = vperm.xlu0 %6067, %v5315_v13   ;;  %5954 = vmatprep.subr.mxu1 %v9081_v45  ;;  %v4868_v13 = vld [vmem:[%s8975_s5 + $0x50] sm:$0xff] }
0x13d3   : > { %5955 = vmatpush3.msra.mxu1 %v4868_v13 }
0x13d4   : > { %5956 = vmatprep.subr.mxu1 %v9081_v45 }
0x13d5   : > { %5957 = vmatpush3.msra.mxu1 %v4867_v12 }
0x13d6   : > { %5958 = vmatprep.subr.mxu1 %v9081_v45 }
0x142e   : > { %v4608_v54 = vpop.permute.xlu1 %4607 }
0x142f   : > { %5876 = vmatprep.subr.msk.mxu0 %vm5361_vm8, %v4608_v54 }
0x1430   : > { %5877 = vmatpush3.msk.msra.mxu0 %vm5361_vm8, %v4608_v54  ;;  %v4606_v59 = vpop.permute.xlu0 %4605  ;;  %v4866_v54 = vld [vmem:[%s8975_s5 + $0x40] sm:$0xff] }
0x1431   : > { %5878 = vmatprep.subr.msk.mxu0 %vm5361_vm8, %v4606_v59  ;;  %5959 = vmatpush3.msra.mxu1 %v4866_v54 }
0x1432   : > { %v4604_v37 = vpop.permute.xlu1 %4603  ;;  %5879 = vmatpush3.msk.msra.mxu0 %vm5361_vm8, %v4606_v59  ;;  %5960 = vmatprep.subr.mxu1 %v9081_v45  ;;  %v4865_v59 = vld [vmem:[%s8975_s5 + $0x38] sm:$0xff] }
0x1433   : > { %5880 = vmatprep.subr.msk.mxu0 %vm5361_vm8, %v4604_v37  ;;  %5961 = vmatpush3.msra.mxu1 %v4865_v59 }
0x1434   : > { %5881 = vmatpush3.msk.msra.mxu0 %vm5361_vm8, %v4604_v37  ;;  %v4602_v17 = vpop.permute.xlu0 %4601  ;;  %5962 = vmatprep.subr.mxu1 %v9081_v45  ;;  %v4864_v37 = vld [vmem:[%s8975_s5 + $0x30] sm:$0xff] }
0x1435   : > { %5882 = vmatprep.subr.msk.mxu0 %vm5361_vm8, %v4602_v17  ;;  %5963 = vmatpush3.msra.mxu1 %v4864_v37 }
0x1436   : > { %5883 = vmatpush3.msk.msra.mxu0 %vm5361_vm8, %v4602_v17  ;;  %v4595_v42 = vpop.permute.xlu1 %4594  ;;  %5964 = vmatprep.subr.mxu1 %v9081_v45  ;;  %v4863_v17 = vld [vmem:[%s8975_s5 + $0x28] sm:$0xff] }
0x1437   : > { %5884 = vmatprep.subr.mxu0 %v5875_v62  ;;  %5965 = vmatpush3.msra.mxu1 %v4863_v17 }
0x1438   : > { %5885 = vmatpush3.msra.mxu0 %v5875_v62  ;;  %v4593_v35 = vpop.permute.xlu0 %4592  ;;  %5966 = vmatprep.subr.mxu1 %v9081_v45 }
0x1439   : > { %5886 = vmatprep.subr.mxu0 %v4577_v49 }
0x143a   : > { %5887 = vmatpush3.msra.mxu0 %v4577_v49  ;;  %v4591_v27 = vpop.permute.xlu1 %4590 }
0x143b   : > { %5888 = vmatprep.subr.mxu0 %v5872_v53 }
0x143c   : > { %5889 = vmatpush3.msra.mxu0 %v5872_v53  ;;  %v4589_v4 = vpop.permute.xlu0 %4588 }
0x143d   : > { %5890 = vmatprep.subr.mxu0 %v4567_v18 }
0x143e   : > { %5891 = vmatpush3.msra.mxu0 %v4567_v18 }
0x143f   : > { %5892 = vmatprep.subr.msk.mxu0 %vm5362_vm9, %v4595_v42 }
0x1440   : > { %5893 = vmatpush3.msk.msra.mxu0 %vm5362_vm9, %v4595_v42  ;;  %v4862_v42 = vld [vmem:[%s8975_s5 + $0x20] sm:$0xff] }
0x1441   : > { %5894 = vmatprep.subr.msk.mxu0 %vm5362_vm9, %v4593_v35  ;;  %5967 = vmatpush3.msra.mxu1 %v4862_v42 }
0x1442   : > { %5895 = vmatpush3.msk.msra.mxu0 %vm5362_vm9, %v4593_v35  ;;  %5968 = vmatprep.subr.mxu1 %v9081_v45  ;;  %v4861_v35 = vld [vmem:[%s8975_s5 + $0x18] sm:$0xff] }
0x1443   : > { %5896 = vmatprep.subr.msk.mxu0 %vm5362_vm9, %v4591_v27  ;;  %5969 = vmatpush3.msra.mxu1 %v4861_v35 }
0x1444   : > { %5897 = vmatpush3.msk.msra.mxu0 %vm5362_vm9, %v4591_v27  ;;  %5970 = vmatprep.subr.mxu1 %v9081_v45  ;;  %v4860_v27 = vld [vmem:[%s8975_s5 + $0x10] sm:$0xff] }
0x1445   : > { %5898 = vmatprep.subr.msk.mxu0 %vm5362_vm9, %v4589_v4  ;;  %5971 = vmatpush3.msra.mxu1 %v4860_v27 }
0x1446   : > { %5899 = vmatpush3.msk.msra.mxu0 %vm5362_vm9, %v4589_v4  ;;  %5972 = vmatprep.subr.mxu1 %v9081_v45  ;;  %v4859_v4 = vld [vmem:[%s8975_s5 + $0x8] sm:$0xff] }
0x1447   : > { %5901 = vmatmul.mubr.msk.f32.vlgmr.msra.gmra.mxu0 %vm693_vm4, %v4615_v19  ;;  %5906 = vmatprep.subr.mxu0 %v6253_v43  ;;  %v4626_v51 = vpop.permute.xlu1 %4625  ;;  %v4858_v19 = vld [vmem:[%s8975_s5] sm:$0xff] }
0x1448   : > { %5903 = vmatprep.mubr.msk.f32.mxu0 %vm693_vm4, %v4616_v14  ;;  %5907 = vmatpush3.msra.mxu0 %v6253_v43  ;;  %v4841_v43 = vld [vmem:[#allocation9] sm:$0xff] }
0x1449   : > { %5908 = vmatprep.subr.mxu0 %v6254_v34  ;;  %v4631_v29 = vpop.permute.xlu0 %4630  ;;  %5973 = vmatpush3.msra.mxu1 %v4859_v4 }
0x144a   : > { %5909 = vmatpush3.msra.mxu0 %v6254_v34  ;;  %5974 = vmatprep.subr.mxu1 %v9081_v45 }
0x144b   : > { %5904 = vmatmul.mubr.msk.f32.gmra.mxu0 %vm693_vm4, %v4617_v63  ;;  %5910 = vmatprep.subr.mxu0 %v6255_v7  ;;  %v4636_v2 = vpop.permute.xlu1 %4635  ;;  %vm6463_vm4 = vmmov 0   ;;  %v4842_v63 = vld [vmem:[#allocation9 + $0x8] sm:$0xff] }
0x144c   : > { %5911 = vmatpush3.msra.mxu0 %v6255_v7  ;;  %5976 = vmatprep.mubr.msk.f32.mxu1 %vm6463_vm4, %v9081_v45 }
0x144d   : > { %5912 = vmatprep.subr.mxu0 %v6256_v11  ;;  %v4641_v46 = vpop.permute.xlu0 %4640  ;;  %5975 = vmatpush3.msra.mxu1 %v4858_v19 }
0x144e   : > { %5913 = vmatpush3.msra.mxu0 %v6256_v11 }
0x144f   : > { %5914 = vmatprep.subr.mxu0 %v6257_v26 }
0x1450   : > { %5915 = vmatpush3.msra.mxu0 %v6257_v26  ;;  %v4843_v26 = vld [vmem:[#allocation9 + $0x10] sm:$0xff] }
0x1451   : > { %5916 = vmatprep.subr.mxu0 %v6258_v30 }
0x1452   : > { %5917 = vmatpush3.msra.mxu0 %v6258_v30 }
0x1453   : > { %5918 = vmatprep.subr.mxu0 %v6259_v44 }
0x1454   : > { %5919 = vmatpush3.msra.mxu0 %v6259_v44  ;;  %v4844_v44 = vld [vmem:[#allocation9 + $0x18] sm:$0xff] }
0x1455   : > { %5920 = vmatprep.subr.mxu0 %v6260_v22 }
0x1456   : > { %5921 = vmatpush3.msra.mxu0 %v6260_v22 }
0x1457   : > { %5922 = vmatprep.subr.mxu0 %v6261_v28 }
0x1458   : > { %5923 = vmatpush3.msra.mxu0 %v6261_v28 }
0x1459   : > { %5924 = vmatprep.subr.mxu0 %v6262_v57 }
0x145a   : > { %5925 = vmatpush3.msra.mxu0 %v6262_v57 }
0x145b   : > { %5926 = vmatprep.subr.mxu0 %v6263_v31 }
0x145c   : > { %5927 = vmatpush3.msra.mxu0 %v6263_v31 }
0x145d   : > { %5928 = vmatprep.subr.mxu0 %v6264_v32 }
0x145e   : > { %5929 = vmatpush3.msra.mxu0 %v6264_v32 }
0x145f   : > { %5930 = vmatprep.subr.mxu0 %v6265_v20 }
0x1460   : > { %5931 = vmatpush3.msra.mxu0 %v6265_v20 }
0x1461   : > { %5932 = vmatprep.subr.mxu0 %v6266_v38 }
0x1462   : > { %5933 = vmatpush3.msra.mxu0 %v6266_v38 }
0x1463   : > { %5934 = vmatprep.subr.mxu0 %v6267_v9 }
0x1464   : > { %5935 = vmatpush3.msra.mxu0 %v6267_v9 }
0x1465   : > { %5936 = vmatprep.subr.mxu0 %v6268_v41 }
0x1466   : > { %5937 = vmatpush3.msra.mxu0 %v6268_v41 }
0x1507   : > { %v5902_v61 = vpop.f32.mrf.mxu0 }
0x1508   : > { %v4727_v1 = vadd.f32 %v5902_v61, %v4631_v29  ;;  %v9123_v61 = vlaneseq }
0x1509   : > { %v4721_v6 = vpop.f32.mrf.mxu0 }
0x150a   : > { %v4722_v58 = vadd.f32 %v4721_v6, %v4626_v51  ;;  %v4741_v55 = vmax.f32 %v4727_v1, 0.0  ;;  %v4881_v1 = vshrl.u32 %v9123_v61, 7 }
0x150b   : > { %v5905_v16 = vpop.f32.mrf.mxu0 }
0x150c   : > { %v4740_v39 = vmax.f32 %v4722_v58, 0.0  ;;  %v4737_v21 = vadd.f32 %v5905_v16, %v4641_v46  ;;  %v4882_v6 = vsub.s32 0, %v4881_v1 }
0x150d   : > { %v4731_v10 = vpop.f32.mrf.mxu0 }
0x150e   : > { %v6239_v48 = vpack.i.bf16 %v4741_v55, %v4740_v39  ;;  %v4732_v5 = vadd.f32 %v4731_v10, %v4636_v2  ;;  %v4743_v60 = vmax.f32 %v4737_v21, 0.0 }
0x1510   : > { %v4742_v8 = vmax.f32 %v4732_v5, 0.0  ;;  %6240 = vrot.lane.b32.xlu1 %v6239_v48, %s6459_s8 }
0x1512   : > { %v6244_v52 = vpack.i.bf16 %v4743_v60, %v4742_v8 }
0x1514   : > { %4877 = vperm.xlu1 %6068, %v4874_v33   ;;  %6245 = vrot.lane.b32.xlu0 %v6244_v52, %s6459_s8  ;;  %s4975_s8 = sshll.u32 %s341_s13, 4  ;;  %s4976_s8 = int_to_ptr.vmem [resolvable:$true] %s4975_s8 }
0x1515   : > { %s6375_s11 = scalar_lea.vmem %s4976_s8, 16  ;;  %p6382_p5 = scmp.lt.s32.totalorder %s4976_s8, %s6380_s15 }
0x1516   : > { %p6376_p7 = scmp.ne.s32.totalorder %s4976_s8, %s6375_s11  ;;  %p6383_p10 = scmp.lt.s32.totalorder %s6381_s6, %s6375_s11 }
0x1518   : > { %p6377_p13 = pnand %p6376_p7, %p9124_p12  ;;  %p6384_p2 = por %p6383_p10, %p6382_p5 }
0x151a   : > { %p6378_p0 = pneg %p6377_p13 }
0x151c   : > { %p6385_p9 = pnand %p6384_p2, %p6378_p0 }
0x1582   : > { %v6241_v47 = vpop.permute.xlu1 %6240 }
0x1583   : > { %v6243_v24 = vunpack.i.h.bf16 %v6241_v47  ;;  %v6242_v50 = vunpack.i.l.bf16 %v6241_v47 }
0x1585   : > { %v4753_v40 = vmax.f32 %v4741_v55, %v6243_v24  ;;  %v4752_v53 = vmax.f32 %v4740_v39, %v6242_v50 }
0x1586   : > { %v6246_v18 = vpop.permute.xlu0 %6245 }
0x1587   : > { %v6248_v62 = vunpack.i.h.bf16 %v6246_v18  ;;  %v6247_v49 = vunpack.i.l.bf16 %v6246_v18  ;;  %5938 = vmatprep.mubr.f32.mxu0 %v4752_v53 }
0x1588   : > { %5939 = vmatmul.mubr.f32.vlgmr.msra.gmra.mxu0 %v4753_v40 }
0x1589   : > { %v4755_v56 = vmax.f32 %v4743_v60, %v6248_v62  ;;  %v4754_v3 = vmax.f32 %v4742_v8, %v6247_v49 }
0x158b   : > { %5941 = vmatprep.mubr.f32.mxu0 %v4754_v3 }
0x158c   : > { %5942 = vmatmul.mubr.f32.gmra.mxu0 %v4755_v56 }
0x158f   : > { %v4878_v58 = vpop.permute.xlu1 %4877 }
0x1590   : > { %v4883_v46 = vrot.slane %v4878_v58, %v4882_v6 }
0x1648   : > { %v5940_v14 = vpop.f32.mrf.mxu0 }
0x1649   : > { %v4846_v30 = vmul.f32 %v5940_v14, %v4842_v63 }
0x164a   : > { %v4822_v34 = vpop.f32.mrf.mxu0 }
0x164b   : > { %v4845_v7 = vmul.f32 %v4841_v43, %v4822_v34 }
0x164c   : > { %v5943_v11 = vpop.f32.mrf.mxu0 }
0x164d   : > { %v4849_v28 = vadd.f32 %v4846_v30, %v4845_v7  ;;  %v4848_v31 = vmul.f32 %v5943_v11, %v4844_v44 }
0x164e   : > { %v4832_v22 = vpop.f32.mrf.mxu0 }
0x164f   : > { %v4847_v57 = vmul.f32 %v4843_v26, %v4832_v22 }
0x1651   : > { %v4850_v32 = vadd.f32 %v4849_v28, %v4847_v57 }
0x1653   : > { %v4851_v20 = vadd.f32 %v4850_v32, %v4848_v31 }
0x1655   : > { %v4852_v38 = vrot.slane %v4851_v20, 4 }
0x1657   : > { %v4853_v9 = vadd.f32 %v4852_v38, %v4851_v20 }
0x1659   : > { %v4854_v41 = vrot.slane %v4853_v9, 2 }
0x165b   : > { %v4855_v45 = vadd.f32 %v4854_v41, %v4853_v9 }
0x165d   : > { %v4856_v29 = vrot.slane %v4855_v45, 1 }
0x165f   : > { %v4857_v51 = vadd.f32 %v4856_v29, %v4855_v45 }
0x1661   : > { %5977 = vmatmul.mubr.f32.vlgmr.msra.gmra.mxu1 %v4857_v51 }
0x1721   : > { %v4950_v16 = vpop.f32.mrf.mxu1 }
0x1722   : > { %v4951_v55 = vadd.f32 %v4950_v16, %v4883_v46 }
0x1723   : > { %v5978_v39 = vpop.f32.mrf.mxu1 }
0x1724   : > { %v5336_v21 = vmul.f32 -1.442695, %v4951_v55 }
0x1726   : > { %6249 = vpow2.f32 %v5336_v21 }
0x1733   : > { %v6250_v2 = vpop.eup %6249 }
0x1734   : > { %v4957_v10 = vadd.f32 1.0, %v6250_v2 }
0x1736   : > { %6251 = vrcp.f32 %v4957_v10 }
0x1743   : > { %v6252_v48 = vpop.eup %6251 }
0x1744   : > { %4961 = vst.msk [vmem:[%s341_s13] sm:$0x1] %vm4960_vm10, %v6252_v48 }
0x1745   : > { %6388 = shalt.err (!%p6385_p9)
}
0x1746   : > { %s6389_s10 = scalar_lea.hbm %s8933_s22, 16  ;;  %s6393_s18 = scalar_lea.hbm %s8977_s7, 32 }
0x1747   : > { %p6390_p1 = scmp.ne.s32.totalorder %s8933_s22, %s6389_s10  ;;  %p6394_p8 = scmp.lt.s32.totalorder %s8933_s22, %s8977_s7 }
0x1748   : > { %p6395_p3 = scmp.lt.s32.totalorder %s6393_s18, %s6389_s10 }
0x1749   : > { %p6391_p4 = pnand %p6390_p1, %p9124_p12 }
0x174a   : > { %p6396_p11 = por %p6395_p3, %p6394_p8 }
0x174b   : > { %p6392_p6 = pneg %p6391_p4 }
0x174d   : > { %p6397_p7 = pnand %p6396_p11, %p6392_p6 }
0x174f   : > { %6400 = shalt.err (!%p6397_p7)
}
0x1750   : > { %5993 = dma.vmem_to_hbm [thread:$0]  (%p9124_p12), %s4976_s8, 16, %s8933_s22, %s4963_s17  }
0x1751 PF: > { %s4987_s13 = sand.u32 1, %s6435_s26   ;;  %p9125_p13 = scmp.ne.s32.totalorder %s9035_s9, 0 }
0x1752   : > { %p9126_p0 = scmp.ge.s32.totalorder %s6447_s29, 2  ;;  %s4988_s24 = scalar_lea.sflag [#allocation5], %s4987_s13 }
0x1754   : > { %p6010_p5 = pnand %p9126_p0, %p9125_p13 }
0x1756   : > { %p6011_p10 = pneg %p6010_p5 }
0x1758   : > { %6430 = dma.done.wait (%p6011_p10), %s4988_s24, 16  }
0x1759   : > { %6432 = vsyncadd (%p6011_p10), %s4988_s24, 4294967280  ;;  %p24_p2 = scmp.ge.s32.totalorder %s6583_s12, 4   ;;  %s9127_s26 = smov %s6439_s27 }
0x175a   : > { %s9128_s27 = smov %s6443_s28  ;;  %s9129_s28 = smov %s6604_s20 }
0x175b   : > { %s9130_s29 = smov %s6583_s12  ;;  %26 = sbr.rel (!%p24_p2) target bundleno = 10 (0xa), region = 119 }
0x1760   :  { %4992 = vsyncpa [#allocation4], 1 }
0x1761   :  { %4994 = vsyncpa [#allocation4 + $0x1], 1 }
0x1762   :  { %4995 = vsyncpa [#allocation7], 1 }
0x1763   :  { %4996 = vsyncpa [#allocation10], 1 }
0x1764   :  { %4997 = vsyncpa [#allocation5], 1 }
0x1765   :  { %4999 = vsyncpa [#allocation5 + $0x1], 1 }

</bundles_post_ra>
